<compile_context>
chip_gen: v7x
topology: tpu7x:2x2x1
jax: 0.10.0
libtpu: 0.0.40
codegen_flags: <defaults>
</compile_context>

<pallas_src>
import functools

import jax
import jax.numpy as jnp
from jax.experimental import pallas as pl
from jax.experimental.pallas import tpu as pltpu

THRESH = 1e-6   # nn.Threshold(1e-06, 0)
MIN_LEN = 50    # TextEncoderCNN pads the time axis to at least 50
K = 4           # all three Conv1d layers use kernel_size=4
POOL = 3        # MaxPool1d(3, 3)


def _conv_lengths(L):
    """Static length bookkeeping for the conv trunk (floor-mode pooling)."""
    L1 = L - K + 1          # conv1 output length
    P1 = L1 // POOL         # after maxpool1
    L2 = P1 - K + 1         # conv2 output length
    P2 = L2 // POOL         # after maxpool2
    T = P2 - K + 1          # conv3 output length == GRU sequence length
    return L1, P1, L2, P2, T


def _conv_layer(x, w, b, L_out):
    """Valid Conv1d(kernel=4) + Threshold(1e-6, 0), time-major & batch-tiled.

    x: (L_in, Bt, C_in) f32, w: (K*C_in, C_out) bf16, b: (1, C_out) f32
    -> (L_out, Bt, C_out) f32.
    """
    _, Bt, C_in = x.shape
    # im2col: time-axis slices are leading-dim slices (no sublane shuffle).
    cols = jnp.concatenate([x[k:k + L_out] for k in range(K)], axis=-1)
    # Merging (L_out, Bt) with Bt % 8 == 0 keeps the tiled layout -> free.
    cols = cols.reshape(L_out * Bt, K * C_in).astype(jnp.bfloat16)
    y = jnp.dot(cols, w, preferred_element_type=jnp.float32) + b
    y = jnp.where(y > THRESH, y, jnp.float32(0.0))       # Threshold in f32
    return y.reshape(L_out, Bt, w.shape[-1])


def _maxpool3(y, P):
    """MaxPool1d(kernel=3, stride=3) along time. y: (L, Bt, C) -> (P, Bt, C)."""
    _, Bt, C = y.shape
    y4 = y[:POOL * P].reshape(P, POOL, Bt, C)   # leading-dim split: free
    return jnp.maximum(jnp.maximum(y4[:, 0], y4[:, 1]), y4[:, 2])


def _text_encoder_kernel(x_ref, w1_ref, b1_ref, w2_ref, b2_ref, w3_ref,
                         b3_ref, wih_ref, whh_ref, bih_ref, bhh_ref, o_ref,
                         *, L1, P1, L2, P2, T, GP):
    """Conv trunk + GRU for one batch tile (Bt elements), entirely in VMEM."""
    x = x_ref[...]                                        # (L, Bt, word_dim)
    Bt = x.shape[1]

    # --- CNN trunk: one MXU matmul per layer over the whole batch tile ---
    h1 = _conv_layer(x, w1_ref[...], b1_ref[...], L1)     # (L1, Bt, 384)
    p1 = _maxpool3(h1, P1)                                # (P1, Bt, 384)
    h2 = _conv_layer(p1, w2_ref[...], b2_ref[...], L2)    # (L2, Bt, 512)
    p2 = _maxpool3(h2, P2)                                # (P2, Bt, 512)
    h3 = _conv_layer(p2, w3_ref[...], b3_ref[...], T)     # (T, Bt, cnn_dim)

    # --- GRU: input projection hoisted out of the recurrence ---
    cnn_dim = h3.shape[-1]
    gi_all = jnp.dot(h3.reshape(T * Bt, cnn_dim).astype(jnp.bfloat16),
                     wih_ref[...], preferred_element_type=jnp.float32)
    gi_all = (gi_all + bih_ref[...]).reshape(T, Bt, 3 * GP)

    whh = whh_ref[...]                # (GP, 3*GP) f32 — recurrent path in f32
    bhh = bhh_ref[...]
    h = jnp.zeros((Bt, GP), jnp.float32)
    for t in range(T):                # static unroll; T is small
        gi = gi_all[t]                                    # (Bt, 3*GP)
        gh = jnp.dot(h, whh, preferred_element_type=jnp.float32) + bhh
        # gates live in separate 128-lane blocks -> vreg-aligned slices
        r = jax.nn.sigmoid(gi[:, 0:GP] + gh[:, 0:GP])
        z = jax.nn.sigmoid(gi[:, GP:2 * GP] + gh[:, GP:2 * GP])
        n = jnp.tanh(gi[:, 2 * GP:3 * GP] + r * gh[:, 2 * GP:3 * GP])
        h = (1.0 - z) * n + z * h     # padded lanes provably stay 0
    o_ref[...] = h                    # single lane-dense (Bt, GP) store


def _pad_gru_params(params, H, GP):
    """Pad GRU weights so each gate occupies its own GP(=128k)-lane block."""
    cnn_dim = params["w_ih"].shape[0]
    z = lambda s: jnp.zeros(s, jnp.float32)
    wih = z((cnn_dim, 3, GP)).at[:, :, :H].set(
        params["w_ih"].reshape(cnn_dim, 3, H)).reshape(cnn_dim, 3 * GP)
    whh = z((GP, 3, GP)).at[:H, :, :H].set(
        params["w_hh"].reshape(H, 3, H)).reshape(GP, 3 * GP)
    bih = z((1, 3, GP)).at[:, :, :H].set(
        params["b_ih"].reshape(1, 3, H)).reshape(1, 3 * GP)
    bhh = z((1, 3, GP)).at[:, :, :H].set(
        params["b_hh"].reshape(1, 3, H)).reshape(1, 3 * GP)
    return wih, whh, bih, bhh


def text_encoder_fused(x, params, *, block_b=8):
    """x: (L, B, word_dim) f32 time-major (L >= 50) -> (B, embed_dim) f32."""
    L, B, word_dim = x.shape
    L1, P1, L2, P2, T = _conv_lengths(L)
    assert T >= 1, "sequence too short for the conv trunk"
    H = params["w_hh"].shape[0]
    GP = -(-H // 128) * 128                      # per-gate lane padding

    bt = max(8, (block_b // 8) * 8)              # batch tile, multiple of 8
    B_pad = pl.cdiv(B, bt) * bt
    if B_pad != B:
        x = jnp.pad(x, ((0, 0), (0, B_pad - B), (0, 0)))
    nb = B_pad // bt                             # >= 2 for B > bt (v7x 2 TCs)

    # bf16 MXU operands; accumulation + VPU/EUP math stay f32.
    w1 = params["w1"].astype(jnp.bfloat16)
    w2 = params["w2"].astype(jnp.bfloat16)
    w3 = params["w3"].astype(jnp.bfloat16)
    wih, whh, bih, bhh = _pad_gru_params(params, H, GP)
    wih = wih.astype(jnp.bfloat16)

    kernel = functools.partial(_text_encoder_kernel,
                               L1=L1, P1=P1, L2=L2, P2=P2, T=T, GP=GP)
    const = lambda i: (0, 0)   # weights/biases: constant block across grid
    out = pl.pallas_call(
        kernel,
        out_shape=jax.ShapeDtypeStruct((B_pad, GP), jnp.float32),
        grid_spec=pltpu.PrefetchScalarGridSpec(
            num_scalar_prefetch=0,
            grid=(nb,),
            in_specs=[
                pl.BlockSpec((L, bt, word_dim), lambda i: (0, i, 0)),
                pl.BlockSpec(w1.shape, const),
                pl.BlockSpec(params["b1"].shape, const),
                pl.BlockSpec(w2.shape, const),
                pl.BlockSpec(params["b2"].shape, const),
                pl.BlockSpec(w3.shape, const),
                pl.BlockSpec(params["b3"].shape, const),
                pl.BlockSpec(wih.shape, const),
                pl.BlockSpec(whh.shape, const),
                pl.BlockSpec(bih.shape, const),
                pl.BlockSpec(bhh.shape, const),
            ],
            out_specs=pl.BlockSpec((bt, GP), lambda i: (i, 0)),
        ),
        compiler_params=pltpu.CompilerParams(
            dimension_semantics=("parallel",)),   # batch tiles across TCs
    )(x, w1, params["b1"], w2, params["b2"], w3, params["b3"],
      wih, whh, bih, bhh)
    return out[:B, :H]


def init_params(key, alphasize, cnn_dim, embed_dim, word_dim):
    """Deterministic synthetic parameters in kernel-friendly layouts."""
    ks = jax.random.split(key, 11)
    s = 0.1
    rnd = lambda k, shape: jax.random.normal(k, shape, jnp.float32) * s
    return {
        "emb":  rnd(ks[0], (alphasize, word_dim)),        # nn.Embedding
        # Conv1d weights in im2col form (K*C_in, C_out):
        #   w[k*C_in + c_in, c_out] == torch_conv.weight[c_out, c_in, k]
        "w1":   rnd(ks[1], (K * word_dim, 384)),          # Conv1d(word_dim,384,4)
        "b1":   rnd(ks[2], (1, 384)),
        "w2":   rnd(ks[3], (K * 384, 512)),               # Conv1d(384,512,4)
        "b2":   rnd(ks[4], (1, 512)),
        "w3":   rnd(ks[5], (K * 512, cnn_dim)),           # Conv1d(512,cnn_dim,4)
        "b3":   rnd(ks[6], (1, cnn_dim)),
        # GRU weights transposed: (in_dim, 3*hidden), gate order [r|z|n]
        "w_ih": rnd(ks[7], (cnn_dim, 3 * embed_dim)),
        "w_hh": rnd(ks[8], (embed_dim, 3 * embed_dim)),
        "b_ih": rnd(ks[9], (1, 3 * embed_dim)),
        "b_hh": rnd(ks[10], (1, 3 * embed_dim)),
    }


def text_encoder_forward(params, indices, *, block_b=8):
    """indices: (B, seq_len) int32 -> (B, embed_dim) float32."""
    # TODO(synk): embedding gather + zero-pad-to-50 kept in plain JAX
    # (data-dependent gather); could be folded into conv1 via one-hot im2col
    # with scalar-prefetched indices for a further small win.
    x = jnp.take(params["emb"], indices.T, axis=0)        # (S, B, word_dim)
    S = x.shape[0]
    if S < MIN_LEN:
        x = jnp.pad(x, ((0, MIN_LEN - S), (0, 0), (0, 0)))  # zeros AFTER emb
    return text_encoder_fused(x, params, block_b=block_b)


if __name__ == "__main__":
    alphasize, cnn_dim, embed_dim, word_dim = 32, 128, 32, 16
    B, seq_len = 2, 8

    key = jax.random.PRNGKey(0)
    pkey, ikey = jax.random.split(key)
    params = init_params(pkey, alphasize, cnn_dim, embed_dim, word_dim)
    indices = jax.random.randint(ikey, (B, seq_len), 0, alphasize,
                                 dtype=jnp.int32)

    out = jax.block_until_ready(text_encoder_forward(params, indices))
    assert out.shape == (B, embed_dim), out.shape
    assert out.dtype == jnp.float32
    print("KERNEL_OK")
</pallas_src>

<mosaic_0001>
module attributes {stable_mosaic.version = 11 : i64} {
  func.func @_text_encoder_kernel(%arg0: i32, %arg1: memref<50x8x16xf32, #tpu.memory_space<vmem>>, %arg2: memref<64x384xbf16, #tpu.memory_space<vmem>>, %arg3: memref<1x384xf32, #tpu.memory_space<vmem>>, %arg4: memref<1536x512xbf16, #tpu.memory_space<vmem>>, %arg5: memref<1x512xf32, #tpu.memory_space<vmem>>, %arg6: memref<2048x128xbf16, #tpu.memory_space<vmem>>, %arg7: memref<1x128xf32, #tpu.memory_space<vmem>>, %arg8: memref<128x384xbf16, #tpu.memory_space<vmem>>, %arg9: memref<128x384xf32, #tpu.memory_space<vmem>>, %arg10: memref<1x384xf32, #tpu.memory_space<vmem>>, %arg11: memref<1x384xf32, #tpu.memory_space<vmem>>, %arg12: memref<8x128xf32, #tpu.memory_space<vmem>>) attributes {dimension_semantics = [#tpu.dimension_semantics<parallel>], iteration_bounds = array<i64: 1>, scalar_prefetch = 0 : i64, scratch_operands = 0 : i64, tpu.core_type = #tpu.core_type<tc>, window_params = [{transform_indices = @transform_0, window_bounds = array<i64: 50, 8, 16>}, {pipeline_mode = #tpu.pipeline_mode<synchronous>, transform_indices = @transform_1, window_bounds = array<i64: 64, 384>}, {pipeline_mode = #tpu.pipeline_mode<synchronous>, transform_indices = @transform_2, window_bounds = array<i64: 1, 384>}, {pipeline_mode = #tpu.pipeline_mode<synchronous>, transform_indices = @transform_3, window_bounds = array<i64: 1536, 512>}, {pipeline_mode = #tpu.pipeline_mode<synchronous>, transform_indices = @transform_4, window_bounds = array<i64: 1, 512>}, {pipeline_mode = #tpu.pipeline_mode<synchronous>, transform_indices = @transform_5, window_bounds = array<i64: 2048, 128>}, {pipeline_mode = #tpu.pipeline_mode<synchronous>, transform_indices = @transform_6, window_bounds = array<i64: 1, 128>}, {pipeline_mode = #tpu.pipeline_mode<synchronous>, transform_indices = @transform_7, window_bounds = array<i64: 128, 384>}, {pipeline_mode = #tpu.pipeline_mode<synchronous>, transform_indices = @transform_8, window_bounds = array<i64: 128, 384>}, {pipeline_mode = #tpu.pipeline_mode<synchronous>, transform_indices = @transform_9, window_bounds = array<i64: 1, 384>}, {pipeline_mode = #tpu.pipeline_mode<synchronous>, transform_indices = @transform_10, window_bounds = array<i64: 1, 384>}, {transform_indices = @transform_11, window_bounds = array<i64: 8, 128>}]} {
    %c0 = arith.constant 0 : index
    %c0_0 = arith.constant 0 : index
    %c0_1 = arith.constant 0 : index
    %0 = vector.load %arg1[%c0, %c0_0, %c0_1] : memref<50x8x16xf32, #tpu.memory_space<vmem>>, vector<50x8x16xf32>
    %c0_2 = arith.constant 0 : index
    %c0_3 = arith.constant 0 : index
    %1 = vector.load %arg2[%c0_2, %c0_3] : memref<64x384xbf16, #tpu.memory_space<vmem>>, vector<64x384xbf16>
    %c0_4 = arith.constant 0 : index
    %c0_5 = arith.constant 0 : index
    %2 = vector.load %arg3[%c0_4, %c0_5] : memref<1x384xf32, #tpu.memory_space<vmem>>, vector<1x384xf32>
    %3 = vector.extract_strided_slice %0 {offsets = [0, 0, 0], sizes = [47, 8, 16], strides = [1, 1, 1]} : vector<50x8x16xf32> to vector<47x8x16xf32>
    %4 = vector.extract_strided_slice %0 {offsets = [1, 0, 0], sizes = [47, 8, 16], strides = [1, 1, 1]} : vector<50x8x16xf32> to vector<47x8x16xf32>
    %5 = vector.extract_strided_slice %0 {offsets = [2, 0, 0], sizes = [47, 8, 16], strides = [1, 1, 1]} : vector<50x8x16xf32> to vector<47x8x16xf32>
    %6 = vector.extract_strided_slice %0 {offsets = [3, 0, 0], sizes = [47, 8, 16], strides = [1, 1, 1]} : vector<50x8x16xf32> to vector<47x8x16xf32>
    %7 = tpu.concatenate %3, %4, %5, %6 in 2 : vector<47x8x16xf32>, vector<47x8x16xf32>, vector<47x8x16xf32>, vector<47x8x16xf32> -> vector<47x8x64xf32>
    %8 = vector.shape_cast %7 : vector<47x8x64xf32> to vector<376x64xf32>
    %9 = arith.truncf %8 : vector<376x64xf32> to vector<376x64xbf16>
    %cst = arith.constant dense<0.000000e+00> : vector<376x384xf32>
    %10 = tpu.matmul %9, %1, %cst {dimension_numbers = #tpu.dot_dimension_numbers<[1], [0], [0], [1], [0, 0, 1, 1], [], []>} : vector<376x64xbf16>, vector<64x384xbf16>, vector<376x384xf32> -> vector<376x384xf32>
    %11 = vector.broadcast %2 : vector<1x384xf32> to vector<376x384xf32>
    %12 = arith.addf %10, %11 : vector<376x384xf32>
    %cst_6 = arith.constant 9.99999997E-7 : f32
    %13 = vector.broadcast %cst_6 : f32 to vector<376x384xf32>
    %14 = arith.cmpf ogt, %12, %13 : vector<376x384xf32>
    %cst_7 = arith.constant 0.000000e+00 : f32
    %15 = vector.broadcast %cst_7 : f32 to vector<376x384xf32>
    %16 = arith.select %14, %12, %15 : vector<376x384xi1>, vector<376x384xf32>
    %17 = vector.shape_cast %16 : vector<376x384xf32> to vector<47x8x384xf32>
    %18 = vector.extract_strided_slice %17 {offsets = [0, 0, 0], sizes = [45, 8, 384], strides = [1, 1, 1]} : vector<47x8x384xf32> to vector<45x8x384xf32>
    %19 = vector.shape_cast %18 : vector<45x8x384xf32> to vector<15x3x8x384xf32>
    %20 = vector.extract_strided_slice %19 {offsets = [0, 0, 0, 0], sizes = [15, 1, 8, 384], strides = [1, 1, 1, 1]} : vector<15x3x8x384xf32> to vector<15x1x8x384xf32>
    %21 = vector.shape_cast %20 : vector<15x1x8x384xf32> to vector<15x8x384xf32>
    %22 = vector.extract_strided_slice %19 {offsets = [0, 1, 0, 0], sizes = [15, 1, 8, 384], strides = [1, 1, 1, 1]} : vector<15x3x8x384xf32> to vector<15x1x8x384xf32>
    %23 = vector.shape_cast %22 : vector<15x1x8x384xf32> to vector<15x8x384xf32>
    %24 = arith.maximumf %21, %23 : vector<15x8x384xf32>
    %25 = vector.extract_strided_slice %19 {offsets = [0, 2, 0, 0], sizes = [15, 1, 8, 384], strides = [1, 1, 1, 1]} : vector<15x3x8x384xf32> to vector<15x1x8x384xf32>
    %26 = vector.shape_cast %25 : vector<15x1x8x384xf32> to vector<15x8x384xf32>
    %27 = arith.maximumf %24, %26 : vector<15x8x384xf32>
    %c0_8 = arith.constant 0 : index
    %c0_9 = arith.constant 0 : index
    %28 = vector.load %arg4[%c0_8, %c0_9] : memref<1536x512xbf16, #tpu.memory_space<vmem>>, vector<1536x512xbf16>
    %c0_10 = arith.constant 0 : index
    %c0_11 = arith.constant 0 : index
    %29 = vector.load %arg5[%c0_10, %c0_11] : memref<1x512xf32, #tpu.memory_space<vmem>>, vector<1x512xf32>
    %30 = vector.extract_strided_slice %27 {offsets = [0, 0, 0], sizes = [12, 8, 384], strides = [1, 1, 1]} : vector<15x8x384xf32> to vector<12x8x384xf32>
    %31 = vector.extract_strided_slice %27 {offsets = [1, 0, 0], sizes = [12, 8, 384], strides = [1, 1, 1]} : vector<15x8x384xf32> to vector<12x8x384xf32>
    %32 = vector.extract_strided_slice %27 {offsets = [2, 0, 0], sizes = [12, 8, 384], strides = [1, 1, 1]} : vector<15x8x384xf32> to vector<12x8x384xf32>
    %33 = vector.extract_strided_slice %27 {offsets = [3, 0, 0], sizes = [12, 8, 384], strides = [1, 1, 1]} : vector<15x8x384xf32> to vector<12x8x384xf32>
    %34 = tpu.concatenate %30, %31, %32, %33 in 2 : vector<12x8x384xf32>, vector<12x8x384xf32>, vector<12x8x384xf32>, vector<12x8x384xf32> -> vector<12x8x1536xf32>
    %35 = vector.shape_cast %34 : vector<12x8x1536xf32> to vector<96x1536xf32>
    %36 = arith.truncf %35 : vector<96x1536xf32> to vector<96x1536xbf16>
    %cst_12 = arith.constant dense<0.000000e+00> : vector<96x512xf32>
    %37 = tpu.matmul %36, %28, %cst_12 {dimension_numbers = #tpu.dot_dimension_numbers<[1], [0], [0], [1], [0, 0, 1, 1], [], []>} : vector<96x1536xbf16>, vector<1536x512xbf16>, vector<96x512xf32> -> vector<96x512xf32>
    %38 = vector.broadcast %29 : vector<1x512xf32> to vector<96x512xf32>
    %39 = arith.addf %37, %38 : vector<96x512xf32>
    %cst_13 = arith.constant 9.99999997E-7 : f32
    %40 = vector.broadcast %cst_13 : f32 to vector<96x512xf32>
    %41 = arith.cmpf ogt, %39, %40 : vector<96x512xf32>
    %cst_14 = arith.constant 0.000000e+00 : f32
    %42 = vector.broadcast %cst_14 : f32 to vector<96x512xf32>
    %43 = arith.select %41, %39, %42 : vector<96x512xi1>, vector<96x512xf32>
    %44 = vector.shape_cast %43 : vector<96x512xf32> to vector<12x8x512xf32>
    %45 = vector.shape_cast %44 : vector<12x8x512xf32> to vector<4x3x8x512xf32>
    %46 = vector.extract_strided_slice %45 {offsets = [0, 0, 0, 0], sizes = [4, 1, 8, 512], strides = [1, 1, 1, 1]} : vector<4x3x8x512xf32> to vector<4x1x8x512xf32>
    %47 = vector.shape_cast %46 : vector<4x1x8x512xf32> to vector<4x8x512xf32>
    %48 = vector.extract_strided_slice %45 {offsets = [0, 1, 0, 0], sizes = [4, 1, 8, 512], strides = [1, 1, 1, 1]} : vector<4x3x8x512xf32> to vector<4x1x8x512xf32>
    %49 = vector.shape_cast %48 : vector<4x1x8x512xf32> to vector<4x8x512xf32>
    %50 = arith.maximumf %47, %49 : vector<4x8x512xf32>
    %51 = vector.extract_strided_slice %45 {offsets = [0, 2, 0, 0], sizes = [4, 1, 8, 512], strides = [1, 1, 1, 1]} : vector<4x3x8x512xf32> to vector<4x1x8x512xf32>
    %52 = vector.shape_cast %51 : vector<4x1x8x512xf32> to vector<4x8x512xf32>
    %53 = arith.maximumf %50, %52 : vector<4x8x512xf32>
    %c0_15 = arith.constant 0 : index
    %c0_16 = arith.constant 0 : index
    %54 = vector.load %arg6[%c0_15, %c0_16] : memref<2048x128xbf16, #tpu.memory_space<vmem>>, vector<2048x128xbf16>
    %c0_17 = arith.constant 0 : index
    %c0_18 = arith.constant 0 : index
    %55 = vector.load %arg7[%c0_17, %c0_18] : memref<1x128xf32, #tpu.memory_space<vmem>>, vector<1x128xf32>
    %56 = vector.extract_strided_slice %53 {offsets = [0, 0, 0], sizes = [1, 8, 512], strides = [1, 1, 1]} : vector<4x8x512xf32> to vector<1x8x512xf32>
    %57 = vector.extract_strided_slice %53 {offsets = [1, 0, 0], sizes = [1, 8, 512], strides = [1, 1, 1]} : vector<4x8x512xf32> to vector<1x8x512xf32>
    %58 = vector.extract_strided_slice %53 {offsets = [2, 0, 0], sizes = [1, 8, 512], strides = [1, 1, 1]} : vector<4x8x512xf32> to vector<1x8x512xf32>
    %59 = vector.extract_strided_slice %53 {offsets = [3, 0, 0], sizes = [1, 8, 512], strides = [1, 1, 1]} : vector<4x8x512xf32> to vector<1x8x512xf32>
    %60 = tpu.concatenate %56, %57, %58, %59 in 2 : vector<1x8x512xf32>, vector<1x8x512xf32>, vector<1x8x512xf32>, vector<1x8x512xf32> -> vector<1x8x2048xf32>
    %61 = vector.shape_cast %60 : vector<1x8x2048xf32> to vector<8x2048xf32>
    %62 = arith.truncf %61 : vector<8x2048xf32> to vector<8x2048xbf16>
    %cst_19 = arith.constant dense<0.000000e+00> : vector<8x128xf32>
    %63 = tpu.matmul %62, %54, %cst_19 {dimension_numbers = #tpu.dot_dimension_numbers<[1], [0], [0], [1], [0, 0, 1, 1], [], []>} : vector<8x2048xbf16>, vector<2048x128xbf16>, vector<8x128xf32> -> vector<8x128xf32>
    %64 = vector.broadcast %55 : vector<1x128xf32> to vector<8x128xf32>
    %65 = arith.addf %63, %64 : vector<8x128xf32>
    %cst_20 = arith.constant 9.99999997E-7 : f32
    %66 = vector.broadcast %cst_20 : f32 to vector<8x128xf32>
    %67 = arith.cmpf ogt, %65, %66 : vector<8x128xf32>
    %cst_21 = arith.constant 0.000000e+00 : f32
    %68 = vector.broadcast %cst_21 : f32 to vector<8x128xf32>
    %69 = arith.select %67, %65, %68 : vector<8x128xi1>, vector<8x128xf32>
    %70 = vector.shape_cast %69 : vector<8x128xf32> to vector<1x8x128xf32>
    %71 = vector.shape_cast %70 : vector<1x8x128xf32> to vector<8x128xf32>
    %72 = arith.truncf %71 : vector<8x128xf32> to vector<8x128xbf16>
    %c0_22 = arith.constant 0 : index
    %c0_23 = arith.constant 0 : index
    %73 = vector.load %arg8[%c0_22, %c0_23] : memref<128x384xbf16, #tpu.memory_space<vmem>>, vector<128x384xbf16>
    %cst_24 = arith.constant dense<0.000000e+00> : vector<8x384xf32>
    %74 = tpu.matmul %72, %73, %cst_24 {dimension_numbers = #tpu.dot_dimension_numbers<[1], [0], [0], [1], [0, 0, 1, 1], [], []>} : vector<8x128xbf16>, vector<128x384xbf16>, vector<8x384xf32> -> vector<8x384xf32>
    %c0_25 = arith.constant 0 : index
    %c0_26 = arith.constant 0 : index
    %75 = vector.load %arg10[%c0_25, %c0_26] : memref<1x384xf32, #tpu.memory_space<vmem>>, vector<1x384xf32>
    %76 = vector.broadcast %75 : vector<1x384xf32> to vector<8x384xf32>
    %77 = arith.addf %74, %76 : vector<8x384xf32>
    %78 = vector.shape_cast %77 : vector<8x384xf32> to vector<1x8x384xf32>
    %c0_27 = arith.constant 0 : index
    %c0_28 = arith.constant 0 : index
    %79 = vector.load %arg9[%c0_27, %c0_28] : memref<128x384xf32, #tpu.memory_space<vmem>>, vector<128x384xf32>
    %c0_29 = arith.constant 0 : index
    %c0_30 = arith.constant 0 : index
    %80 = vector.load %arg11[%c0_29, %c0_30] : memref<1x384xf32, #tpu.memory_space<vmem>>, vector<1x384xf32>
    %cst_31 = arith.constant 0.000000e+00 : f32
    %81 = vector.broadcast %cst_31 : f32 to vector<8x128xf32>
    %82 = vector.shape_cast %78 : vector<1x8x384xf32> to vector<8x384xf32>
    %cst_32 = arith.constant dense<0.000000e+00> : vector<8x384xf32>
    %83 = tpu.matmul %81, %79, %cst_32 {dimension_numbers = #tpu.dot_dimension_numbers<[1], [0], [0], [1], [0, 0, 1, 1], [], []>} : vector<8x128xf32>, vector<128x384xf32>, vector<8x384xf32> -> vector<8x384xf32>
    %84 = vector.broadcast %80 : vector<1x384xf32> to vector<8x384xf32>
    %85 = arith.addf %83, %84 : vector<8x384xf32>
    %86 = vector.extract_strided_slice %82 {offsets = [0, 0], sizes = [8, 128], strides = [1, 1]} : vector<8x384xf32> to vector<8x128xf32>
    %87 = vector.extract_strided_slice %85 {offsets = [0, 0], sizes = [8, 128], strides = [1, 1]} : vector<8x384xf32> to vector<8x128xf32>
    %88 = arith.addf %86, %87 : vector<8x128xf32>
    %89 = arith.negf %88 : vector<8x128xf32>
    %90 = math.exp %89 : vector<8x128xf32>
    %cst_33 = arith.constant 1.000000e+00 : f32
    %91 = vector.broadcast %cst_33 : f32 to vector<8x128xf32>
    %92 = arith.addf %91, %90 : vector<8x128xf32>
    %93 = arith.divf %91, %92 : vector<8x128xf32>
    %94 = vector.extract_strided_slice %82 {offsets = [0, 128], sizes = [8, 128], strides = [1, 1]} : vector<8x384xf32> to vector<8x128xf32>
    %95 = vector.extract_strided_slice %85 {offsets = [0, 128], sizes = [8, 128], strides = [1, 1]} : vector<8x384xf32> to vector<8x128xf32>
    %96 = arith.addf %94, %95 : vector<8x128xf32>
    %97 = arith.negf %96 : vector<8x128xf32>
    %98 = math.exp %97 : vector<8x128xf32>
    %cst_34 = arith.constant 1.000000e+00 : f32
    %99 = vector.broadcast %cst_34 : f32 to vector<8x128xf32>
    %100 = arith.addf %99, %98 : vector<8x128xf32>
    %101 = arith.divf %99, %100 : vector<8x128xf32>
    %102 = vector.extract_strided_slice %82 {offsets = [0, 256], sizes = [8, 128], strides = [1, 1]} : vector<8x384xf32> to vector<8x128xf32>
    %103 = vector.extract_strided_slice %85 {offsets = [0, 256], sizes = [8, 128], strides = [1, 1]} : vector<8x384xf32> to vector<8x128xf32>
    %104 = arith.mulf %93, %103 : vector<8x128xf32>
    %105 = arith.addf %102, %104 : vector<8x128xf32>
    %106 = math.tanh %105 : vector<8x128xf32>
    %cst_35 = arith.constant 1.000000e+00 : f32
    %107 = vector.broadcast %cst_35 : f32 to vector<8x128xf32>
    %108 = arith.subf %107, %101 : vector<8x128xf32>
    %109 = arith.mulf %108, %106 : vector<8x128xf32>
    %110 = arith.mulf %101, %81 : vector<8x128xf32>
    %111 = arith.addf %109, %110 : vector<8x128xf32>
    %c0_36 = arith.constant 0 : index
    %c0_37 = arith.constant 0 : index
    %112 = vector.load %arg12[%c0_36, %c0_37] : memref<8x128xf32, #tpu.memory_space<vmem>>, vector<8x128xf32>
    tpu.vector_store %arg12[%c0_36, %c0_37], %111 {strides = array<i32>} : memref<8x128xf32, #tpu.memory_space<vmem>>, vector<8x128xf32>,
    return
  }
  func.func @transform_0(%arg0: i32) -> (i32, i32, i32) {
    %c0_i32 = arith.constant 0 : i32
    %c0_i32_0 = arith.constant 0 : i32
    %c0_i32_1 = arith.constant 0 : i32
    return %c0_i32, %arg0, %c0_i32_0 : i32, i32, i32
  }
  func.func @transform_1(%arg0: i32) -> (i32, i32) {
    %c0_i32 = arith.constant 0 : i32
    %c0_i32_0 = arith.constant 0 : i32
    %c0_i32_1 = arith.constant 0 : i32
    return %c0_i32, %c0_i32_0 : i32, i32
  }
  func.func @transform_2(%arg0: i32) -> (i32, i32) {
    %c0_i32 = arith.constant 0 : i32
    %c0_i32_0 = arith.constant 0 : i32
    %c0_i32_1 = arith.constant 0 : i32
    return %c0_i32, %c0_i32_0 : i32, i32
  }
  func.func @transform_3(%arg0: i32) -> (i32, i32) {
    %c0_i32 = arith.constant 0 : i32
    %c0_i32_0 = arith.constant 0 : i32
    %c0_i32_1 = arith.constant 0 : i32
    return %c0_i32, %c0_i32_0 : i32, i32
  }
  func.func @transform_4(%arg0: i32) -> (i32, i32) {
    %c0_i32 = arith.constant 0 : i32
    %c0_i32_0 = arith.constant 0 : i32
    %c0_i32_1 = arith.constant 0 : i32
    return %c0_i32, %c0_i32_0 : i32, i32
  }
  func.func @transform_5(%arg0: i32) -> (i32, i32) {
    %c0_i32 = arith.constant 0 : i32
    %c0_i32_0 = arith.constant 0 : i32
    %c0_i32_1 = arith.constant 0 : i32
    return %c0_i32, %c0_i32_0 : i32, i32
  }
  func.func @transform_6(%arg0: i32) -> (i32, i32) {
    %c0_i32 = arith.constant 0 : i32
    %c0_i32_0 = arith.constant 0 : i32
    %c0_i32_1 = arith.constant 0 : i32
    return %c0_i32, %c0_i32_0 : i32, i32
  }
  func.func @transform_7(%arg0: i32) -> (i32, i32) {
    %c0_i32 = arith.constant 0 : i32
    %c0_i32_0 = arith.constant 0 : i32
    %c0_i32_1 = arith.constant 0 : i32
    return %c0_i32, %c0_i32_0 : i32, i32
  }
  func.func @transform_8(%arg0: i32) -> (i32, i32) {
    %c0_i32 = arith.constant 0 : i32
    %c0_i32_0 = arith.constant 0 : i32
    %c0_i32_1 = arith.constant 0 : i32
    return %c0_i32, %c0_i32_0 : i32, i32
  }
  func.func @transform_9(%arg0: i32) -> (i32, i32) {
    %c0_i32 = arith.constant 0 : i32
    %c0_i32_0 = arith.constant 0 : i32
    %c0_i32_1 = arith.constant 0 : i32
    return %c0_i32, %c0_i32_0 : i32, i32
  }
  func.func @transform_10(%arg0: i32) -> (i32, i32) {
    %c0_i32 = arith.constant 0 : i32
    %c0_i32_0 = arith.constant 0 : i32
    %c0_i32_1 = arith.constant 0 : i32
    return %c0_i32, %c0_i32_0 : i32, i32
  }
  func.func @transform_11(%arg0: i32) -> (i32, i32) {
    %c0_i32 = arith.constant 0 : i32
    %c0_i32_0 = arith.constant 0 : i32
    return %arg0, %c0_i32 : i32, i32
  }
}

</mosaic_0001>

<bundles_post_ra>
// kernel: tpu_custom_call.1
= control target key start
LH: loop header
LB: loop body
LE: loop exit
PB: predicated region body
PF: predicated region fallthrough
CT: control target
= control target key end

     0   :  { %16 = vsyncpa [#allocation3], 0  ;;  %s11747_s0 = inlined_call_operand.vmem [shape: f32[50,8,16], index: 0, kind: input, shape index: {}]   ;;  %s11748_s1 = inlined_call_operand.hbm [shape: bf16[64,384], index: 1, kind: input, shape index: {}]   ;;  %s11749_s2 = inlined_call_operand.hbm [shape: f32[1,384], index: 2, kind: input, shape index: {}]   ;;  %s11750_s3 = inlined_call_operand.hbm [shape: bf16[1536,512], index: 3, kind: input, shape index: {}]   ;;  %s11751_s4 = inlined_call_operand.hbm [shape: f32[1,512], index: 4, kind: input, shape index: {}]   ;;  %s11752_s5 = inlined_call_operand.hbm [shape: bf16[2048,128], index: 5, kind: input, shape index: {}]   ;;  %s11753_s6 = inlined_call_operand.hbm [shape: f32[1,128], index: 6, kind: input, shape index: {}]   ;;  %s11754_s7 = inlined_call_operand.hbm [shape: bf16[128,384], index: 7, kind: input, shape index: {}]   ;;  %s11755_s8 = inlined_call_operand.hbm [shape: f32[128,384], index: 8, kind: input, shape index: {}]   ;;  %s11756_s9 = inlined_call_operand.hbm [shape: f32[1,384], index: 9, kind: input, shape index: {}]   ;;  %s11757_s10 = inlined_call_operand.hbm [shape: f32[1,384], index: 10, kind: input, shape index: {}]   ;;  %s11758_s11 = inlined_call_operand.hbm [shape: f32[8,128], index: 11, kind: output, shape index: {}]  }
   0x1   :  { %17 = vsyncpa [#allocation6], 0 }
   0x2   :  { %18 = vsyncpa [#allocation9], 0 }
   0x3   :  { %19 = vsyncpa [#allocation12], 0 }
   0x4   :  { %20 = vsyncpa [#allocation15], 0 }
   0x5   :  { %21 = vsyncpa [#allocation18], 0 }
   0x6   :  { %22 = vsyncpa [#allocation4], 0  ;;  %s10095_s17 = smov [#allocation5]   ;;  %s10096_s19 = smov [#allocation8]  }
   0x7   :  { %s43_s18 = sshll.u32 %s10095_s17, 4  ;;  %s65_s20 = sshll.u32 %s10096_s19, 4  ;;  %s44_s18 = int_to_ptr.vmem [resolvable:$true] %s43_s18  ;;  %s66_s20 = int_to_ptr.vmem [resolvable:$true] %s65_s20 }
   0x8   :  { %s9839_s23 = scalar_lea.hbm %s11749_s2, 48 }
   0x9   :  { %p9840_p0 = scmp.ne.s32.totalorder %s11749_s2, %s9839_s23  ;;  %p9843_p1 = scmp.lt.u32.totalorder %s9839_s23, %s11749_s2 }
   0xb   :  { %p9845_p2 = pnand %p9843_p1, %p9840_p0 }
   0xd   :  { %9848 = shalt.err (!%p9845_p2)
}
   0xe   :  { %s9849_s28 = scalar_lea.vmem %s44_s18, 48  ;;  %s9853_s29 = scalar_lea.vmem %s44_s18, 64 }
   0xf   :  { %p9850_p3 = scmp.ne.s32.totalorder %s44_s18, %s9849_s28  ;;  %p9854_p4 = scmp.lt.s32.totalorder %s44_s18, %s44_s18 }
  0x10   :  { %p9855_p5 = scmp.lt.s32.totalorder %s9853_s29, %s9849_s28 }
  0x12   :  { %p9856_p6 = por %p9855_p5, %p9854_p4 }
  0x14   :  { %p9857_p7 = pnand %p9856_p6, %p9850_p3 }
  0x16   :  { %9860 = shalt.err (!%p9857_p7)
}
  0x17   :  { %46 = dma.hbm_to_vmem [thread:$0]  %s11749_s2, 48, %s44_s18, [#allocation6]  }
  0x18   :  { %s9861_s15 = scalar_lea.hbm %s11751_s4, 64 }
  0x19   :  { %p9862_p8 = scmp.ne.s32.totalorder %s11751_s4, %s9861_s15  ;;  %p9865_p9 = scmp.lt.u32.totalorder %s9861_s15, %s11751_s4 }
  0x1b   :  { %p9867_p10 = pnand %p9865_p9, %p9862_p8 }
  0x1d   :  { %9870 = shalt.err (!%p9867_p10)
}
  0x1e   :  { %s9871_s22 = scalar_lea.vmem %s66_s20, 64  ;;  %p9876_p12 = scmp.lt.s32.totalorder %s66_s20, %s66_s20 }
  0x1f   :  { %p9872_p11 = scmp.ne.s32.totalorder %s66_s20, %s9871_s22  ;;  %p9877_p13 = scmp.lt.s32.totalorder %s9871_s22, %s9871_s22 }
  0x21   :  { %p9878_p0 = por %p9877_p13, %p9876_p12 }
  0x23   :  { %p9879_p1 = pnand %p9878_p0, %p9872_p11 }
  0x25   :  { %9882 = shalt.err (!%p9879_p1)
}
  0x26   :  { %68 = dma.hbm_to_vmem [thread:$0]  %s11751_s4, 64, %s66_s20, [#allocation9]  }
  0x27   :  { %s10097_s23 = smov [#allocation11]   ;;  %s10098_s25 = smov [#allocation14]  }
  0x28   :  { %s87_s24 = sshll.u32 %s10097_s23, 4  ;;  %s108_s26 = sshll.u32 %s10098_s25, 4  ;;  %s88_s24 = int_to_ptr.vmem [resolvable:$true] %s87_s24  ;;  %s10204_s26 = int_to_ptr.vmem [resolvable:$true] %s108_s26 }
  0x29   :  { %s9883_s29 = scalar_lea.hbm %s11753_s6, 16 }
  0x2a   :  { %p9884_p2 = scmp.ne.s32.totalorder %s11753_s6, %s9883_s29  ;;  %p9887_p3 = scmp.lt.u32.totalorder %s9883_s29, %s11753_s6 }
  0x2c   :  { %p9889_p4 = pnand %p9887_p3, %p9884_p2 }
  0x2e   :  { %9892 = shalt.err (!%p9889_p4)
}
  0x2f   :  { %s9893_s4 = scalar_lea.vmem %s88_s24, 16  ;;  %s9897_s20 = scalar_lea.vmem %s88_s24, 32 }
  0x30   :  { %p9894_p5 = scmp.ne.s32.totalorder %s88_s24, %s9893_s4  ;;  %p9898_p6 = scmp.lt.s32.totalorder %s88_s24, %s88_s24 }
  0x31   :  { %p9899_p7 = scmp.lt.s32.totalorder %s9897_s20, %s9893_s4 }
  0x33   :  { %p9900_p8 = por %p9899_p7, %p9898_p6 }
  0x35   :  { %p9901_p9 = pnand %p9900_p8, %p9894_p5 }
  0x37   :  { %9904 = shalt.err (!%p9901_p9)
}
  0x38   :  { %90 = dma.hbm_to_vmem [thread:$0]  %s11753_s6, 16, %s88_s24, [#allocation12]  }
  0x39   :  { %s9905_s21 = scalar_lea.hbm %s11755_s8, 6144 }
  0x3a   :  { %p9906_p10 = scmp.ne.s32.totalorder %s11755_s8, %s9905_s21  ;;  %p9909_p11 = scmp.lt.u32.totalorder %s9905_s21, %s11755_s8 }
  0x3c   :  { %p9911_p12 = pnand %p9909_p11, %p9906_p10 }
  0x3e   :  { %9914 = shalt.err (!%p9911_p12)
}
  0x3f   :  { %s9915_s25 = scalar_lea.vmem %s10204_s26, 6144  ;;  %p9920_p0 = scmp.lt.s32.totalorder %s10204_s26, %s10204_s26 }
  0x40   :  { %p9916_p13 = scmp.ne.s32.totalorder %s10204_s26, %s9915_s25  ;;  %p9921_p1 = scmp.lt.s32.totalorder %s9915_s25, %s9915_s25 }
  0x42   :  { %p9922_p2 = por %p9921_p1, %p9920_p0 }
  0x44   :  { %p9923_p3 = pnand %p9922_p2, %p9916_p13 }
  0x46   :  { %9926 = shalt.err (!%p9923_p3)
}
  0x47   :  { %s10099_s6 = smov 384   ;;  %s10100_s24 = smov 24  }
  0x48   :  { %114 = dma.hbm_to_vmem [thread:$0]  %s11755_s8, 6144, %s10204_s26, [#allocation15], %s10099_s6, %s10099_s6, %s10100_s24  }
  0x49   :  { %s10101_s29 = smov [#allocation2]   ;;  %s9927_s14 = scalar_lea.hbm %s11748_s1, 1536 }
  0x4a   :  { %s30_s30 = sshll.u32 %s10101_s29, 4  ;;  %p9928_p4 = scmp.ne.s32.totalorder %s11748_s1, %s9927_s14  ;;  %s31_s30 = int_to_ptr.vmem [resolvable:$true] %s30_s30 }
  0x4b   :  { %p9931_p5 = scmp.lt.u32.totalorder %s9927_s14, %s11748_s1 }
  0x4d   :  { %p9933_p6 = pnand %p9931_p5, %p9928_p4 }
  0x4f   :  { %9936 = shalt.err (!%p9933_p6)
}
  0x50   :  { %s9937_s17 = scalar_lea.vmem %s31_s30, 1536  ;;  %p9942_p8 = scmp.lt.s32.totalorder %s31_s30, %s31_s30 }
  0x51   :  { %p9938_p7 = scmp.ne.s32.totalorder %s31_s30, %s9937_s17  ;;  %p9943_p9 = scmp.lt.s32.totalorder %s9937_s17, %s9937_s17 }
  0x53   :  { %p9944_p10 = por %p9943_p9, %p9942_p8 }
  0x55   :  { %p9945_p11 = pnand %p9944_p10, %p9938_p7 }
  0x57   :  { %9948 = shalt.err (!%p9945_p11)
}
  0x58   :  { %s10102_s8 = smov 192   ;;  %s10103_s26 = smov 12  }
  0x59   :  { %36 = dma.hbm_to_vmem [thread:$0]  %s11748_s1, 1536, %s31_s30, [#allocation3], %s10102_s8, %s10102_s8, %s10103_s26  }
  0x5a   :  { %s10104_s22 = smov [#allocation7]   ;;  %s9949_s25 = scalar_lea.hbm %s11750_s3, 49152 }
  0x5b   :  { %s52_s2 = sshll.u32 %s10104_s22, 4  ;;  %p9950_p12 = scmp.ne.s32.totalorder %s11750_s3, %s9949_s25  ;;  %s53_s2 = int_to_ptr.vmem [resolvable:$true] %s52_s2 }
  0x5c   :  { %p9953_p13 = scmp.lt.u32.totalorder %s9949_s25, %s11750_s3 }
  0x5e   :  { %p9955_p0 = pnand %p9953_p13, %p9950_p12 }
  0x60   :  { %9958 = shalt.err (!%p9955_p0)
}
  0x61   :  { %s9959_s29 = scalar_lea.vmem %s53_s2, 49152  ;;  %p9964_p2 = scmp.lt.s32.totalorder %s53_s2, %s53_s2 }
  0x62   :  { %p9960_p1 = scmp.ne.s32.totalorder %s53_s2, %s9959_s29  ;;  %p9965_p3 = scmp.lt.s32.totalorder %s9959_s29, %s9959_s29 }
  0x64   :  { %p9966_p4 = por %p9965_p3, %p9964_p2 }
  0x66   :  { %p9967_p5 = pnand %p9966_p4, %p9960_p1 }
  0x68   :  { %9970 = shalt.err (!%p9967_p5)
}
  0x69   :  { %s10105_s1 = smov 256   ;;  %s10106_s30 = smov 16  }
  0x6a   :  { %58 = dma.hbm_to_vmem [thread:$0]  %s11750_s3, 49152, %s53_s2, [#allocation6], %s10105_s1, %s10105_s1, %s10106_s30  }
  0x6b   :  { %s10107_s14 = smov [#allocation10]   ;;  %s9971_s16 = scalar_lea.hbm %s11752_s5, 16384 }
  0x6c   :  { %s74_s4 = sshll.u32 %s10107_s14, 4  ;;  %p9972_p6 = scmp.ne.s32.totalorder %s11752_s5, %s9971_s16  ;;  %s75_s4 = int_to_ptr.vmem [resolvable:$true] %s74_s4 }
  0x6d   :  { %p9975_p7 = scmp.lt.u32.totalorder %s9971_s16, %s11752_s5 }
  0x6f   :  { %p9977_p8 = pnand %p9975_p7, %p9972_p6 }
  0x71   :  { %9980 = shalt.err (!%p9977_p8)
}
  0x72   :  { %s9981_s18 = scalar_lea.vmem %s75_s4, 16384  ;;  %p9986_p10 = scmp.lt.s32.totalorder %s75_s4, %s75_s4 }
  0x73   :  { %p9982_p9 = scmp.ne.s32.totalorder %s75_s4, %s9981_s18  ;;  %p9987_p11 = scmp.lt.s32.totalorder %s9981_s18, %s9981_s18 }
  0x75   :  { %p9988_p12 = por %p9987_p11, %p9986_p10 }
  0x77   :  { %p9989_p13 = pnand %p9988_p12, %p9982_p9 }
  0x79   :  { %9992 = shalt.err (!%p9989_p13)
}
  0x7a   :  { %s10108_s3 = smov 64   ;;  %s10109_s2 = smov 4  }
  0x7b   :  { %80 = dma.hbm_to_vmem [thread:$0]  %s11752_s5, 16384, %s75_s4, [#allocation9], %s10108_s3, %s10108_s3, %s10109_s2  }
  0x7c   :  { %s10110_s6 = smov [#allocation13]   ;;  %s10111_s27 = smov [#allocation16]  }
  0x7d   :  { %s96_s24 = sshll.u32 %s10110_s6, 4  ;;  %s121_s28 = sshll.u32 %s10111_s27, 4  ;;  %s97_s24 = int_to_ptr.vmem [resolvable:$true] %s96_s24  ;;  %s122_s28 = int_to_ptr.vmem [resolvable:$true] %s121_s28 }
  0x7e   :  { %s9993_s12 = scalar_lea.hbm %s11754_s7, 3072 }
  0x7f   :  { %p9994_p0 = scmp.ne.s32.totalorder %s11754_s7, %s9993_s12  ;;  %p9997_p1 = scmp.lt.u32.totalorder %s9993_s12, %s11754_s7 }
  0x81   :  { %p9999_p2 = pnand %p9997_p1, %p9994_p0 }
  0x83   :  { %10002 = shalt.err (!%p9999_p2)
}
  0x84   :  { %s10003_s5 = scalar_lea.vmem %s97_s24, 3072  ;;  %p10008_p4 = scmp.lt.s32.totalorder %s97_s24, %s97_s24 }
  0x85   :  { %p10004_p3 = scmp.ne.s32.totalorder %s97_s24, %s10003_s5  ;;  %p10009_p5 = scmp.lt.s32.totalorder %s10003_s5, %s10003_s5 }
  0x87   :  { %p10010_p6 = por %p10009_p5, %p10008_p4 }
  0x89   :  { %p10011_p7 = pnand %p10010_p6, %p10004_p3 }
  0x8b   :  { %10014 = shalt.err (!%p10011_p7)
}
  0x8c   :  { %102 = dma.hbm_to_vmem [thread:$0]  %s11754_s7, 3072, %s97_s24, [#allocation12], %s10102_s8, %s10102_s8, %s10103_s26  }
  0x8d   :  { %s10015_s21 = scalar_lea.hbm %s11756_s9, 48 }
  0x8e   :  { %p10016_p8 = scmp.ne.s32.totalorder %s11756_s9, %s10015_s21  ;;  %p10019_p9 = scmp.lt.u32.totalorder %s10015_s21, %s11756_s9 }
  0x90   :  { %p10021_p10 = pnand %p10019_p9, %p10016_p8 }
  0x92   :  { %10024 = shalt.err (!%p10021_p10)
}
  0x93   :  { %s10025_s23 = scalar_lea.vmem %s122_s28, 48  ;;  %s10029_s25 = scalar_lea.vmem %s122_s28, 64 }
  0x94   :  { %p10026_p11 = scmp.ne.s32.totalorder %s122_s28, %s10025_s23  ;;  %p10030_p12 = scmp.lt.s32.totalorder %s122_s28, %s122_s28 }
  0x95   :  { %p10031_p13 = scmp.lt.s32.totalorder %s10029_s25, %s10025_s23 }
  0x97   :  { %p10032_p0 = por %p10031_p13, %p10030_p12 }
  0x99   :  { %p10033_p1 = pnand %p10032_p0, %p10026_p11 }
  0x9b   :  { %10036 = shalt.err (!%p10033_p1)
}
  0x9c   :  { %124 = dma.hbm_to_vmem [thread:$0]  %s11756_s9, 48, %s122_s28, [#allocation15]  }
  0x9d   :  { %s10112_s26 = smov [#allocation17]   ;;  %s10037_s29 = scalar_lea.hbm %s11757_s10, 48 }
  0x9e   :  { %s131_s6 = sshll.u32 %s10112_s26, 4  ;;  %p10038_p2 = scmp.ne.s32.totalorder %s11757_s10, %s10037_s29  ;;  %s132_s6 = int_to_ptr.vmem [resolvable:$true] %s131_s6 }
  0x9f   :  { %p10041_p3 = scmp.lt.u32.totalorder %s10037_s29, %s11757_s10 }
  0xa1   :  { %p10043_p4 = pnand %p10041_p3, %p10038_p2 }
  0xa3   :  { %10046 = shalt.err (!%p10043_p4)
}
  0xa4   :  { %s10047_s20 = scalar_lea.vmem %s132_s6, 48  ;;  %s10051_s9 = scalar_lea.vmem %s132_s6, 64 }
  0xa5   :  { %p10048_p5 = scmp.ne.s32.totalorder %s132_s6, %s10047_s20  ;;  %p10052_p6 = scmp.lt.s32.totalorder %s132_s6, %s132_s6 }
  0xa6   :  { %p10053_p7 = scmp.lt.s32.totalorder %s10051_s9, %s10047_s20 }
  0xa8   :  { %p10054_p8 = por %p10053_p7, %p10052_p6 }
  0xaa   :  { %p10055_p9 = pnand %p10054_p8, %p10048_p5 }
  0xac   :  { %10058 = shalt.err (!%p10055_p9)
}
  0xad   :  { %134 = dma.hbm_to_vmem [thread:$0]  %s11757_s10, 48, %s132_s6, [#allocation18]  }
  0xae   :  { %10081 = dma.done.wait [#allocation3], 1536  }
  0xaf   :  { %10082 = vsyncadd [#allocation3], 4294965760 }
  0xb0   :  { %10083 = dma.done.wait [#allocation6], 49200  }
  0xb1   :  { %10084 = vsyncadd [#allocation6], 4294918096 }
  0xb2   :  { %10085 = dma.done.wait [#allocation9], 16448  }
  0xb3   :  { %10086 = vsyncadd [#allocation9], 4294950848 }
  0xb4   :  { %10087 = dma.done.wait [#allocation12], 3088  }
  0xb5   :  { %10088 = vsyncadd [#allocation12], 4294964208 }
  0xb6   :  { %10089 = dma.done.wait [#allocation15], 6192  }
  0xb7   :  { %10090 = vsyncadd [#allocation15], 4294961104 }
  0xb8   :  { %10091 = dma.done.wait [#allocation18], 48  }
  0xb9   :  { %10092 = vsyncadd [#allocation18], 4294967248  ;;  %v11759_v0 = vmov 0   ;;  %v169_v1 = vld [vmem:[%s11747_s0 + $0x18] sm:$0xff]  ;;  %v170_v2 = vld [vmem:[%s11747_s0 + $0x20] sm:$0xff]  ;;  %s10114_s18 = smov 48  }
  0xba   :  { %1058 = vmatprep.mubr.bf16.mxu0 %v11759_v0  ;;  %1278 = vmatprep.mubr.bf16.mxu1 %v11759_v0  ;;  %v167_v3 = vld [vmem:[%s11747_s0 + $0x8] sm:$0xff]  ;;  %v8696_v4 = vpack.i.bf16 %v170_v2, %v169_v1  ;;  %v168_v5 = vld [vmem:[%s11747_s0 + $0x10] sm:$0xff]  ;;  %s10115_s7 = smov 32   ;;  %v173_v12 = vld [vmem:[%s11747_s0 + $0x38] sm:$0xff]  ;;  %vm705_vm0 = vcmask 130048   ;;  %vm753_vm1 = vcmask 261120  }
  0xbb   :  { %v8686_v6 = vpack.i.bf16 %v168_v5, %v167_v3  ;;  %v8691_v7 = vpack.i.bf16 %v169_v1, %v168_v5  ;;  %v171_v8 = vld [vmem:[%s11747_s0 + $0x28] sm:$0xff]  ;;  %v172_v9 = vld [vmem:[%s11747_s0 + $0x30] sm:$0xff]  ;;  %v174_v14 = vld [vmem:[%s11747_s0 + $0x40] sm:$0xff]  ;;  %vm801_vm2 = vcmask 392192   ;;  %vm953_vm3 = vcmask 523264  }
  0xbc   :  { %8697 = vrot.lane.b32.xlu1 %v8696_v4, %s10114_s18  ;;  %v8711_v10 = vpack.i.bf16 %v172_v9, %v171_v8  ;;  %v8706_v11 = vpack.i.bf16 %v171_v8, %v170_v2  ;;  %v8721_v13 = vpack.i.bf16 %v173_v12, %v172_v9  ;;  %v9031_v15 = vld [vmem:[#allocation2 + $0x4] ss:$12 sps:$4 sm:$0xff]   ;;  %v9033_v16 = vld [vmem:[#allocation2] ss:$12 sps:$4 sm:$0xff]   ;;  %v8731_v17 = vpack.i.bf16 %v174_v14, %v173_v12  ;;  %v175_v18 = vld [vmem:[%s11747_s0 + $0x48] sm:$0xff] }
  0xbd   :  { %8687 = vrot.lane.b32.xlu0 %v8686_v6, %s10106_s30  ;;  %v9034_v19 = vld [vmem:[#allocation2 + $0x1c] ss:$12 sps:$4 sm:$0xff]   ;;  %v176_v20 = vld [vmem:[%s11747_s0 + $0x50] sm:$0xff]  ;;  %1026 = vmatprep.subr.bf16.mxu0 %v9031_v15  ;;  %v8736_v25 = vpack.i.bf16 %v175_v18, %v174_v14  ;;  %v178_v27 = vld [vmem:[%s11747_s0 + $0x60] sm:$0xff] }
  0xbe   :  { %1027 = vmatpush1.bf16.msra.mxu0 %v9033_v16  ;;  %v9036_v21 = vld [vmem:[#allocation2 + $0x18] ss:$12 sps:$4 sm:$0xff]   ;;  %8365 = vmatprep.subr.bf16.mxu1 %v9031_v15  ;;  %v9037_v22 = vld [vmem:[#allocation2 + $0x34] ss:$12 sps:$4 sm:$0xff]   ;;  %v8741_v23 = vpack.i.bf16 %v176_v20, %v175_v18  ;;  %v177_v24 = vld [vmem:[%s11747_s0 + $0x58] sm:$0xff] }
  0xbf   :  { %1028 = vmatprep.subr.bf16.mxu0 %v9034_v19  ;;  %8369 = vmatpush1.bf16.msra.mxu1 %v9033_v16  ;;  %v9039_v26 = vld [vmem:[#allocation2 + $0x30] ss:$12 sps:$4 sm:$0xff]   ;;  %v9040_v28 = vld [vmem:[#allocation2 + $0x4c] ss:$12 sps:$4 sm:$0xff]   ;;  %v8751_v29 = vpack.i.bf16 %v177_v24, %v176_v20  ;;  %v9042_v30 = vld [vmem:[#allocation2 + $0x48] ss:$12 sps:$4 sm:$0xff]   ;;  %v8761_v33 = vpack.i.bf16 %v178_v27, %v177_v24 }
  0xc0   :  { %8702 = vrot.lane.b32.xlu1 %v8696_v4, %s10106_s30  ;;  %8366 = vmatprep.subr.bf16.mxu1 %v9034_v19  ;;  %v179_v31 = vld [vmem:[%s11747_s0 + $0x68] sm:$0xff]  ;;  %v180_v32 = vld [vmem:[%s11747_s0 + $0x70] sm:$0xff]  ;;  %v181_v34 = vld [vmem:[%s11747_s0 + $0x78] sm:$0xff] }
  0xc1   :  { %8692 = vrot.lane.b32.xlu0 %v8691_v7, %s10115_s7  ;;  %v8771_v35 = vpack.i.bf16 %v180_v32, %v179_v31  ;;  %v8766_v36 = vpack.i.bf16 %v179_v31, %v178_v27  ;;  %v182_v37 = vld [vmem:[%s11747_s0 + $0x80] sm:$0xff]  ;;  %v8781_v38 = vpack.i.bf16 %v181_v34, %v180_v32  ;;  %v183_v39 = vld [vmem:[%s11747_s0 + $0x88] sm:$0xff]  ;;  %v184_v40 = vld [vmem:[%s11747_s0 + $0x90] sm:$0xff] }
  0xc2   :  { %1029 = vmatpush1.bf16.msra.mxu0 %v9036_v21  ;;  %v8791_v41 = vpack.i.bf16 %v182_v37, %v181_v34  ;;  %v185_v42 = vld [vmem:[%s11747_s0 + $0x98] sm:$0xff]  ;;  %v8801_v43 = vpack.i.bf16 %v184_v40, %v183_v39  ;;  %v8796_v44 = vpack.i.bf16 %v183_v39, %v182_v37  ;;  %v186_v45 = vld [vmem:[%s11747_s0 + $0xa0] sm:$0xff]  ;;  %v187_v47 = vld [vmem:[%s11747_s0 + $0xa8] sm:$0xff] }
  0xc3   :  { %1030 = vmatprep.subr.bf16.mxu0 %v9037_v22  ;;  %8370 = vmatpush1.bf16.msra.mxu1 %v9036_v21  ;;  %v8811_v46 = vpack.i.bf16 %v185_v42, %v184_v40  ;;  %v188_v48 = vld [vmem:[%s11747_s0 + $0xb0] sm:$0xff]  ;;  %v8821_v49 = vpack.i.bf16 %v186_v45, %v185_v42  ;;  %v189_v50 = vld [vmem:[%s11747_s0 + $0xb8] sm:$0xff]  ;;  %v8826_v52 = vpack.i.bf16 %v187_v47, %v186_v45  ;;  %v190_v53 = vld [vmem:[%s11747_s0 + $0xc0] sm:$0xff] }
  0xc4   :  { %8712 = vrot.lane.b32.xlu1 %v8711_v10, %s10114_s18  ;;  %8367 = vmatprep.subr.bf16.mxu1 %v9037_v22  ;;  %v8831_v51 = vpack.i.bf16 %v188_v48, %v187_v47  ;;  %v8841_v54 = vpack.i.bf16 %v189_v50, %v188_v48  ;;  %v191_v55 = vld [vmem:[%s11747_s0 + $0xc8] sm:$0xff]  ;;  %v192_v56 = vld [vmem:[%s11747_s0 + $0xd0] sm:$0xff]  ;;  %v8851_v57 = vpack.i.bf16 %v190_v53, %v189_v50  ;;  %v193_v58 = vld [vmem:[%s11747_s0 + $0xd8] sm:$0xff] }
  0xc5   :  { %8707 = vrot.lane.b32.xlu0 %v8706_v11, %s10115_s7  ;;  %v8861_v59 = vpack.i.bf16 %v192_v56, %v191_v55  ;;  %v8856_v60 = vpack.i.bf16 %v191_v55, %v190_v53  ;;  %v194_v61 = vld [vmem:[%s11747_s0 + $0xe0] sm:$0xff]  ;;  %v8871_v62 = vpack.i.bf16 %v193_v58, %v192_v56  ;;  %v195_v63 = vld [vmem:[%s11747_s0 + $0xe8] sm:$0xff]  ;;  %v196_v1 = vld [vmem:[%s11747_s0 + $0xf0] sm:$0xff] }
  0xc6   :  { %1031 = vmatpush1.bf16.msra.mxu0 %v9039_v26  ;;  %v8881_v2 = vpack.i.bf16 %v194_v61, %v193_v58  ;;  %v197_v3 = vld [vmem:[%s11747_s0 + $0xf8] sm:$0xff]  ;;  %v8891_v4 = vpack.i.bf16 %v196_v1, %v195_v63  ;;  %v8886_v5 = vpack.i.bf16 %v195_v63, %v194_v61  ;;  %v10452_v6 = vld [vmem:[%s11747_s0 + $0x168] sm:$0xff]  ;;  %v212_v7 = vld [vmem:[%s11747_s0 + $0x170] sm:$0xff] }
  0xc7   :  { %1032 = vmatprep.subr.bf16.mxu0 %v9040_v28  ;;  %8371 = vmatpush1.bf16.msra.mxu1 %v9039_v26  ;;  %v8901_v8 = vpack.i.bf16 %v197_v3, %v196_v1  ;;  %v198_v9 = vld [vmem:[%s11747_s0 + $0x100] sm:$0xff]  ;;  %v10467_v11 = vpack.i.bf16 %v212_v7, %v10452_v6  ;;  %v199_v15 = vld [vmem:[%s11747_s0 + $0x108] sm:$0xff]  ;;  %v200_v19 = vld [vmem:[%s11747_s0 + $0x110] sm:$0xff] }
  0xc8   :  { %8722 = vrot.lane.b32.xlu1 %v8721_v13, %s10115_s7  ;;  %8368 = vmatprep.subr.bf16.mxu1 %v9040_v28  ;;  %v8906_v12 = vpack.i.bf16 %v198_v9, %v197_v3  ;;  %v214_v13 = vld [vmem:[%s11747_s0 + $0x180] sm:$0xff]  ;;  %v8926_v18 = vpack.i.bf16 %v199_v15, %v198_v9  ;;  %v8936_v21 = vpack.i.bf16 %v200_v19, %v199_v15  ;;  %v201_v22 = vld [vmem:[%s11747_s0 + $0x118] sm:$0xff]  ;;  %v203_v28 = vld [vmem:[%s11747_s0 + $0x128] sm:$0xff] }
  0xc9   :  { %8717 = vrot.lane.b32.xlu0 %v8711_v10, %s10106_s30  ;;  %v213_v10 = vld [vmem:[%s11747_s0 + $0x178] sm:$0xff]  ;;  %v8951_v24 = vpack.i.bf16 %v200_v19, %v214_v13  ;;  %v202_v27 = vld [vmem:[%s11747_s0 + $0x120] sm:$0xff]  ;;  %v207_v50 = vld [vmem:[%s11747_s0 + $0x148] sm:$0xff] }
  0xca   :  { %1033 = vmatpush1.bf16.msra.mxu0 %v9042_v30  ;;  %v8921_v14 = vpack.i.bf16 %v213_v10, %v212_v7  ;;  %v9043_v16 = vld [vmem:[#allocation2 + $0x8] ss:$12 sps:$4 sm:$0xff]   ;;  %v8941_v20 = vpack.i.bf16 %v199_v15, %v213_v10  ;;  %v8961_v32 = vpack.i.bf16 %v203_v28, %v202_v27 }
  0xcb   :  { %8372 = vmatpush1.bf16.msra.mxu1 %v9042_v30  ;;  %v205_v30 = vld [vmem:[%s11747_s0 + $0x138] sm:$0xff]  ;;  %v206_v37 = vld [vmem:[%s11747_s0 + $0x140] sm:$0xff] }
  0xcc   :  { %8732 = vrot.lane.b32.xlu1 %v8731_v17, %s10106_s30  ;;  %8198 = vmatprep.subr.bf16.mxu1 %v9043_v16  ;;  %v10550_v1 = vld [vmem:[%s11747_s0 + $0x160] sm:$0xff]  ;;  %v8991_v9 = vpack.i.bf16 %v207_v50, %v206_v37 }
  0xcd   :  { %8727 = vrot.lane.b32.xlu0 %v8731_v17, %s10114_s18  ;;  %v8931_v17 = vpack.i.bf16 %v214_v13, %v213_v10  ;;  %v209_v10 = vld [vmem:[%s11747_s0 + $0x158] sm:$0xff] }
  0xd0   :  { %8742 = vrot.lane.b32.xlu1 %v8741_v23, %s10114_s18 }
  0xd1   :  { %8737 = vrot.lane.b32.xlu0 %v8736_v25, %s10115_s7  ;;  %v8946_v25 = vpack.i.bf16 %v201_v22, %v200_v19 }
  0xd4   :  { %8752 = vrot.lane.b32.xlu1 %v8751_v29, %s10115_s7  ;;  %v204_v29 = vld [vmem:[%s11747_s0 + $0x130] sm:$0xff] }
  0xd5   :  { %8747 = vrot.lane.b32.xlu0 %v8741_v23, %s10106_s30  ;;  %v215_v23 = vld [vmem:[%s11747_s0 + $0x188] sm:$0xff]  ;;  %v8966_v31 = vpack.i.bf16 %v204_v29, %v203_v28 }
  0xd6   :  { %v8956_v26 = vpack.i.bf16 %v201_v22, %v215_v23 }
  0xd8   :  { %8762 = vrot.lane.b32.xlu1 %v8761_v33, %s10106_s30 }
  0xd9   :  { %8757 = vrot.lane.b32.xlu0 %v8761_v33, %s10114_s18 }
  0xdc   :  { %8772 = vrot.lane.b32.xlu1 %v8771_v35, %s10114_s18 }
  0xdd   :  { %8767 = vrot.lane.b32.xlu0 %v8766_v36, %s10115_s7  ;;  %v8976_v36 = vpack.i.bf16 %v205_v30, %v204_v29 }
  0xe0   :  { %8782 = vrot.lane.b32.xlu1 %v8781_v38, %s10115_s7 }
  0xe1   :  { %8777 = vrot.lane.b32.xlu0 %v8771_v35, %s10106_s30  ;;  %v166_v35 = vld [vmem:[%s11747_s0] sm:$0xff] }
  0xe4   :  { %8792 = vrot.lane.b32.xlu1 %v8791_v41, %s10106_s30 }
  0xe5   :  { %8787 = vrot.lane.b32.xlu0 %v8791_v41, %s10114_s18 }
  0xe8   :  { %8802 = vrot.lane.b32.xlu1 %v8801_v43, %s10114_s18 }
  0xe9   :  { %8797 = vrot.lane.b32.xlu0 %v8796_v44, %s10115_s7 }
  0xec   :  { %8812 = vrot.lane.b32.xlu1 %v8811_v46, %s10115_s7  ;;  %v10523_v46 = vld [vmem:[%s11747_s0 + $0x150] sm:$0xff] }
  0xed   :  { %8807 = vrot.lane.b32.xlu0 %v8801_v43, %s10106_s30 }
  0xf0   :  { %8822 = vrot.lane.b32.xlu1 %v8821_v49, %s10106_s30 }
  0xf1   :  { %8817 = vrot.lane.b32.xlu0 %v8821_v49, %s10114_s18  ;;  %v8986_v49 = vpack.i.bf16 %v206_v37, %v205_v30  ;;  %v9016_v30 = vpack.i.bf16 %v10452_v6, %v10550_v1 }
  0xf4   :  { %8832 = vrot.lane.b32.xlu1 %v8831_v51, %s10114_s18 }
  0xf5   :  { %8827 = vrot.lane.b32.xlu0 %v8826_v52, %s10115_s7 }
  0xf8   :  { %8842 = vrot.lane.b32.xlu1 %v8841_v54, %s10115_s7 }
  0xf9   :  { %8837 = vrot.lane.b32.xlu0 %v8831_v51, %s10106_s30  ;;  %v9793_v51 = vld [vmem:[%s11747_s0 + $0x8] sm:$0xff] }
  0xfc   :  { %8852 = vrot.lane.b32.xlu1 %v8851_v57, %s10106_s30 }
  0xfd   :  { %8847 = vrot.lane.b32.xlu0 %v8851_v57, %s10114_s18  ;;  %v9794_v57 = vld [vmem:[%s11747_s0 + $0x18] sm:$0xff] }
 0x100   :  { %8862 = vrot.lane.b32.xlu1 %v8861_v59, %s10114_s18 }
 0x101   :  { %8857 = vrot.lane.b32.xlu0 %v8856_v60, %s10115_s7 }
 0x104   :  { %8872 = vrot.lane.b32.xlu1 %v8871_v62, %s10115_s7 }
 0x105   :  { %8867 = vrot.lane.b32.xlu0 %v8861_v59, %s10106_s30  ;;  %v9795_v59 = vld [vmem:[%s11747_s0 + $0x10] sm:$0xff] }
 0x108   :  { %8882 = vrot.lane.b32.xlu1 %v8881_v2, %s10106_s30 }
 0x109   :  { %8877 = vrot.lane.b32.xlu0 %v8881_v2, %s10114_s18 }
 0x10c   :  { %8892 = vrot.lane.b32.xlu1 %v8891_v4, %s10114_s18 }
 0x10d   :  { %8887 = vrot.lane.b32.xlu0 %v8886_v5, %s10115_s7  ;;  %v8996_v5 = vpack.i.bf16 %v10523_v46, %v207_v50 }
 0x110   :  { %8902 = vrot.lane.b32.xlu1 %v8901_v8, %s10115_s7 }
 0x111   :  { %8897 = vrot.lane.b32.xlu0 %v8891_v4, %s10106_s30 }
 0x114   :  { %8912 = vrot.lane.b32.xlu1 %v10467_v11, %s10106_s30 }
 0x115   :  { %8907 = vrot.lane.b32.xlu0 %v8906_v12, %s10114_s18 }
 0x118   :  { %8922 = vrot.lane.b32.xlu1 %v8921_v14, %s10115_s7 }
 0x119   :  { %8917 = vrot.lane.b32.xlu0 %v8906_v12, %s10106_s30 }
 0x11c   :  { %8932 = vrot.lane.b32.xlu1 %v8931_v17, %s10114_s18 }
 0x11d   :  { %8927 = vrot.lane.b32.xlu0 %v8926_v18, %s10115_s7  ;;  %v9006_v18 = vpack.i.bf16 %v10550_v1, %v209_v10 }
 0x120   :  { %8942 = vrot.lane.b32.xlu1 %v8941_v20, %s10106_s30 }
 0x121   :  { %8937 = vrot.lane.b32.xlu0 %v8936_v21, %s10114_s18 }
 0x124   :  { %8952 = vrot.lane.b32.xlu1 %v8951_v24, %s10115_s7  ;;  %v9796_v24 = vld [vmem:[%s11747_s0 + $0x28] sm:$0xff] }
 0x125   :  { %8947 = vrot.lane.b32.xlu0 %v8946_v25, %s10106_s30 }
 0x128   :  { %8957 = vrot.lane.b32.xlu1 %v8956_v26, %s10114_s18  ;;  %v9797_v26 = vld [vmem:[%s11747_s0 + $0x20] sm:$0xff] }
 0x129   :  { %488 = vrot.lane.b32.xlu0 %v201_v22, %s10115_s7 }
 0x12c   :  { %350 = vrot.lane.b32.xlu1 %v202_v27, %s10106_s30 }
 0x12d   :  { %630 = vrot.lane.b32.xlu0 %v202_v27, %s10114_s18 }
 0x12e   :  { %v8698_v33 = vpop.permute.xlu1 %8697 }
 0x12f   :  { %v8688_v34 = vpop.permute.xlu0 %8687  ;;  %v8700_v41 = vunpack.i.h.bf16 %v8698_v33  ;;  %v8699_v42 = vunpack.i.l.bf16 %v8698_v33  ;;  %v9011_v33 = vpack.i.bf16 %v209_v10, %v10523_v46  ;;  %v9799_v46 = vld [vmem:[%s11747_s0 + $0x30] sm:$0xff] }
 0x130   :  { %8967 = vrot.lane.b32.xlu1 %v8966_v31, %s10114_s18  ;;  %v8690_v38 = vunpack.i.h.bf16 %v8688_v34  ;;  %v8689_v39 = vunpack.i.l.bf16 %v8688_v34 }
 0x131   :  { %8962 = vrot.lane.b32.xlu0 %v8961_v32, %s10115_s7 }
 0x132   :  { %v8703_v40 = vpop.permute.xlu1 %8702  ;;  %v707_v52 = vsel %vm705_vm0, %v9793_v51, %v8690_v38  ;;  %v706_v53 = vsel %vm705_vm0, %v166_v35, %v8689_v39 }
 0x133   :  { %v8705_v43 = vunpack.i.h.bf16 %v8703_v40  ;;  %v8704_v44 = vunpack.i.l.bf16 %v8703_v40  ;;  %v8693_v45 = vpop.permute.xlu0 %8692 }
 0x134   :  { %v8695_v47 = vunpack.i.h.bf16 %v8693_v45  ;;  %v8694_v48 = vunpack.i.l.bf16 %v8693_v45  ;;  %8977 = vrot.lane.b32.xlu1 %v8976_v36, %s10115_s7 }
 0x135   :  { %8972 = vrot.lane.b32.xlu0 %v8966_v31, %s10106_s30  ;;  %v709_v58 = vsel %vm705_vm0, %v9794_v57, %v8705_v43  ;;  %v708_v60 = vsel %vm705_vm0, %v9795_v59, %v8704_v44  ;;  %v9798_v44 = vld [vmem:[%s11747_s0 + $0x38] sm:$0xff] }
 0x136   :  { %v754_v54 = vsel %vm753_vm1, %v706_v53, %v8694_v48  ;;  %v755_v55 = vsel %vm753_vm1, %v707_v52, %v8695_v47  ;;  %v8713_v56 = vpop.permute.xlu1 %8712 }
 0x137   :  { %v8708_v61 = vpop.permute.xlu0 %8707  ;;  %v802_v62 = vsel %vm801_vm2, %v754_v54, %v8699_v42  ;;  %v803_v63 = vsel %vm801_vm2, %v755_v55, %v8700_v41  ;;  %v8715_v7 = vunpack.i.h.bf16 %v8713_v56  ;;  %v8714_v8 = vunpack.i.l.bf16 %v8713_v56 }
 0x138   :  { %v8710_v2 = vunpack.i.h.bf16 %v8708_v61  ;;  %v8709_v3 = vunpack.i.l.bf16 %v8708_v61  ;;  %v10552_v4 = vpack.c.bf16 %v803_v63, %v802_v62  ;;  %8987 = vrot.lane.b32.xlu1 %v8986_v49, %s10106_s30  ;;  %v9800_v62 = vld [vmem:[%s11747_s0 + $0x48] sm:$0xff] }
 0x139   :  { %8982 = vrot.lane.b32.xlu0 %v8986_v49, %s10114_s18 }
 0x13a   :  { %v757_v12 = vsel %vm753_vm1, %v709_v58, %v8710_v2  ;;  %v756_v13 = vsel %vm753_vm1, %v708_v60, %v8709_v3  ;;  %7375 = vmatmul.mubr.msk.bf16.vlgmr.msra.gmra.mrb[0].mxu0 %vm953_vm3, %v10552_v4  ;;  %v8723_v14 = vpop.permute.xlu1 %8722  ;;  %v9801_v2 = vld [vmem:[%s11747_s0 + $0x40] sm:$0xff] }
 0x13b   :  { %v8718_v15 = vpop.permute.xlu0 %8717  ;;  %1068 = vmatprep.mubr.bf16.mxu0 %v11759_v0  ;;  %v804_v19 = vsel %vm801_vm2, %v756_v13, %v8714_v8  ;;  %v805_v20 = vsel %vm801_vm2, %v757_v12, %v8715_v7  ;;  %v8725_v21 = vunpack.i.h.bf16 %v8723_v14  ;;  %v8724_v22 = vunpack.i.l.bf16 %v8723_v14 }
 0x13c   :  { %v8720_v16 = vunpack.i.h.bf16 %v8718_v15  ;;  %v8719_v17 = vunpack.i.l.bf16 %v8718_v15  ;;  %8997 = vrot.lane.b32.xlu1 %v8996_v5, %s10114_s18  ;;  %v10578_v29 = vpack.c.bf16 %v805_v20, %v804_v19 }
 0x13d   :  { %8992 = vrot.lane.b32.xlu0 %v8991_v9, %s10115_s7 }
 0x13e   :  { %v8733_v23 = vpop.permute.xlu1 %8732  ;;  %v711_v25 = vsel %vm705_vm0, %v9796_v24, %v8720_v16  ;;  %v710_v27 = vsel %vm705_vm0, %v9797_v26, %v8719_v17  ;;  %v9803_v24 = vld [vmem:[%s11747_s0 + $0x50] sm:$0xff] }
 0x13f   :  { %v8728_v28 = vpop.permute.xlu0 %8727  ;;  %v758_v34 = vsel %vm753_vm1, %v710_v27, %v8724_v22  ;;  %v759_v35 = vsel %vm753_vm1, %v711_v25, %v8725_v21  ;;  %v8735_v37 = vunpack.i.h.bf16 %v8733_v23  ;;  %v8734_v38 = vunpack.i.l.bf16 %v8733_v23  ;;  %v9802_v22 = vld [vmem:[%s11747_s0 + $0x58] sm:$0xff] }
 0x140   :  { %9007 = vrot.lane.b32.xlu1 %v9006_v18, %s10106_s30  ;;  %v8730_v31 = vunpack.i.h.bf16 %v8728_v28  ;;  %v8729_v32 = vunpack.i.l.bf16 %v8728_v28  ;;  %v9047_v28 = vld [vmem:[#allocation7 + $0x8] ss:$16 sps:$4 sm:$0xff]  }
 0x141   :  { %9002 = vrot.lane.b32.xlu0 %v8996_v5, %s10106_s30  ;;  %v713_v45 = vsel %vm705_vm0, %v9798_v44, %v8735_v37  ;;  %v712_v47 = vsel %vm705_vm0, %v9799_v46, %v8734_v38 }
 0x142   :  { %7376 = vmatmul.mubr.msk.bf16.gmra.mrb[4].mxu0 %vm953_vm3, %v10578_v29  ;;  %v8743_v36 = vpop.permute.xlu1 %8742  ;;  %v806_v6 = vsel %vm801_vm2, %v758_v34, %v8729_v32  ;;  %v807_v40 = vsel %vm801_vm2, %v759_v35, %v8730_v31 }
 0x143   :  { %v8738_v39 = vpop.permute.xlu0 %8737  ;;  %1078 = vmatprep.mubr.bf16.mxu0 %v11759_v0  ;;  %v10602_v49 = vpack.c.bf16 %v807_v40, %v806_v6  ;;  %v8745_v50 = vunpack.i.h.bf16 %v8743_v36  ;;  %v8744_v51 = vunpack.i.l.bf16 %v8743_v36 }
 0x144   :  { %9017 = vrot.lane.b32.xlu1 %v9016_v30, %s10115_s7  ;;  %v8740_v42 = vunpack.i.h.bf16 %v8738_v39  ;;  %v8739_v43 = vunpack.i.l.bf16 %v8738_v39  ;;  %v9049_v30 = vld [vmem:[#allocation7 + $0xc] ss:$16 sps:$4 sm:$0xff]  }
 0x145   :  { %9012 = vrot.lane.b32.xlu0 %v9011_v33, %s10115_s7  ;;  %4801 = vmatprep.subr.bf16.mxu0 %v9049_v30 }
 0x146   :  { %v8753_v41 = vpop.permute.xlu1 %8752  ;;  %v761_v52 = vsel %vm753_vm1, %v713_v45, %v8740_v42  ;;  %v760_v53 = vsel %vm753_vm1, %v712_v47, %v8739_v43  ;;  %4802 = vmatpush1.bf16.msra.mxu0 %v9047_v28  ;;  %v9804_v43 = vld [vmem:[%s11747_s0 + $0x68] sm:$0xff]  ;;  %v9805_v45 = vld [vmem:[%s11747_s0 + $0x60] sm:$0xff] }
 0x147   :  { %v8748_v48 = vpop.permute.xlu0 %8747  ;;  %v808_v58 = vsel %vm801_vm2, %v760_v53, %v8744_v51  ;;  %v8755_v59 = vunpack.i.h.bf16 %v8753_v41  ;;  %v8754_v60 = vunpack.i.l.bf16 %v8753_v41  ;;  %v9808_v28 = vld [vmem:[%s11747_s0 + $0x88] sm:$0xff] }
 0x148   :  { %9027 = vrot.lane.b32.xlu1 %v10467_v11, %s10114_s18  ;;  %v8750_v55 = vunpack.i.h.bf16 %v8748_v48  ;;  %v8749_v56 = vunpack.i.l.bf16 %v8748_v48  ;;  %v809_v11 = vsel %vm801_vm2, %v761_v52, %v8745_v50 }
 0x149   :  { %9022 = vrot.lane.b32.xlu0 %v9006_v18, %s10114_s18  ;;  %v10622_v7 = vpack.c.bf16 %v809_v11, %v808_v58 }
 0x14a   :  { %7377 = vmatmul.mubr.msk.bf16.gmra.mrb[8].mxu0 %vm953_vm3, %v10602_v49  ;;  %v8763_v54 = vpop.permute.xlu1 %8762  ;;  %v715_v63 = vsel %vm705_vm0, %v9800_v62, %v8750_v55  ;;  %v714_v3 = vsel %vm705_vm0, %v9801_v2, %v8749_v56  ;;  %v9050_v55 = vld [vmem:[#allocation7 + $0x28] ss:$16 sps:$4 sm:$0xff]   ;;  %v9052_v56 = vld [vmem:[#allocation7 + $0x2c] ss:$16 sps:$4 sm:$0xff]  }
 0x14b   :  { %1088 = vmatprep.mubr.bf16.mxu0 %v11759_v0  ;;  %v8758_v57 = vpop.permute.xlu0 %8757  ;;  %v762_v10 = vsel %vm753_vm1, %v714_v3, %v8754_v60  ;;  %v763_v12 = vsel %vm753_vm1, %v715_v63, %v8755_v59  ;;  %v8765_v14 = vunpack.i.h.bf16 %v8763_v54  ;;  %v8764_v15 = vunpack.i.l.bf16 %v8763_v54  ;;  %4803 = vmatprep.subr.bf16.mxu0 %v9052_v56  ;;  %v9806_v2 = vld [vmem:[%s11747_s0 + $0x78] sm:$0xff] }
 0x14c   :  { %v8760_v8 = vunpack.i.h.bf16 %v8758_v57  ;;  %v8759_v9 = vunpack.i.l.bf16 %v8758_v57  ;;  %4804 = vmatpush1.bf16.msra.mxu0 %v9050_v55 }
 0x14d   :  { %v717_v23 = vsel %vm705_vm0, %v9802_v22, %v8765_v14  ;;  %v716_v25 = vsel %vm705_vm0, %v9803_v24, %v8764_v15  ;;  %v9059_v14 = vld [vmem:[#allocation7 + $0x48] ss:$16 sps:$4 sm:$0xff]   ;;  %v9061_v15 = vld [vmem:[#allocation7 + $0x4c] ss:$16 sps:$4 sm:$0xff]  }
 0x14e   :  { %v8773_v61 = vpop.permute.xlu1 %8772  ;;  %v810_v17 = vsel %vm801_vm2, %v762_v10, %v8759_v9  ;;  %v811_v18 = vsel %vm801_vm2, %v763_v12, %v8760_v8  ;;  %4805 = vmatprep.subr.bf16.mxu0 %v9061_v15 }
 0x14f   :  { %v8768_v5 = vpop.permute.xlu0 %8767  ;;  %v10639_v27 = vpack.c.bf16 %v811_v18, %v810_v17  ;;  %v8775_v31 = vunpack.i.h.bf16 %v8773_v61  ;;  %v8774_v32 = vunpack.i.l.bf16 %v8773_v61 }
 0x150   :  { %v8770_v20 = vunpack.i.h.bf16 %v8768_v5  ;;  %v8769_v21 = vunpack.i.l.bf16 %v8768_v5  ;;  %v9807_v5 = vld [vmem:[%s11747_s0 + $0x70] sm:$0xff]  ;;  %4806 = vmatpush1.bf16.msra.mxu0 %v9059_v14 }
 0x152   :  { %7378 = vmatmul.mubr.msk.bf16.gmra.mrb[12].mxu0 %vm953_vm3, %v10622_v7  ;;  %v8783_v13 = vpop.permute.xlu1 %8782  ;;  %v765_v33 = vsel %vm753_vm1, %v717_v23, %v8770_v20  ;;  %v764_v34 = vsel %vm753_vm1, %v716_v25, %v8769_v21 }
 0x153   :  { %1098 = vmatprep.mubr.bf16.mxu0 %v11759_v0  ;;  %v8778_v16 = vpop.permute.xlu0 %8777  ;;  %v812_v39 = vsel %vm801_vm2, %v764_v34, %v8774_v32  ;;  %v813_v6 = vsel %vm801_vm2, %v765_v33, %v8775_v31  ;;  %v8785_v40 = vunpack.i.h.bf16 %v8783_v13  ;;  %v8784_v41 = vunpack.i.l.bf16 %v8783_v13  ;;  %v9809_v31 = vld [vmem:[%s11747_s0 + $0x80] sm:$0xff] }
 0x154   :  { %v8780_v36 = vunpack.i.h.bf16 %v8778_v16  ;;  %v8779_v37 = vunpack.i.l.bf16 %v8778_v16  ;;  %v10658_v48 = vpack.c.bf16 %v813_v6, %v812_v39 }
 0x156   :  { %v8793_v19 = vpop.permute.xlu1 %8792  ;;  %v719_v44 = vsel %vm705_vm0, %v9804_v43, %v8780_v36  ;;  %v718_v46 = vsel %vm705_vm0, %v9805_v45, %v8779_v37  ;;  %v9068_v37 = vld [vmem:[#allocation7 + $0x68] ss:$16 sps:$4 sm:$0xff]  }
 0x157   :  { %v8788_v26 = vpop.permute.xlu0 %8787  ;;  %v766_v52 = vsel %vm753_vm1, %v718_v46, %v8784_v41  ;;  %v767_v53 = vsel %vm753_vm1, %v719_v44, %v8785_v40  ;;  %v8795_v57 = vunpack.i.h.bf16 %v8793_v19  ;;  %v8794_v58 = vunpack.i.l.bf16 %v8793_v19 }
 0x158   :  { %v8790_v50 = vunpack.i.h.bf16 %v8788_v26  ;;  %v8789_v51 = vunpack.i.l.bf16 %v8788_v26 }
 0x159   :  { %v721_v3 = vsel %vm705_vm0, %v9806_v2, %v8795_v57  ;;  %v720_v8 = vsel %vm705_vm0, %v9807_v5, %v8794_v58  ;;  %v9076_v57 = vld [vmem:[#allocation7 + $0x8c] ss:$16 sps:$4 sm:$0xff]   ;;  %v9080_v2 = vld [vmem:[#allocation7 + $0xa8] ss:$16 sps:$4 sm:$0xff]  }
 0x15a   :  { %7379 = vmatmul.mubr.msk.bf16.gmra.mrb[16].mxu0 %vm953_vm3, %v10639_v27  ;;  %v8803_v35 = vpop.permute.xlu1 %8802  ;;  %v814_v59 = vsel %vm801_vm2, %v766_v52, %v8789_v51  ;;  %v815_v60 = vsel %vm801_vm2, %v767_v53, %v8790_v50  ;;  %v9810_v51 = vld [vmem:[%s11747_s0 + $0x98] sm:$0xff]  ;;  %v9811_v53 = vld [vmem:[%s11747_s0 + $0x90] sm:$0xff] }
 0x15b   :  { %1108 = vmatprep.mubr.bf16.mxu0 %v11759_v0  ;;  %v8798_v38 = vpop.permute.xlu0 %8797  ;;  %v10679_v10 = vpack.c.bf16 %v815_v60, %v814_v59  ;;  %v8805_v12 = vunpack.i.h.bf16 %v8803_v35  ;;  %v8804_v13 = vunpack.i.l.bf16 %v8803_v35  ;;  %v9074_v59 = vld [vmem:[#allocation7 + $0x88] ss:$16 sps:$4 sm:$0xff]  }
 0x15c   :  { %v8800_v62 = vunpack.i.h.bf16 %v8798_v38  ;;  %v8799_v63 = vunpack.i.l.bf16 %v8798_v38  ;;  %v9070_v38 = vld [vmem:[#allocation7 + $0x6c] ss:$16 sps:$4 sm:$0xff]  }
 0x15d   :  { %4807 = vmatprep.subr.bf16.mxu0 %v9070_v38  ;;  %v9100_v38 = vld [vmem:[#allocation7 + $0x10c] ss:$16 sps:$4 sm:$0xff]  }
 0x15e   :  { %v10648_v42 = vpop.permute.xlu1 %8812  ;;  %v769_v16 = vsel %vm753_vm1, %v721_v3, %v8800_v62  ;;  %v768_v17 = vsel %vm753_vm1, %v720_v8, %v8799_v63  ;;  %4808 = vmatpush1.bf16.msra.mxu0 %v9068_v37  ;;  %v9082_v3 = vld [vmem:[#allocation7 + $0xac] ss:$16 sps:$4 sm:$0xff]  }
 0x15f   :  { %v8808_v47 = vpop.permute.xlu0 %8807  ;;  %v816_v22 = vsel %vm801_vm2, %v768_v17, %v8804_v13  ;;  %v817_v23 = vsel %vm801_vm2, %v769_v16, %v8805_v12  ;;  %v8815_v24 = vunpack.i.h.bf16 %v10648_v42  ;;  %v8814_v25 = vunpack.i.l.bf16 %v10648_v42  ;;  %4809 = vmatprep.subr.bf16.mxu0 %v9076_v57  ;;  %v9812_v16 = vld [vmem:[%s11747_s0 + $0xa8] sm:$0xff] }
 0x160   :  { %v8810_v19 = vunpack.i.h.bf16 %v8808_v47  ;;  %v8809_v20 = vunpack.i.l.bf16 %v8808_v47  ;;  %v10706_v34 = vpack.c.bf16 %v817_v23, %v816_v22 }
 0x162   :  { %7380 = vmatmul.mubr.msk.bf16.gmra.mrb[20].mxu0 %vm953_vm3, %v10658_v48  ;;  %v10664_v54 = vpop.permute.xlu1 %8822  ;;  %v723_v30 = vsel %vm705_vm0, %v9808_v28, %v8810_v19  ;;  %v722_v32 = vsel %vm705_vm0, %v9809_v31, %v8809_v20  ;;  %v9813_v19 = vld [vmem:[%s11747_s0 + $0xa0] sm:$0xff] }
 0x163   :  { %1118 = vmatprep.mubr.bf16.mxu0 %v11759_v0  ;;  %v8818_v11 = vpop.permute.xlu0 %8817  ;;  %v770_v39 = vsel %vm753_vm1, %v722_v32, %v8814_v25  ;;  %v771_v6 = vsel %vm753_vm1, %v723_v30, %v8815_v24  ;;  %v8825_v41 = vunpack.i.h.bf16 %v10664_v54  ;;  %v8824_v42 = vunpack.i.l.bf16 %v10664_v54  ;;  %4810 = vmatpush1.bf16.msra.mxu0 %v9074_v59  ;;  %v9088_v25 = vld [vmem:[#allocation7 + $0xcc] ss:$16 sps:$4 sm:$0xff]  }
 0x164   :  { %v8820_v35 = vunpack.i.h.bf16 %v8818_v11  ;;  %v8819_v36 = vunpack.i.l.bf16 %v8818_v11  ;;  %4811 = vmatprep.subr.bf16.mxu0 %v9082_v3  ;;  %v9094_v32 = vld [vmem:[#allocation7 + $0xec] ss:$16 sps:$4 sm:$0xff]   ;;  %v9816_v3 = vld [vmem:[%s11747_s0 + $0x168] sm:$0xff] }
 0x165   :  { %v725_v52 = vsel %vm705_vm0, %v9810_v51, %v8825_v41  ;;  %v724_v54 = vsel %vm705_vm0, %v9811_v53, %v8824_v42 }
 0x166   :  { %v10669_v61 = vpop.permute.xlu1 %8832  ;;  %v818_v44 = vsel %vm801_vm2, %v770_v39, %v8819_v36  ;;  %v819_v45 = vsel %vm801_vm2, %v771_v6, %v8820_v35 }
 0x167   :  { %v8828_v9 = vpop.permute.xlu0 %8827  ;;  %v10733_v56 = vpack.c.bf16 %v819_v45, %v818_v44  ;;  %v8835_v58 = vunpack.i.h.bf16 %v10669_v61  ;;  %v8834_v11 = vunpack.i.l.bf16 %v10669_v61  ;;  %4812 = vmatpush1.bf16.msra.mxu0 %v9080_v2  ;;  %v9098_v45 = vld [vmem:[#allocation7 + $0x108] ss:$16 sps:$4 sm:$0xff]  }
 0x168   :  { %v8830_v46 = vunpack.i.h.bf16 %v8828_v9  ;;  %v8829_v47 = vunpack.i.l.bf16 %v8828_v9  ;;  %4813 = vmatprep.subr.bf16.mxu0 %v9088_v25  ;;  %v9818_v25 = vld [vmem:[%s11747_s0 + $0xc0] sm:$0xff] }
 0x16a   :  { %7381 = vmatmul.mubr.msk.bf16.gmra.mrb[24].mxu0 %vm953_vm3, %v10679_v10  ;;  %v10685_v18 = vpop.permute.xlu1 %8842  ;;  %v773_v60 = vsel %vm753_vm1, %v725_v52, %v8830_v46  ;;  %v772_v62 = vsel %vm753_vm1, %v724_v54, %v8829_v47  ;;  %v9815_v47 = vld [vmem:[%s11747_s0 + $0xb0] sm:$0xff] }
 0x16b   :  { %1128 = vmatprep.mubr.bf16.mxu0 %v11759_v0  ;;  %v10688_v21 = vpop.permute.xlu0 %8837  ;;  %v820_v9 = vsel %vm801_vm2, %v772_v62, %v8834_v11  ;;  %v821_v12 = vsel %vm801_vm2, %v773_v60, %v8835_v58  ;;  %v8845_v13 = vunpack.i.h.bf16 %v10685_v18  ;;  %v8844_v14 = vunpack.i.l.bf16 %v10685_v18  ;;  %v9086_v18 = vld [vmem:[#allocation7 + $0xc8] ss:$16 sps:$4 sm:$0xff]  }
 0x16c   :  { %v8840_v5 = vunpack.i.h.bf16 %v10688_v21  ;;  %v8839_v8 = vunpack.i.l.bf16 %v10688_v21  ;;  %v10764_v22 = vpack.c.bf16 %v821_v12, %v820_v9  ;;  %4814 = vmatpush1.bf16.msra.mxu0 %v9086_v18 }
 0x16d   :  { %4815 = vmatprep.subr.bf16.mxu0 %v9094_v32 }
 0x16e   :  { %v10694_v26 = vpop.permute.xlu1 %8852  ;;  %v727_v17 = vsel %vm705_vm0, %v9812_v16, %v8840_v5  ;;  %v726_v20 = vsel %vm705_vm0, %v9813_v19, %v8839_v8  ;;  %v9104_v16 = vld [vmem:[#allocation7 + $0x128] ss:$16 sps:$4 sm:$0xff]  }
 0x16f   :  { %v10704_v33 = vpop.permute.xlu0 %8847  ;;  %v774_v28 = vsel %vm753_vm1, %v726_v20, %v8844_v14  ;;  %v775_v30 = vsel %vm753_vm1, %v727_v17, %v8845_v13  ;;  %v8855_v35 = vunpack.i.h.bf16 %v10694_v26  ;;  %v8854_v36 = vunpack.i.l.bf16 %v10694_v26  ;;  %v9814_v26 = vld [vmem:[%s11747_s0 + $0xb8] sm:$0xff] }
 0x170   :  { %v8850_v23 = vunpack.i.h.bf16 %v10704_v33  ;;  %v8849_v24 = vunpack.i.l.bf16 %v10704_v33  ;;  %v9092_v33 = vld [vmem:[#allocation7 + $0xe8] ss:$16 sps:$4 sm:$0xff]  }
 0x171   :  { %v729_v46 = vsel %vm705_vm0, %v9814_v26, %v8855_v35  ;;  %v728_v51 = vsel %vm705_vm0, %v9815_v47, %v8854_v36  ;;  %4816 = vmatpush1.bf16.msra.mxu0 %v9092_v33  ;;  %v9112_v36 = vld [vmem:[#allocation7 + $0x14c] ss:$16 sps:$4 sm:$0xff]  }
 0x172   :  { %7382 = vmatmul.mubr.msk.bf16.gmra.mrb[28].mxu0 %vm953_vm3, %v10706_v34  ;;  %v10712_v40 = vpop.permute.xlu1 %8862  ;;  %v822_v39 = vsel %vm801_vm2, %v774_v28, %v8849_v24  ;;  %v823_v6 = vsel %vm801_vm2, %v775_v30, %v8850_v23  ;;  %4817 = vmatprep.subr.bf16.mxu0 %v9100_v38  ;;  %v9817_v23 = vld [vmem:[%s11747_s0 + $0xc8] sm:$0xff] }
 0x173   :  { %1138 = vmatprep.mubr.bf16.mxu0 %v11759_v0  ;;  %v10717_v43 = vpop.permute.xlu0 %8857  ;;  %v10793_v57 = vpack.c.bf16 %v823_v6, %v822_v39  ;;  %v8864_v58 = vunpack.i.l.bf16 %v10712_v40 }
 0x174   :  { %v8860_v41 = vunpack.i.h.bf16 %v10717_v43  ;;  %v8859_v42 = vunpack.i.l.bf16 %v10717_v43  ;;  %v8865_v43 = vunpack.i.h.bf16 %v10712_v40 }
 0x175   :  { %4818 = vmatpush1.bf16.msra.mxu0 %v9098_v45 }
 0x176   :  { %v10721_v50 = vpop.permute.xlu1 %8872  ;;  %v777_v11 = vsel %vm753_vm1, %v729_v46, %v8860_v41  ;;  %v776_v59 = vsel %vm753_vm1, %v728_v51, %v8859_v42  ;;  %v9044_v41 = vld [vmem:[#allocation2 + $0x20] ss:$12 sps:$4 sm:$0xff]  }
 0x177   :  { %v10731_v55 = vpop.permute.xlu0 %8867  ;;  %v824_v13 = vsel %vm801_vm2, %v776_v59, %v8864_v58  ;;  %v825_v14 = vsel %vm801_vm2, %v777_v11, %v8865_v43  ;;  %v8875_v17 = vunpack.i.h.bf16 %v10721_v50  ;;  %v8874_v19 = vunpack.i.l.bf16 %v10721_v50  ;;  %v9110_v42 = vld [vmem:[#allocation7 + $0x148] ss:$16 sps:$4 sm:$0xff]   ;;  %v9819_v11 = vld [vmem:[#allocation2 + $0x8] ss:$12 sps:$4 sm:$0xff]  }
 0x178   :  { %v8870_v60 = vunpack.i.h.bf16 %v10731_v55  ;;  %v8869_v62 = vunpack.i.l.bf16 %v10731_v55  ;;  %v9106_v55 = vld [vmem:[#allocation7 + $0x12c] ss:$16 sps:$4 sm:$0xff]   ;;  %v10828_v35 = vpack.c.bf16 %v825_v14, %v824_v13  ;;  %v9116_v59 = vld [vmem:[#allocation7 + $0x168] ss:$16 sps:$4 sm:$0xff]  }
 0x179   :  { %4819 = vmatprep.subr.bf16.mxu0 %v9106_v55 }
 0x17a   :  { %7383 = vmatmul.mubr.msk.bf16.gmra.mrb[32].mxu0 %vm953_vm3, %v10733_v56  ;;  %v10741_v63 = vpop.permute.xlu1 %8882  ;;  %v731_v24 = vsel %vm705_vm0, %v9817_v23, %v8870_v60  ;;  %v730_v28 = vsel %vm705_vm0, %v9818_v25, %v8869_v62 }
 0x17b   :  { %1148 = vmatprep.mubr.bf16.mxu0 %v11759_v0  ;;  %v10746_v61 = vpop.permute.xlu0 %8877  ;;  %4820 = vmatpush1.bf16.msra.mxu0 %v9104_v16  ;;  %v779_v45 = vsel %vm753_vm1, %v731_v24, %v8875_v17  ;;  %v8884_v47 = vunpack.i.l.bf16 %v10741_v63  ;;  %v9124_v16 = vld [vmem:[#allocation7 + $0x18c] ss:$16 sps:$4 sm:$0xff]  }
 0x17c   :  { %v8880_v33 = vunpack.i.h.bf16 %v10746_v61  ;;  %v8879_v38 = vunpack.i.l.bf16 %v10746_v61  ;;  %4821 = vmatprep.subr.bf16.mxu0 %v9112_v36  ;;  %v8885_v61 = vunpack.i.h.bf16 %v10741_v63  ;;  %v9045_v63 = vld [vmem:[#allocation2 + $0x38] ss:$12 sps:$4 sm:$0xff]  }
 0x17e   :  { %v10752_v15 = vpop.permute.xlu1 %8892  ;;  %v827_v58 = vsel %vm801_vm2, %v779_v45, %v8880_v33  ;;  %v9823_v45 = vld [vmem:[%s11747_s0 + $0xe8] sm:$0xff] }
 0x17f   :  { %v10762_v21 = vpop.permute.xlu0 %8887  ;;  %4822 = vmatpush1.bf16.msra.mxu0 %v9110_v42  ;;  %v8895_v17 = vunpack.i.h.bf16 %v10752_v15 }
 0x180   :  { %v8890_v60 = vunpack.i.h.bf16 %v10762_v21  ;;  %v8889_v62 = vunpack.i.l.bf16 %v10762_v21  ;;  %v9822_v21 = vld [vmem:[%s11747_s0 + $0x170] sm:$0xff] }
 0x182   :  { %7384 = vmatmul.mubr.msk.bf16.gmra.mrb[36].mxu0 %vm953_vm3, %v10764_v22  ;;  %v10772_v31 = vpop.permute.xlu1 %8902 }
 0x183   :  { %1158 = vmatprep.mubr.bf16.mxu0 %v11759_v0  ;;  %v10777_v37 = vpop.permute.xlu0 %8897 }
 0x186   :  { %v8913_v44 = vpop.permute.xlu1 %8912 }
 0x187   :  { %v8915_v52 = vunpack.i.h.bf16 %v8913_v44  ;;  %v8914_v53 = vunpack.i.l.bf16 %v8913_v44  ;;  %v10791_v54 = vpop.permute.xlu0 %8907  ;;  %v778_v44 = vsel %vm753_vm1, %v730_v28, %v8874_v19  ;;  %v8894_v19 = vunpack.i.l.bf16 %v10752_v15 }
 0x188   :  { %v826_v43 = vsel %vm801_vm2, %v778_v44, %v8879_v38  ;;  %v8900_v28 = vunpack.i.h.bf16 %v10777_v37 }
 0x189   :  { %v751_v5 = vsel %vm705_vm0, %v9816_v3, %v8915_v52  ;;  %v750_v40 = vsel %vm705_vm0, %v10550_v1, %v8914_v53  ;;  %v9118_v53 = vld [vmem:[#allocation7 + $0x16c] ss:$16 sps:$4 sm:$0xff]   ;;  %v9820_v3 = vld [vmem:[%s11747_s0 + $0xd8] sm:$0xff]  ;;  %v10870_v13 = vpack.c.bf16 %v827_v58, %v826_v43  ;;  %v8910_v43 = vunpack.i.h.bf16 %v10791_v54 }
 0x18a   :  { %7385 = vmatmul.mubr.msk.bf16.gmra.mrb[40].mxu0 %vm953_vm3, %v10793_v57  ;;  %v8923_v2 = vpop.permute.xlu1 %8922  ;;  %4823 = vmatprep.subr.bf16.mxu0 %v9118_v53  ;;  %v9136_v53 = vld [vmem:[#allocation7 + $0x1cc] ss:$16 sps:$4 sm:$0xff]   ;;  %v8909_v58 = vunpack.i.l.bf16 %v10791_v54 }
 0x18b   :  { %v8925_v8 = vunpack.i.h.bf16 %v8923_v2  ;;  %v8924_v9 = vunpack.i.l.bf16 %v8923_v2  ;;  %1168 = vmatprep.mubr.bf16.mxu0 %v11759_v0  ;;  %v10810_v12 = vpop.permute.xlu0 %8917  ;;  %4824 = vmatpush1.bf16.msra.mxu0 %v9116_v59 }
 0x18c   :  { %4825 = vmatprep.subr.bf16.mxu0 %v9124_v16 }
 0x18d   :  { %v798_v20 = vsel %vm753_vm1, %v750_v40, %v8924_v9  ;;  %v799_v1 = vsel %vm753_vm1, %v751_v5, %v8925_v8  ;;  %v733_v5 = vsel %vm705_vm0, %v9820_v3, %v8885_v61  ;;  %v9821_v40 = vld [vmem:[%s11747_s0 + $0xd0] sm:$0xff]  ;;  %v735_v61 = vsel %vm705_vm0, %v9823_v45, %v8900_v28 }
 0x18e   :  { %v8933_v18 = vpop.permute.xlu1 %8932  ;;  %v732_v8 = vsel %vm705_vm0, %v9821_v40, %v8884_v47  ;;  %v9824_v47 = vld [vmem:[%s11747_s0 + $0xe0] sm:$0xff] }
 0x18f   :  { %v8935_v30 = vunpack.i.h.bf16 %v8933_v18  ;;  %v8934_v50 = vunpack.i.l.bf16 %v8933_v18  ;;  %v10826_v32 = vpop.permute.xlu0 %8927  ;;  %v781_v18 = vsel %vm753_vm1, %v733_v5, %v8890_v60  ;;  %v780_v23 = vsel %vm753_vm1, %v732_v8, %v8889_v62  ;;  %v9142_v3 = vld [vmem:[#allocation7 + $0x1ec] ss:$16 sps:$4 sm:$0xff]   ;;  %v9058_v8 = vld [vmem:[#allocation7 + $0x24] ss:$16 sps:$4 sm:$0xff]   ;;  %v9065_v45 = vld [vmem:[#allocation7 + $0x60] ss:$16 sps:$4 sm:$0xff]  }
 0x190   :  { %v828_v33 = vsel %vm801_vm2, %v780_v23, %v8894_v19  ;;  %v829_v38 = vsel %vm801_vm2, %v781_v18, %v8895_v17  ;;  %v8920_v60 = vunpack.i.h.bf16 %v10810_v12  ;;  %v8919_v62 = vunpack.i.l.bf16 %v10810_v12  ;;  %v9825_v12 = vld [vmem:[%s11747_s0 + $0xf8] sm:$0xff]  ;;  %v9826_v17 = vld [vmem:[%s11747_s0 + $0xf0] sm:$0xff] }
 0x191   :  { %v846_v39 = vsel %vm801_vm2, %v798_v20, %v8934_v50  ;;  %v847_v6 = vsel %vm801_vm2, %v799_v1, %v8935_v30  ;;  %v9046_v20 = vld [vmem:[#allocation2 + $0x50] ss:$12 sps:$4 sm:$0xff]   ;;  %v8899_v30 = vunpack.i.l.bf16 %v10777_v37  ;;  %v8904_v37 = vunpack.i.l.bf16 %v10772_v31 }
 0x192   :  { %v10836_v26 = vpack.c.bf16 %v847_v6, %v846_v39  ;;  %7386 = vmatmul.mubr.msk.bf16.gmra.mrb[44].mxu0 %vm953_vm3, %v10828_v35  ;;  %v10840_v46 = vpop.permute.xlu1 %8942  ;;  %v9122_v1 = vld [vmem:[#allocation7 + $0x188] ss:$16 sps:$4 sm:$0xff]   ;;  %v9130_v50 = vld [vmem:[#allocation7 + $0x1ac] ss:$16 sps:$4 sm:$0xff]   ;;  %v9055_v39 = vld [vmem:[#allocation7 + $0x4] ss:$16 sps:$4 sm:$0xff]   ;;  %v737_v16 = vsel %vm705_vm0, %v9825_v12, %v8920_v60  ;;  %v736_v19 = vsel %vm705_vm0, %v9826_v17, %v8919_v62 }
 0x193   :  { %v8944_v51 = vunpack.i.l.bf16 %v10840_v46  ;;  %1178 = vmatprep.mubr.bf16.mxu0 %v11759_v0  ;;  %v10846_v52 = vpop.permute.xlu0 %8937  ;;  %4826 = vmatpush1.bf16.msra.mxu0 %v9122_v1  ;;  %v9128_v6 = vld [vmem:[#allocation7 + $0x1a8] ss:$16 sps:$4 sm:$0xff]   ;;  %v9829_v60 = vld [vmem:[%s11747_s0 + $0x110] sm:$0xff] }
 0x194   :  { %7397 = vmatmul.mubr.msk.bf16.vlgmr.msra.gmra.mrb[0].mxu1 %vm953_vm3, %v10836_v26  ;;  %4827 = vmatprep.subr.bf16.mxu0 %v9130_v50  ;;  %v8940_v18 = vunpack.i.h.bf16 %v10846_v52  ;;  %v8939_v23 = vunpack.i.l.bf16 %v10846_v52  ;;  %v9062_v52 = vld [vmem:[#allocation7 + $0x40] ss:$16 sps:$4 sm:$0xff]   ;;  %v9067_v50 = vld [vmem:[#allocation7 + $0x64] ss:$16 sps:$4 sm:$0xff]  }
 0x195   :  { %8199 = vmatpush3.bf16.msra.mxu1 %v9819_v11  ;;  %1286 = vmatprep.mubr.bf16.mxu1 %v11759_v0  ;;  %v752_v9 = vsel %vm705_vm0, %v9822_v21, %v8944_v51  ;;  %v734_v51 = vsel %vm705_vm0, %v9824_v47, %v8899_v30  ;;  %v9134_v11 = vld [vmem:[#allocation7 + $0x1c8] ss:$16 sps:$4 sm:$0xff]  }
 0x196   :  { %v10855_v2 = vpop.permute.xlu1 %8952  ;;  %8200 = vmatprep.subr.bf16.mxu1 %v9044_v41  ;;  %v9140_v21 = vld [vmem:[#allocation7 + $0x1e8] ss:$16 sps:$4 sm:$0xff]  }
 0x197   :  { %v8954_v55 = vunpack.i.l.bf16 %v10855_v2  ;;  %v10872_v14 = vpop.permute.xlu0 %8947  ;;  %4828 = vmatpush1.bf16.msra.mxu0 %v9128_v6  ;;  %v9830_v62 = vld [vmem:[%s11747_s0 + $0x118] sm:$0xff] }
 0x198   :  { %4829 = vmatprep.subr.bf16.mxu0 %v9136_v53 }
 0x199   :  { %8201 = vmatpush3.bf16.msra.mxu1 %v9044_v41  ;;  %v800_v24 = vsel %vm753_vm1, %v752_v9, %v8954_v55  ;;  %v8905_v41 = vunpack.i.h.bf16 %v10772_v31  ;;  %v10906_v31 = vpack.c.bf16 %v829_v38, %v828_v33  ;;  %v8930_v9 = vunpack.i.h.bf16 %v10826_v32 }
 0x19a   :  { %7387 = vmatmul.mubr.msk.bf16.gmra.mrb[48].mxu0 %vm953_vm3, %v10870_v13  ;;  %v10881_v25 = vpop.permute.xlu1 %8957  ;;  %8202 = vmatprep.subr.bf16.mxu1 %v9045_v63  ;;  %v8929_v55 = vunpack.i.l.bf16 %v10826_v32  ;;  %v9064_v32 = vld [vmem:[#allocation7 + $0x44] ss:$16 sps:$4 sm:$0xff]   ;;  %v8955_v33 = vunpack.i.h.bf16 %v10855_v2 }
 0x19b   :  { %v8959_v15 = vunpack.i.l.bf16 %v10881_v25  ;;  %1188 = vmatprep.mubr.bf16.mxu0 %v11759_v0  ;;  %v10894_v44 = vpop.permute.xlu0 %488  ;;  %v783_v59 = vsel %vm753_vm1, %v735_v61, %v8905_v41  ;;  %4830 = vmatpush1.bf16.msra.mxu0 %v9134_v11  ;;  %v785_v28 = vsel %vm753_vm1, %v737_v16, %v8930_v9  ;;  %v9828_v41 = vld [vmem:[%s11747_s0 + $0x108] sm:$0xff]  ;;  %v8960_v47 = vunpack.i.h.bf16 %v10881_v25 }
 0x19c   :  { %v831_v40 = vsel %vm801_vm2, %v783_v59, %v8910_v43  ;;  %4831 = vmatprep.subr.bf16.mxu0 %v9142_v3  ;;  %v9073_v2 = vld [vmem:[#allocation7 + $0x84] ss:$16 sps:$4 sm:$0xff]   ;;  %v8950_v43 = vunpack.i.h.bf16 %v10872_v14  ;;  %v9077_v3 = vld [vmem:[#allocation7 + $0xa0] ss:$16 sps:$4 sm:$0xff]  }
 0x19d   :  { %v848_v36 = vsel %vm801_vm2, %v800_v24, %v8959_v15  ;;  %8203 = vmatpush3.bf16.msra.mxu1 %v9045_v63  ;;  %v782_v63 = vsel %vm753_vm1, %v734_v51, %v8904_v37  ;;  %v784_v24 = vsel %vm753_vm1, %v736_v19, %v8929_v55  ;;  %v8949_v15 = vunpack.i.l.bf16 %v10872_v14  ;;  %v9079_v11 = vld [vmem:[#allocation7 + $0xa4] ss:$16 sps:$4 sm:$0xff]  }
 0x19e   :  { %v10892_v42 = vpack.c.bf16 %v848_v36, %v848_v36  ;;  %8204 = vmatprep.subr.bf16.mxu1 %v9046_v20  ;;  %v830_v5 = vsel %vm801_vm2, %v782_v63, %v8909_v58  ;;  %v833_v36 = vsel %vm801_vm2, %v785_v28, %v8940_v18  ;;  %v351_v38 = vpop.permute.xlu1 %350  ;;  %v740_v14 = vsel %vm705_vm0, %v9829_v60, %v8950_v43  ;;  %v9832_v28 = vld [vmem:[%s11747_s0 + $0x120] sm:$0xff]  ;;  %v9834_v43 = vld [vmem:[%s11747_s0 + $0x130] sm:$0xff] }
 0x19f   :  { %v10919_v54 = vpop.permute.xlu0 %630  ;;  %v10933_v1 = vpack.c.bf16 %v831_v40, %v830_v5  ;;  %4832 = vmatpush1.bf16.msra.mxu0 %v9140_v21  ;;  %v739_v37 = vsel %vm705_vm0, %v9828_v41, %v8949_v15  ;;  %v9085_v40 = vld [vmem:[#allocation7 + $0xc4] ss:$16 sps:$4 sm:$0xff]  }
 0x1a0   :  { %7398 = vmatmul.mubr.msk.bf16.gmra.mrb[4].mxu1 %vm953_vm3, %v10892_v42  ;;  %v787_v51 = vsel %vm753_vm1, %v739_v37, %v10894_v44  ;;  %v9095_v37 = vld [vmem:[#allocation7 + $0x100] ss:$16 sps:$4 sm:$0xff]  }
 0x1a1   :  { %8206 = vmatprep.mubr.msk.bf16.mxu1 %vm953_vm3, %v10552_v4  ;;  %8205 = vmatpush3.bf16.msra.mxu1 %v9046_v20  ;;  %v9053_v4 = vld [vmem:[#allocation7] ss:$16 sps:$4 sm:$0xff]   ;;  %v835_v63 = vsel %vm801_vm2, %v787_v51, %v10919_v54  ;;  %v9103_v51 = vld [vmem:[#allocation7 + $0x124] ss:$16 sps:$4 sm:$0xff]  }
 0x1a2   :  { %7388 = vmatmul.mubr.msk.bf16.gmra.mrb[52].mxu0 %vm953_vm3, %v10906_v31  ;;  %4243 = vmatprep.subr.bf16.mxu1 %v9055_v39  ;;  %v9056_v20 = vld [vmem:[#allocation7 + $0x20] ss:$16 sps:$4 sm:$0xff]   ;;  %v8968_v58 = vpop.permute.xlu1 %8967 }
 0x1a3   :  { %1198 = vmatprep.mubr.bf16.mxu0 %v11759_v0  ;;  %v8963_v30 = vpop.permute.xlu0 %8962  ;;  %v8969_v21 = vunpack.i.l.bf16 %v8968_v58 }
 0x1a4   :  { %v8965_v44 = vunpack.i.h.bf16 %v8963_v30  ;;  %v8964_v59 = vunpack.i.l.bf16 %v8963_v30 }
 0x1a6   :  { %v8978_v54 = vpop.permute.xlu1 %8977  ;;  %v788_v16 = vsel %vm753_vm1, %v740_v14, %v8964_v59 }
 0x1a7   :  { %v8973_v39 = vpop.permute.xlu0 %8972  ;;  %v8980_v19 = vunpack.i.h.bf16 %v8978_v54 }
 0x1a8   :  { %8207 = vmatmul.mubr.msk.bf16.vlgmr.msra.gmra.mrb[8].mxu1 %vm953_vm3, %v10578_v29  ;;  %v8945_v29 = vunpack.i.h.bf16 %v10840_v46  ;;  %v9827_v46 = vld [vmem:[%s11747_s0 + $0x100] sm:$0xff]  ;;  %v8975_v9 = vunpack.i.h.bf16 %v8973_v39  ;;  %v8974_v55 = vunpack.i.l.bf16 %v8973_v39  ;;  %v9097_v39 = vld [vmem:[#allocation7 + $0x104] ss:$16 sps:$4 sm:$0xff]  }
 0x1a9   :  { %8210 = vmatprep.mubr.msk.bf16.mxu1 %vm953_vm3, %v10602_v49  ;;  %4244 = vmatpush1.bf16.msra.mxu1 %v9053_v4  ;;  %v832_v49 = vsel %vm801_vm2, %v784_v24, %v8939_v23  ;;  %v741_v4 = vsel %vm705_vm0, %v9830_v62, %v351_v38  ;;  %v9831_v23 = vld [vmem:[%s11747_s0 + $0x128] sm:$0xff]  ;;  %v9101_v62 = vld [vmem:[#allocation7 + $0x120] ss:$16 sps:$4 sm:$0xff]  }
 0x1aa   :  { %7389 = vmatmul.mubr.msk.bf16.gmra.mrb[56].mxu0 %vm953_vm3, %v10933_v1  ;;  %4245 = vmatprep.subr.bf16.mxu1 %v9058_v8  ;;  %v738_v6 = vsel %vm705_vm0, %v9827_v46, %v8945_v29  ;;  %v10959_v61 = vpack.c.bf16 %v833_v36, %v832_v49  ;;  %v8970_v8 = vunpack.i.h.bf16 %v8968_v58  ;;  %v789_v12 = vsel %vm753_vm1, %v741_v4, %v8965_v44  ;;  %v8988_v29 = vpop.permute.xlu1 %8987  ;;  %v9109_v4 = vld [vmem:[#allocation7 + $0x144] ss:$16 sps:$4 sm:$0xff]  }
 0x1ab   :  { %1208 = vmatprep.mubr.bf16.mxu0 %v11759_v0  ;;  %v786_v53 = vsel %vm753_vm1, %v738_v6, %v8955_v33  ;;  %v8983_v25 = vpop.permute.xlu0 %8982  ;;  %v743_v24 = vsel %vm705_vm0, %v9831_v23, %v8975_v9  ;;  %v742_v30 = vsel %vm705_vm0, %v9832_v28, %v8974_v55  ;;  %v8990_v46 = vunpack.i.h.bf16 %v8988_v29  ;;  %v9836_v9 = vld [vmem:[%s11747_s0 + $0x140] sm:$0xff]  ;;  %v9121_v28 = vld [vmem:[#allocation7 + $0x184] ss:$16 sps:$4 sm:$0xff]  }
 0x1ac   :  { %v837_v18 = vsel %vm801_vm2, %v789_v12, %v8970_v8  ;;  %v8985_v15 = vunpack.i.h.bf16 %v8983_v25  ;;  %v791_v33 = vsel %vm753_vm1, %v743_v24, %v8980_v19  ;;  %v8989_v6 = vunpack.i.l.bf16 %v8988_v29  ;;  %v9107_v12 = vld [vmem:[#allocation7 + $0x140] ss:$16 sps:$4 sm:$0xff]  }
 0x1ad   :  { %4246 = vmatpush1.bf16.msra.mxu1 %v9056_v20  ;;  %v8979_v20 = vunpack.i.l.bf16 %v8978_v54  ;;  %v9113_v24 = vld [vmem:[#allocation7 + $0x160] ss:$16 sps:$4 sm:$0xff]  }
 0x1ae   :  { %4247 = vmatprep.subr.bf16.mxu1 %v9064_v32  ;;  %v9091_v32 = vld [vmem:[#allocation7 + $0xe4] ss:$16 sps:$4 sm:$0xff]  }
 0x1af   :  { %v8993_v17 = vpop.permute.xlu0 %8992  ;;  %v790_v36 = vsel %vm753_vm1, %v742_v30, %v8979_v20 }
 0x1b0   :  { %8211 = vmatmul.mubr.msk.bf16.gmra.mrb[12].mxu1 %vm953_vm3, %v10622_v7  ;;  %v9071_v7 = vld [vmem:[#allocation7 + $0x80] ss:$16 sps:$4 sm:$0xff]  }
 0x1b1   :  { %8214 = vmatprep.mubr.msk.bf16.mxu1 %vm953_vm3, %v10639_v27  ;;  %4248 = vmatpush1.bf16.msra.mxu1 %v9062_v52  ;;  %v834_v27 = vsel %vm801_vm2, %v786_v53, %v8960_v47  ;;  %v8984_v52 = vunpack.i.l.bf16 %v8983_v25  ;;  %v8998_v47 = vpop.permute.xlu1 %8997 }
 0x1b2   :  { %7390 = vmatmul.mubr.msk.bf16.gmra.mrb[60].mxu0 %vm953_vm3, %v10959_v61  ;;  %4249 = vmatprep.subr.bf16.mxu1 %v9067_v50  ;;  %v10984_v5 = vpack.c.bf16 %v835_v63, %v834_v27  ;;  %v9089_v50 = vld [vmem:[#allocation7 + $0xe0] ss:$16 sps:$4 sm:$0xff]   ;;  %v8999_v27 = vunpack.i.l.bf16 %v8998_v47 }
 0x1b3   :  { %1218 = vmatprep.mubr.bf16.mxu0 %v11759_v0  ;;  %v9003_v38 = vpop.permute.xlu0 %9002  ;;  %v838_v41 = vsel %vm801_vm2, %v790_v36, %v8984_v52  ;;  %v9838_v36 = vld [vmem:[%s11747_s0 + $0x150] sm:$0xff] }
 0x1b4   :  { %v9005_v60 = vunpack.i.h.bf16 %v9003_v38  ;;  %v9004_v14 = vunpack.i.l.bf16 %v9003_v38  ;;  %v9119_v38 = vld [vmem:[#allocation7 + $0x180] ss:$16 sps:$4 sm:$0xff]  }
 0x1b5   :  { %4250 = vmatpush1.bf16.msra.mxu1 %v9065_v45  ;;  %v8995_v45 = vunpack.i.h.bf16 %v8993_v17  ;;  %v9008_v59 = vpop.permute.xlu1 %9007 }
 0x1b6   :  { %4251 = vmatprep.subr.bf16.mxu1 %v9073_v2  ;;  %v8994_v2 = vunpack.i.l.bf16 %v8993_v17  ;;  %v746_v55 = vsel %vm705_vm0, %v9836_v9, %v9004_v14  ;;  %v9009_v23 = vunpack.i.l.bf16 %v9008_v59 }
 0x1b7   :  { %v9013_v25 = vpop.permute.xlu0 %9012 }
 0x1b8   :  { %8215 = vmatmul.mubr.msk.bf16.gmra.mrb[16].mxu1 %vm953_vm3, %v10658_v48  ;;  %v9083_v48 = vld [vmem:[#allocation7 + $0xc0] ss:$16 sps:$4 sm:$0xff]  }
 0x1b9   :  { %8218 = vmatprep.mubr.msk.bf16.mxu1 %vm953_vm3, %v10679_v10  ;;  %4252 = vmatpush1.bf16.msra.mxu1 %v9071_v7  ;;  %v836_v10 = vsel %vm801_vm2, %v788_v16, %v8969_v21  ;;  %v744_v7 = vsel %vm705_vm0, %v9834_v43, %v8989_v6  ;;  %v9018_v17 = vpop.permute.xlu1 %9017  ;;  %v9145_v43 = vld [vmem:[#allocation7 + $0x204] ss:$16 sps:$4 sm:$0xff]  }
 0x1ba   :  { %7391 = vmatmul.mubr.msk.bf16.gmra.mrb[64].mxu0 %vm953_vm3, %v10984_v5  ;;  %4253 = vmatprep.subr.bf16.mxu1 %v9079_v11  ;;  %v11005_v49 = vpack.c.bf16 %v837_v18, %v836_v10  ;;  %v9000_v11 = vunpack.i.h.bf16 %v8998_v47  ;;  %v792_v44 = vsel %vm753_vm1, %v744_v7, %v8994_v2  ;;  %v9010_v18 = vunpack.i.h.bf16 %v9008_v59  ;;  %v9133_v2 = vld [vmem:[#allocation7 + $0x1c4] ss:$16 sps:$4 sm:$0xff]   ;;  %v9148_v7 = vld [vmem:[#allocation7 + $0x20c] ss:$16 sps:$4 sm:$0xff]  }
 0x1bb   :  { %1228 = vmatprep.mubr.bf16.mxu0 %v11759_v0  ;;  %v9023_v8 = vpop.permute.xlu0 %9022  ;;  %4894 = vmatprep.subr.bf16.mxu0 %v9148_v7 }
 0x1bc   :  { %v9025_v19 = vunpack.i.h.bf16 %v9023_v8  ;;  %v9024_v20 = vunpack.i.l.bf16 %v9023_v8 }
 0x1bd   :  { %4254 = vmatpush1.bf16.msra.mxu1 %v9077_v3  ;;  %v840_v3 = vsel %vm801_vm2, %v792_v44, %v8999_v27  ;;  %v9028_v52 = vpop.permute.xlu1 %9027 }
 0x1be   :  { %4255 = vmatprep.subr.bf16.mxu1 %v9085_v40  ;;  %v9014_v40 = vunpack.i.l.bf16 %v9013_v25  ;;  %v9030_v6 = vunpack.i.h.bf16 %v9028_v52 }
 0x1c0   :  { %8219 = vmatmul.mubr.msk.bf16.gmra.mrb[20].mxu1 %vm953_vm3, %v10706_v34  ;;  %v839_v34 = vsel %vm801_vm2, %v791_v33, %v8985_v15  ;;  %v9020_v15 = vunpack.i.h.bf16 %v9018_v17  ;;  %v748_v33 = vsel %vm705_vm0, %v9838_v36, %v9009_v23 }
 0x1c1   :  { %8222 = vmatprep.mubr.msk.bf16.mxu1 %vm953_vm3, %v10733_v56  ;;  %4256 = vmatpush1.bf16.msra.mxu1 %v9083_v48  ;;  %v9833_v56 = vld [vmem:[%s11747_s0 + $0x138] sm:$0xff]  ;;  %v11026_v58 = vpack.c.bf16 %v839_v34, %v838_v41  ;;  %v9029_v41 = vunpack.i.l.bf16 %v9028_v52 }
 0x1c2   :  { %7392 = vmatmul.mubr.msk.bf16.gmra.mrb[68].mxu0 %vm953_vm3, %v11005_v49  ;;  %4257 = vmatprep.subr.bf16.mxu1 %v9091_v32  ;;  %v745_v53 = vsel %vm705_vm0, %v9833_v56, %v8990_v46  ;;  %v9115_v48 = vld [vmem:[#allocation7 + $0x164] ss:$16 sps:$4 sm:$0xff]   ;;  %v794_v32 = vsel %vm753_vm1, %v746_v55, %v9014_v40  ;;  %v9131_v56 = vld [vmem:[#allocation7 + $0x1c0] ss:$16 sps:$4 sm:$0xff]  }
 0x1c3   :  { %1238 = vmatprep.mubr.bf16.mxu0 %v11759_v0  ;;  %v793_v63 = vsel %vm753_vm1, %v745_v53, %v8995_v45  ;;  %v842_v30 = vsel %vm801_vm2, %v794_v32, %v9024_v20  ;;  %v9127_v46 = vld [vmem:[#allocation7 + $0x1a4] ss:$16 sps:$4 sm:$0xff]   ;;  %v9125_v45 = vld [vmem:[#allocation7 + $0x1a0] ss:$16 sps:$4 sm:$0xff]  }
 0x1c4   :  { %v841_v54 = vsel %vm801_vm2, %v793_v63, %v9000_v11 }
 0x1c5   :  { %4258 = vmatpush1.bf16.msra.mxu1 %v9089_v50  ;;  %v11047_v16 = vpack.c.bf16 %v841_v54, %v840_v3 }
 0x1c6   :  { %4259 = vmatprep.subr.bf16.mxu1 %v9097_v39 }
 0x1c8   :  { %8223 = vmatmul.mubr.msk.bf16.gmra.mrb[24].mxu1 %vm953_vm3, %v10764_v22  ;;  %v9015_v22 = vunpack.i.h.bf16 %v9013_v25 }
 0x1c9   :  { %8226 = vmatprep.mubr.msk.bf16.mxu1 %vm953_vm3, %v10793_v57  ;;  %4260 = vmatpush1.bf16.msra.mxu1 %v9095_v37  ;;  %v9835_v57 = vld [vmem:[%s11747_s0 + $0x148] sm:$0xff] }
 0x1ca   :  { %7393 = vmatmul.mubr.msk.bf16.gmra.mrb[72].mxu0 %vm953_vm3, %v11026_v58  ;;  %4261 = vmatprep.subr.bf16.mxu1 %v9103_v51  ;;  %v747_v21 = vsel %vm705_vm0, %v9835_v57, %v9005_v60 }
 0x1cb   :  { %1248 = vmatprep.mubr.bf16.mxu0 %v11759_v0  ;;  %v795_v10 = vsel %vm753_vm1, %v747_v21, %v9015_v22 }
 0x1cc   :  { %v843_v29 = vsel %vm801_vm2, %v795_v10, %v9025_v19 }
 0x1cd   :  { %4262 = vmatpush1.bf16.msra.mxu1 %v9101_v62  ;;  %v869_v39 = vpack.c.bf16 %v843_v29, %v842_v30 }
 0x1ce   :  { %4263 = vmatprep.subr.bf16.mxu1 %v9109_v4 }
 0x1d0   :  { %8227 = vmatmul.mubr.msk.bf16.gmra.mrb[28].mxu1 %vm953_vm3, %v10828_v35  ;;  %v9019_v35 = vunpack.i.l.bf16 %v9018_v17 }
 0x1d1   :  { %8230 = vmatprep.mubr.msk.bf16.mxu1 %vm953_vm3, %v10870_v13  ;;  %4264 = vmatpush1.bf16.msra.mxu1 %v9107_v12  ;;  %v9837_v13 = vld [vmem:[%s11747_s0 + $0x158] sm:$0xff]  ;;  %s10119_s0 = smov [#allocation19]  }
 0x1d2   :  { %7394 = vmatmul.mubr.msk.bf16.gmra.mrb[76].mxu0 %vm953_vm3, %v11047_v16  ;;  %4265 = vmatprep.subr.bf16.mxu1 %v9115_v48  ;;  %v749_v50 = vsel %vm705_vm0, %v9837_v13, %v9010_v18  ;;  %v796_v34 = vsel %vm753_vm1, %v748_v33, %v9019_v35  ;;  %s7349_s15 = sshll.u32 %s10119_s0, 4  ;;  %s7350_s15 = int_to_ptr.vmem [resolvable:$true] %s7349_s15 }
 0x1d3   :  { %1258 = vmatprep.mubr.bf16.mxu0 %v11759_v0  ;;  %v797_v37 = vsel %vm753_vm1, %v749_v50, %v9020_v15  ;;  %v844_v47 = vsel %vm801_vm2, %v796_v34, %v9029_v41  ;;  %s10059_s5 = scalar_lea.vmem %s7350_s15, 128  ;;  %p10064_p11 = scmp.lt.s32.totalorder %s7350_s15, %s7350_s15 }
 0x1d4   :  { %v845_v51 = vsel %vm801_vm2, %v797_v37, %v9030_v6  ;;  %p10060_p10 = scmp.ne.s32.totalorder %s7350_s15, %s10059_s5  ;;  %p10065_p12 = scmp.lt.s32.totalorder %s10059_s5, %s10059_s5 }
 0x1d5   :  { %4266 = vmatpush1.bf16.msra.mxu1 %v9113_v24  ;;  %v870_v53 = vpack.c.bf16 %v845_v51, %v844_v47  ;;  %v9143_v47 = vld [vmem:[#allocation7 + $0x200] ss:$16 sps:$4 sm:$0xff]  }
 0x1d6   :  { %4267 = vmatprep.subr.bf16.mxu1 %v9121_v28  ;;  %p10066_p13 = por %p10065_p12, %p10064_p11 }
 0x1d8   :  { %8231 = vmatmul.mubr.msk.bf16.gmra.mrb[32].mxu1 %vm953_vm3, %v10906_v31  ;;  %v9139_v31 = vld [vmem:[#allocation7 + $0x1e4] ss:$16 sps:$4 sm:$0xff]   ;;  %p10067_p0 = pnand %p10066_p13, %p10060_p10 }
 0x1d9   :  { %8234 = vmatprep.mubr.msk.bf16.mxu1 %vm953_vm3, %v10933_v1  ;;  %4268 = vmatpush1.bf16.msra.mxu1 %v9119_v38  ;;  %v9137_v1 = vld [vmem:[#allocation7 + $0x1e0] ss:$16 sps:$4 sm:$0xff]  }
 0x1da   :  { %7395 = vmatmul.mubr.msk.bf16.gmra.mrb[80].mxu0 %vm953_vm3, %v869_v39  ;;  %4269 = vmatprep.subr.bf16.mxu1 %v9127_v46 }
 0x1db   :  { %1268 = vmatprep.mubr.bf16.mxu0 %v11759_v0  ;;  %v9265_v0 = vld [vmem:[#allocation7 + $0x484] ss:$16 sps:$4 sm:$0xff]  }
 0x1dd   :  { %4270 = vmatpush1.bf16.msra.mxu1 %v9125_v45 }
 0x1de   :  { %4271 = vmatprep.subr.bf16.mxu1 %v9133_v2 }
 0x1e0   :  { %8235 = vmatmul.mubr.msk.bf16.gmra.mrb[36].mxu1 %vm953_vm3, %v10959_v61  ;;  %v874_v61 = vlaneseq }
 0x1e1   :  { %8238 = vmatprep.mubr.msk.bf16.mxu1 %vm953_vm3, %v10984_v5  ;;  %4272 = vmatpush1.bf16.msra.mxu1 %v9131_v56 }
 0x1e2   :  { %7396 = vmatmul.mubr.msk.bf16.gmra.mrb[84].mxu0 %vm953_vm3, %v870_v53  ;;  %4273 = vmatprep.subr.bf16.mxu1 %v9139_v31  ;;  %v11095_v5 = vshrl.u32 %v874_v61, 7  ;;  %v9146_v31 = vld [vmem:[#allocation7 + $0x208] ss:$16 sps:$4 sm:$0xff]   ;;  %v9154_v61 = vld [vmem:[#allocation7 + $0x22c] ss:$16 sps:$4 sm:$0xff]  }
 0x1e4   :  { %11767 = vst [vmem:[#allocation27_spill] sm:$0xff] %v11095_v5  ;;  %v11103_v25 = vsub.s32 1, %v11095_v5 }
 0x1e5   :  { %4274 = vmatpush1.bf16.msra.mxu1 %v9137_v1  ;;  %v9151_v1 = vld [vmem:[#allocation7 + $0x224] ss:$16 sps:$4 sm:$0xff]  }
 0x1e6   :  { %4336 = vmatprep.subr.bf16.mxu1 %v9145_v43  ;;  %11769 = vst [vmem:[#allocation29_spill] sm:$0xff] %v11103_v25 }
 0x1e8   :  { %8239 = vmatmul.mubr.msk.bf16.gmra.mrb[40].mxu1 %vm953_vm3, %v11005_v49  ;;  %v11098_v49 = vsub.s32 0, %v11095_v5 }
 0x1e9   :  { %8242 = vmatprep.mubr.msk.bf16.mxu1 %vm953_vm3, %v11026_v58  ;;  %v11100_v58 = vld [vmem:[#allocation5] sm:$0x7] }
 0x1ea   :  { %11768 = vst [vmem:[#allocation28_spill] sm:$0xff] %v11098_v49  ;;  %v11107_v11 = vrot.slane %v11100_v58, %v11098_v49 }
 0x1f0   :  { %8243 = vmatmul.mubr.msk.bf16.gmra.mrb[44].mxu1 %vm953_vm3, %v11047_v16 }
 0x1f1   :  { %8246 = vmatprep.mubr.msk.bf16.mxu1 %vm953_vm3, %v869_v39 }
 0x1f8   :  { %8247 = vmatmul.mubr.msk.bf16.gmra.mrb[48].mxu1 %vm953_vm3, %v870_v53 }
 0x1f9   :  { %8250 = vmatprep.mubr.msk.bf16.mxu1 %vm953_vm3, %v10836_v26  ;;  %v11111_v26 = vrot.slane %v11100_v58, %v11103_v25 }
 0x200   :  { %8251 = vmatmul.mubr.msk.bf16.gmra.mrb[52].mxu1 %vm953_vm3, %v10892_v42 }
 0x20d   :  { %v1060_v27 = vpop.f32.mrb[0].mxu0 }
 0x20e   :  { %v1061_v42 = vadd.f32 %v1060_v27, %v11107_v11  ;;  %v1062_v63 = vpop.f32.mrb[1].mxu0 }
 0x20f   :  { %v1063_v44 = vadd.f32 %v1062_v63, %v11111_v26  ;;  %v1064_v59 = vpop.f32.mrb[2].mxu0 }
 0x210   :  { %vm1515_vm4 = vcmp.gt.f32.partialorder %v1061_v42, 1e-06  ;;  %v1065_v60 = vadd.f32 %v1064_v59, %v11107_v11  ;;  %v1066_v14 = vpop.f32.mrb[3].mxu0  ;;  %v9152_v59 = vld [vmem:[#allocation7 + $0x228] ss:$16 sps:$4 sm:$0xff]  }
 0x211   :  { %vm1516_vm5 = vcmp.gt.f32.partialorder %v1063_v44, 1e-06  ;;  %v1067_v62 = vadd.f32 %v1066_v14, %v11111_v26  ;;  %v1650_v4 = vsel %vm1515_vm4, %v1061_v42, 0.0  ;;  %v9149_v42 = vld [vmem:[#allocation7 + $0x220] ss:$16 sps:$4 sm:$0xff]  }
 0x212   :  { %vm1518_vm6 = vcmp.gt.f32.partialorder %v1065_v60, 1e-06  ;;  %v1651_v54 = vsel %vm1516_vm5, %v1063_v44, 0.0 }
 0x213   :  { %v1653_v3 = vsel %vm1518_vm6, %v1065_v60, 0.0  ;;  %vm1519_vm7 = vcmp.gt.f32.partialorder %v1067_v62, 1e-06 }
 0x214   :  { %v1785_v22 = vmax.f32 %v1650_v4, %v1653_v3  ;;  %v1654_v40 = vsel %vm1519_vm7, %v1067_v62, 0.0  ;;  %v9157_v4 = vld [vmem:[#allocation7 + $0x244] ss:$16 sps:$4 sm:$0xff]   ;;  %v9160_v3 = vld [vmem:[#allocation7 + $0x24c] ss:$16 sps:$4 sm:$0xff]  }
 0x215   :  { %v1786_v8 = vmax.f32 %v1651_v54, %v1654_v40  ;;  %v1070_v57 = vpop.f32.mrb[4].mxu0 }
 0x216   :  { %v1071_v21 = vadd.f32 %v1070_v57, %v11107_v11  ;;  %v1072_v9 = vpop.f32.mrb[5].mxu0  ;;  %v9155_v57 = vld [vmem:[#allocation7 + $0x240] ss:$16 sps:$4 sm:$0xff]  }
 0x217   :  { %v1073_v55 = vadd.f32 %v1072_v9, %v11111_v26  ;;  %v1074_v12 = vpop.f32.mrb[6].mxu0 }
 0x218   :  { %vm1521_vm8 = vcmp.gt.f32.partialorder %v1071_v21, 1e-06  ;;  %v1076_v16 = vpop.f32.mrb[7].mxu0  ;;  %v1075_v20 = vadd.f32 %v1074_v12, %v11107_v11  ;;  %v9163_v12 = vld [vmem:[#allocation7 + $0x264] ss:$16 sps:$4 sm:$0xff]  }
 0x219   :  { %v1656_v17 = vsel %vm1521_vm8, %v1071_v21, 0.0  ;;  %vm1522_vm9 = vcmp.gt.f32.partialorder %v1073_v55, 1e-06  ;;  %v1077_v10 = vadd.f32 %v1076_v16, %v11111_v26 }
 0x21a   :  { %v1830_v48 = vmax.f32 %v1785_v22, %v1656_v17  ;;  %v1657_v19 = vsel %vm1522_vm9, %v1073_v55, 0.0  ;;  %vm1524_vm10 = vcmp.gt.f32.partialorder %v1075_v20, 1e-06  ;;  %v9158_v55 = vld [vmem:[#allocation7 + $0x248] ss:$16 sps:$4 sm:$0xff]  }
 0x21b   :  { %v1831_v32 = vmax.f32 %v1786_v8, %v1657_v19  ;;  %vm1525_vm11 = vcmp.gt.f32.partialorder %v1077_v10, 1e-06  ;;  %v1659_v35 = vsel %vm1524_vm10, %v1075_v20, 0.0  ;;  %v9166_v17 = vld [vmem:[#allocation7 + $0x26c] ss:$16 sps:$4 sm:$0xff]  }
 0x21c   :  { %v1660_v50 = vsel %vm1525_vm11, %v1077_v10, 0.0 }
 0x21d   :  { %v1080_v18 = vpop.f32.mrb[8].mxu0 }
 0x21e   :  { %v1081_v23 = vadd.f32 %v1080_v18, %v11107_v11  ;;  %v1082_v24 = vpop.f32.mrb[9].mxu0 }
 0x21f   :  { %v1083_v28 = vadd.f32 %v1082_v24, %v11111_v26  ;;  %v1084_v30 = vpop.f32.mrb[10].mxu0  ;;  %v9164_v24 = vld [vmem:[#allocation7 + $0x268] ss:$16 sps:$4 sm:$0xff]  }
 0x220   :  { %vm1527_vm12 = vcmp.gt.f32.partialorder %v1081_v23, 1e-06  ;;  %v1085_v29 = vadd.f32 %v1084_v30, %v11107_v11  ;;  %v1086_v15 = vpop.f32.mrb[11].mxu0  ;;  %v9172_v30 = vld [vmem:[#allocation7 + $0x28c] ss:$16 sps:$4 sm:$0xff]  }
 0x221   :  { %v1662_v52 = vsel %vm1527_vm12, %v1081_v23, 0.0  ;;  %vm1528_vm13 = vcmp.gt.f32.partialorder %v1083_v28, 1e-06  ;;  %v1087_v13 = vadd.f32 %v1086_v15, %v11111_v26  ;;  %v9161_v23 = vld [vmem:[#allocation7 + $0x260] ss:$16 sps:$4 sm:$0xff]  }
 0x222   :  { %v1788_v36 = vmax.f32 %v1659_v35, %v1662_v52  ;;  %v1663_v33 = vsel %vm1528_vm13, %v1083_v28, 0.0  ;;  %vm1530_vm14 = vcmp.gt.f32.partialorder %v1085_v29, 1e-06  ;;  %v9169_v28 = vld [vmem:[#allocation7 + $0x284] ss:$16 sps:$4 sm:$0xff]  }
 0x223   :  { %v1789_v38 = vmax.f32 %v1660_v50, %v1663_v33  ;;  %v1665_v39 = vsel %vm1530_vm14, %v1085_v29, 0.0  ;;  %vm1531_vm15 = vcmp.gt.f32.partialorder %v1087_v13, 1e-06  ;;  %v9167_v52 = vld [vmem:[#allocation7 + $0x280] ss:$16 sps:$4 sm:$0xff]  }
 0x224   :  { %v11125_v46 = vmax.f32 %v1788_v36, %v1665_v39  ;;  %v1666_v6 = vsel %vm1531_vm15, %v1087_v13, 0.0  ;;  %v9170_v36 = vld [vmem:[#allocation7 + $0x288] ss:$16 sps:$4 sm:$0xff]   ;;  %v9175_v39 = vld [vmem:[#allocation7 + $0x2a4] ss:$16 sps:$4 sm:$0xff]  }
 0x225   :  { %v11127_v41 = vmax.f32 %v1789_v38, %v1666_v6  ;;  %v1090_v34 = vpop.f32.mrb[12].mxu0 }
 0x226   :  { %v2260_v37 = vpack.c.bf16 %v11125_v46, %v1830_v48  ;;  %v1091_v45 = vadd.f32 %v1090_v34, %v11107_v11  ;;  %v1092_v2 = vpop.f32.mrb[13].mxu0 }
 0x227   :  { %v1093_v51 = vadd.f32 %v1092_v2, %v11111_v26  ;;  %v1094_v56 = vpop.f32.mrb[14].mxu0  ;;  %v2261_v53 = vpack.c.bf16 %v11127_v41, %v1831_v32 }
 0x228   :  { %vm1533_vm0 = vcmp.gt.f32.partialorder %v1091_v45, 1e-06  ;;  %v1095_v43 = vadd.f32 %v1094_v56, %v11107_v11  ;;  %v1096_v7 = vpop.f32.mrb[15].mxu0  ;;  %v9173_v56 = vld [vmem:[#allocation7 + $0x2a0] ss:$16 sps:$4 sm:$0xff]  }
 0x229   :  { %vm1534_vm1 = vcmp.gt.f32.partialorder %v1093_v51, 1e-06  ;;  %v1097_v27 = vadd.f32 %v1096_v7, %v11111_v26  ;;  %4275 = vmatprep.mubr.bf16.mxu1 %v2261_v53  ;;  %4833 = vmatprep.mubr.bf16.mxu0 %v2261_v53  ;;  %v1668_v63 = vsel %vm1533_vm0, %v1091_v45, 0.0 }
 0x22a   :  { %vm1536_vm2 = vcmp.gt.f32.partialorder %v1095_v43, 1e-06  ;;  %4276 = vmatmul.mubr.bf16.vlgmr.msra.gmra.mrb[56].mxu1 %v2260_v37  ;;  %4834 = vmatmul.mubr.bf16.vlgmr.msra.gmra.mrb[88].mxu0 %v2260_v37  ;;  %v1669_v60 = vsel %vm1534_vm1, %v1093_v51, 0.0 }
 0x22b   :  { %v1671_v44 = vsel %vm1536_vm2, %v1095_v43, 0.0  ;;  %vm1537_vm3 = vcmp.gt.f32.partialorder %v1097_v27, 1e-06  ;;  %4337 = vmatpush1.bf16.msra.mxu1 %v9143_v47  ;;  %4895 = vmatpush1.bf16.msra.mxu0 %v9146_v31 }
 0x22c   :  { %v1791_v14 = vmax.f32 %v1668_v63, %v1671_v44  ;;  %v1672_v62 = vsel %vm1537_vm3, %v1097_v27, 0.0  ;;  %4338 = vmatprep.subr.bf16.mxu1 %v9151_v1  ;;  %4896 = vmatprep.subr.bf16.mxu0 %v9154_v61  ;;  %v9176_v1 = vld [vmem:[#allocation7 + $0x2a8] ss:$16 sps:$4 sm:$0xff]   ;;  %v9181_v61 = vld [vmem:[#allocation7 + $0x2c4] ss:$16 sps:$4 sm:$0xff]  }
 0x22d   :  { %v1792_v54 = vmax.f32 %v1669_v60, %v1672_v62  ;;  %v1100_v22 = vpop.f32.mrb[16].mxu0  ;;  %v9184_v27 = vld [vmem:[#allocation7 + $0x2cc] ss:$16 sps:$4 sm:$0xff]  }
 0x22e   :  { %v1101_v40 = vadd.f32 %v1100_v22, %v11107_v11  ;;  %v1102_v8 = vpop.f32.mrb[17].mxu0  ;;  %v9187_v22 = vld [vmem:[#allocation7 + $0x2e4] ss:$16 sps:$4 sm:$0xff]  }
 0x22f   :  { %v1103_v21 = vadd.f32 %v1102_v8, %v11111_v26  ;;  %v1104_v9 = vpop.f32.mrb[18].mxu0  ;;  %4339 = vmatpush1.bf16.msra.mxu1 %v9149_v42  ;;  %4897 = vmatpush1.bf16.msra.mxu0 %v9152_v59 }
 0x230   :  { %vm1539_vm4 = vcmp.gt.f32.partialorder %v1101_v40, 1e-06  ;;  %v1106_v16 = vpop.f32.mrb[19].mxu0  ;;  %4340 = vmatprep.subr.bf16.mxu1 %v9157_v4  ;;  %4898 = vmatprep.subr.bf16.mxu0 %v9160_v3  ;;  %v1105_v32 = vadd.f32 %v1104_v9, %v11107_v11  ;;  %v9185_v9 = vld [vmem:[#allocation7 + $0x2e0] ss:$16 sps:$4 sm:$0xff]  }
 0x231   :  { %v1674_v48 = vsel %vm1539_vm4, %v1101_v40, 0.0  ;;  %vm1540_vm5 = vcmp.gt.f32.partialorder %v1103_v21, 1e-06  ;;  %v1107_v18 = vadd.f32 %v1106_v16, %v11111_v26  ;;  %v9188_v16 = vld [vmem:[#allocation7 + $0x2e8] ss:$16 sps:$4 sm:$0xff]  }
 0x232   :  { %v1836_v19 = vmax.f32 %v1791_v14, %v1674_v48  ;;  %v1675_v20 = vsel %vm1540_vm5, %v1103_v21, 0.0  ;;  %vm1542_vm6 = vcmp.gt.f32.partialorder %v1105_v32, 1e-06  ;;  %v9179_v14 = vld [vmem:[#allocation7 + $0x2c0] ss:$16 sps:$4 sm:$0xff]  }
 0x233   :  { %v1837_v10 = vmax.f32 %v1792_v54, %v1675_v20  ;;  %4341 = vmatpush1.bf16.msra.mxu1 %v9155_v57  ;;  %4899 = vmatpush1.bf16.msra.mxu0 %v9158_v55  ;;  %vm1543_vm7 = vcmp.gt.f32.partialorder %v1107_v18, 1e-06  ;;  %v1677_v34 = vsel %vm1542_vm6, %v1105_v32, 0.0  ;;  %v9182_v54 = vld [vmem:[#allocation7 + $0x2c8] ss:$16 sps:$4 sm:$0xff]  }
 0x234   :  { %4342 = vmatprep.subr.bf16.mxu1 %v9163_v12  ;;  %4900 = vmatprep.subr.bf16.mxu0 %v9166_v17  ;;  %v11140_v29 = vpack.c.bf16 %v1836_v19, %v11125_v46  ;;  %v1678_v2 = vsel %vm1543_vm7, %v1107_v18, 0.0  ;;  %v9190_v57 = vld [vmem:[#allocation7 + $0x2ec] ss:$16 sps:$4 sm:$0xff]   ;;  %v9193_v20 = vld [vmem:[#allocation7 + $0x304] ss:$16 sps:$4 sm:$0xff]  }
 0x235   :  { %v11143_v15 = vpack.c.bf16 %v1837_v10, %v11127_v41  ;;  %v1110_v35 = vpop.f32.mrb[20].mxu0  ;;  %v9178_v41 = vld [vmem:[#allocation7 + $0x2ac] ss:$16 sps:$4 sm:$0xff]  }
 0x236   :  { %v1111_v13 = vadd.f32 %v1110_v35, %v11107_v11  ;;  %v1112_v50 = vpop.f32.mrb[21].mxu0  ;;  %v9196_v32 = vld [vmem:[#allocation7 + $0x30c] ss:$16 sps:$4 sm:$0xff]  }
 0x237   :  { %v1113_v33 = vadd.f32 %v1112_v50, %v11111_v26  ;;  %v1114_v38 = vpop.f32.mrb[22].mxu0  ;;  %4343 = vmatpush1.bf16.msra.mxu1 %v9161_v23  ;;  %4901 = vmatpush1.bf16.msra.mxu0 %v9164_v24 }
 0x238   :  { %vm1545_vm8 = vcmp.gt.f32.partialorder %v1111_v13, 1e-06  ;;  %v1115_v46 = vadd.f32 %v1114_v38, %v11107_v11  ;;  %v1116_v6 = vpop.f32.mrb[23].mxu0  ;;  %4344 = vmatprep.subr.bf16.mxu1 %v9169_v28  ;;  %4902 = vmatprep.subr.bf16.mxu0 %v9172_v30  ;;  %v9191_v28 = vld [vmem:[#allocation7 + $0x300] ss:$16 sps:$4 sm:$0xff]  }
 0x239   :  { %v1680_v37 = vsel %vm1545_vm8, %v1111_v13, 0.0  ;;  %vm1546_vm9 = vcmp.gt.f32.partialorder %v1113_v33, 1e-06  ;;  %v1117_v45 = vadd.f32 %v1116_v6, %v11111_v26  ;;  %v9199_v13 = vld [vmem:[#allocation7 + $0x324] ss:$16 sps:$4 sm:$0xff]  }
 0x23a   :  { %v1794_v47 = vmax.f32 %v1677_v34, %v1680_v37  ;;  %v1681_v51 = vsel %vm1546_vm9, %v1113_v33, 0.0  ;;  %vm1548_vm10 = vcmp.gt.f32.partialorder %v1115_v46, 1e-06  ;;  %v9197_v34 = vld [vmem:[#allocation7 + $0x320] ss:$16 sps:$4 sm:$0xff]  }
 0x23b   :  { %v1795_v53 = vmax.f32 %v1678_v2, %v1681_v51  ;;  %v1683_v31 = vsel %vm1548_vm10, %v1115_v46, 0.0  ;;  %vm1549_vm11 = vcmp.gt.f32.partialorder %v1117_v45, 1e-06  ;;  %4345 = vmatpush1.bf16.msra.mxu1 %v9167_v52  ;;  %4903 = vmatpush1.bf16.msra.mxu0 %v9170_v36  ;;  %v9194_v52 = vld [vmem:[#allocation7 + $0x308] ss:$16 sps:$4 sm:$0xff]  }
 0x23c   :  { %v11151_v43 = vmax.f32 %v1794_v47, %v1683_v31  ;;  %v1684_v7 = vsel %vm1549_vm11, %v1117_v45, 0.0  ;;  %4346 = vmatprep.subr.bf16.mxu1 %v9175_v39  ;;  %4904 = vmatprep.subr.bf16.mxu0 %v9178_v41  ;;  %v9202_v36 = vld [vmem:[#allocation7 + $0x32c] ss:$16 sps:$4 sm:$0xff]   ;;  %v9200_v37 = vld [vmem:[#allocation7 + $0x328] ss:$16 sps:$4 sm:$0xff]  }
 0x23d   :  { %v11153_v42 = vmax.f32 %v1795_v53, %v1684_v7  ;;  %v1120_v63 = vpop.f32.mrb[24].mxu0  ;;  %v9205_v2 = vld [vmem:[#allocation7 + $0x344] ss:$16 sps:$4 sm:$0xff]   ;;  %v9208_v47 = vld [vmem:[#allocation7 + $0x34c] ss:$16 sps:$4 sm:$0xff]  }
 0x23e   :  { %v11156_v44 = vpack.c.bf16 %v11151_v43, %v1836_v19  ;;  %v1121_v59 = vadd.f32 %v1120_v63, %v11107_v11  ;;  %v1122_v60 = vpop.f32.mrb[25].mxu0  ;;  %v9203_v53 = vld [vmem:[#allocation7 + $0x340] ss:$16 sps:$4 sm:$0xff]   ;;  %v9206_v7 = vld [vmem:[#allocation7 + $0x348] ss:$16 sps:$4 sm:$0xff]  }
 0x23f   :  { %v11160_v62 = vpack.c.bf16 %v11153_v42, %v1837_v10  ;;  %v1123_v4 = vadd.f32 %v1122_v60, %v11111_v26  ;;  %v1124_v3 = vpop.f32.mrb[26].mxu0  ;;  %4347 = vmatpush1.bf16.msra.mxu1 %v9173_v56  ;;  %4905 = vmatpush1.bf16.msra.mxu0 %v9176_v1 }
 0x240   :  { %vm1551_vm12 = vcmp.gt.f32.partialorder %v1121_v59, 1e-06  ;;  %v1125_v40 = vadd.f32 %v1124_v3, %v11107_v11  ;;  %v1126_v8 = vpop.f32.mrb[27].mxu0  ;;  %4348 = vmatprep.subr.bf16.mxu1 %v9181_v61  ;;  %4906 = vmatprep.subr.bf16.mxu0 %v9184_v27 }
 0x241   :  { %vm1552_vm13 = vcmp.gt.f32.partialorder %v1123_v4, 1e-06  ;;  %v1127_v21 = vadd.f32 %v1126_v8, %v11111_v26  ;;  %4285 = vmatprep.mubr.bf16.mxu1 %v11160_v62  ;;  %4843 = vmatprep.mubr.bf16.mxu0 %v11160_v62  ;;  %v1686_v55 = vsel %vm1551_vm12, %v1121_v59, 0.0 }
 0x242   :  { %vm1554_vm14 = vcmp.gt.f32.partialorder %v1125_v40, 1e-06  ;;  %4286 = vmatmul.mubr.bf16.gmra.mrb[60].mxu1 %v11156_v44  ;;  %4844 = vmatmul.mubr.bf16.gmra.mrb[92].mxu0 %v11156_v44  ;;  %v1687_v17 = vsel %vm1552_vm13, %v1123_v4, 0.0 }
 0x243   :  { %v1689_v12 = vsel %vm1554_vm14, %v1125_v40, 0.0  ;;  %vm1555_vm15 = vcmp.gt.f32.partialorder %v1127_v21, 1e-06  ;;  %4349 = vmatpush1.bf16.msra.mxu1 %v9179_v14  ;;  %4907 = vmatpush1.bf16.msra.mxu0 %v9182_v54  ;;  %v9209_v40 = vld [vmem:[#allocation7 + $0x360] ss:$16 sps:$4 sm:$0xff]  }
 0x244   :  { %v1797_v48 = vmax.f32 %v1686_v55, %v1689_v12  ;;  %v1690_v19 = vsel %vm1555_vm15, %v1127_v21, 0.0  ;;  %4350 = vmatprep.subr.bf16.mxu1 %v9187_v22  ;;  %4908 = vmatprep.subr.bf16.mxu0 %v9190_v57  ;;  %v9212_v21 = vld [vmem:[#allocation7 + $0x368] ss:$16 sps:$4 sm:$0xff]   ;;  %v9217_v12 = vld [vmem:[#allocation7 + $0x384] ss:$16 sps:$4 sm:$0xff]  }
 0x245   :  { %v1798_v10 = vmax.f32 %v1687_v17, %v1690_v19  ;;  %v1130_v18 = vpop.f32.mrb[28].mxu0 }
 0x246   :  { %v1131_v23 = vadd.f32 %v1130_v18, %v11107_v11  ;;  %v1132_v24 = vpop.f32.mrb[29].mxu0 }
 0x247   :  { %v1133_v30 = vadd.f32 %v1132_v24, %v11111_v26  ;;  %v1134_v35 = vpop.f32.mrb[30].mxu0  ;;  %4351 = vmatpush1.bf16.msra.mxu1 %v9185_v9  ;;  %4909 = vmatpush1.bf16.msra.mxu0 %v9188_v16  ;;  %v9220_v16 = vld [vmem:[#allocation7 + $0x38c] ss:$16 sps:$4 sm:$0xff]  }
 0x248   :  { %vm1557_vm0 = vcmp.gt.f32.partialorder %v1131_v23, 1e-06  ;;  %v1136_v50 = vpop.f32.mrb[31].mxu0  ;;  %4352 = vmatprep.subr.bf16.mxu1 %v9193_v20  ;;  %4910 = vmatprep.subr.bf16.mxu0 %v9196_v32  ;;  %v1135_v46 = vadd.f32 %v1134_v35, %v11107_v11 }
 0x249   :  { %v1692_v33 = vsel %vm1557_vm0, %v1131_v23, 0.0  ;;  %vm1558_vm1 = vcmp.gt.f32.partialorder %v1133_v30, 1e-06  ;;  %v1137_v41 = vadd.f32 %v1136_v50, %v11111_v26 }
 0x24a   :  { %v1842_v38 = vmax.f32 %v1797_v48, %v1692_v33  ;;  %v1693_v39 = vsel %vm1558_vm1, %v1133_v30, 0.0  ;;  %vm1560_vm2 = vcmp.gt.f32.partialorder %v1135_v46, 1e-06  ;;  %v9223_v30 = vld [vmem:[#allocation7 + $0x3a4] ss:$16 sps:$4 sm:$0xff]  }
 0x24b   :  { %v1843_v6 = vmax.f32 %v1798_v10, %v1693_v39  ;;  %4353 = vmatpush1.bf16.msra.mxu1 %v9191_v28  ;;  %4911 = vmatpush1.bf16.msra.mxu0 %v9194_v52  ;;  %vm1561_vm3 = vcmp.gt.f32.partialorder %v1137_v41, 1e-06  ;;  %v1695_v60 = vsel %vm1560_vm2, %v1135_v46, 0.0  ;;  %v9215_v10 = vld [vmem:[#allocation7 + $0x380] ss:$16 sps:$4 sm:$0xff]  }
 0x24c   :  { %v11174_v45 = vpack.c.bf16 %v1842_v38, %v11151_v43  ;;  %4354 = vmatprep.subr.bf16.mxu1 %v9199_v13  ;;  %4912 = vmatprep.subr.bf16.mxu0 %v9202_v36  ;;  %v9211_v43 = vld [vmem:[#allocation7 + $0x364] ss:$16 sps:$4 sm:$0xff]   ;;  %v1696_v3 = vsel %vm1561_vm3, %v1137_v41, 0.0  ;;  %v9218_v28 = vld [vmem:[#allocation7 + $0x388] ss:$16 sps:$4 sm:$0xff]  }
 0x24d   :  { %v11177_v51 = vpack.c.bf16 %v1843_v6, %v11153_v42  ;;  %v1140_v56 = vpop.f32.mrb[32].mxu0  ;;  %v9214_v42 = vld [vmem:[#allocation7 + $0x36c] ss:$16 sps:$4 sm:$0xff]   ;;  %v9221_v36 = vld [vmem:[#allocation7 + $0x3a0] ss:$16 sps:$4 sm:$0xff]  }
 0x24e   :  { %v1141_v31 = vadd.f32 %v1140_v56, %v11107_v11  ;;  %v1142_v1 = vpop.f32.mrb[33].mxu0  ;;  %v9226_v13 = vld [vmem:[#allocation7 + $0x3ac] ss:$16 sps:$4 sm:$0xff]   ;;  %v9224_v39 = vld [vmem:[#allocation7 + $0x3a8] ss:$16 sps:$4 sm:$0xff]  }
 0x24f   :  { %v1143_v61 = vadd.f32 %v1142_v1, %v11111_v26  ;;  %v1144_v27 = vpop.f32.mrb[34].mxu0  ;;  %4355 = vmatpush1.bf16.msra.mxu1 %v9197_v34  ;;  %4913 = vmatpush1.bf16.msra.mxu0 %v9200_v37  ;;  %v9229_v34 = vld [vmem:[#allocation7 + $0x3c4] ss:$16 sps:$4 sm:$0xff]   ;;  %v9232_v37 = vld [vmem:[#allocation7 + $0x3cc] ss:$16 sps:$4 sm:$0xff]  }
 0x250   :  { %vm1563_vm4 = vcmp.gt.f32.partialorder %v1141_v31, 1e-06  ;;  %v1145_v63 = vadd.f32 %v1144_v27, %v11107_v11  ;;  %v1146_v59 = vpop.f32.mrb[35].mxu0  ;;  %4356 = vmatprep.subr.bf16.mxu1 %v9205_v2  ;;  %4914 = vmatprep.subr.bf16.mxu0 %v9208_v47  ;;  %v9235_v27 = vld [vmem:[#allocation7 + $0x3e4] ss:$16 sps:$4 sm:$0xff]  }
 0x251   :  { %v1698_v14 = vsel %vm1563_vm4, %v1141_v31, 0.0  ;;  %vm1564_vm5 = vcmp.gt.f32.partialorder %v1143_v61, 1e-06  ;;  %v1147_v4 = vadd.f32 %v1146_v59, %v11111_v26  ;;  %v9227_v31 = vld [vmem:[#allocation7 + $0x3c0] ss:$16 sps:$4 sm:$0xff]  }
 0x252   :  { %v1800_v54 = vmax.f32 %v1695_v60, %v1698_v14  ;;  %v1699_v22 = vsel %vm1564_vm5, %v1143_v61, 0.0  ;;  %vm1566_vm6 = vcmp.gt.f32.partialorder %v1145_v63, 1e-06  ;;  %v9230_v61 = vld [vmem:[#allocation7 + $0x3c8] ss:$16 sps:$4 sm:$0xff]  }
 0x253   :  { %v1801_v8 = vmax.f32 %v1696_v3, %v1699_v22  ;;  %v1701_v57 = vsel %vm1566_vm6, %v1145_v63, 0.0  ;;  %vm1567_vm7 = vcmp.gt.f32.partialorder %v1147_v4, 1e-06  ;;  %4357 = vmatpush1.bf16.msra.mxu1 %v9203_v53  ;;  %4915 = vmatpush1.bf16.msra.mxu0 %v9206_v7  ;;  %v9238_v63 = vld [vmem:[#allocation7 + $0x3ec] ss:$16 sps:$4 sm:$0xff]  }
 0x254   :  { %v11185_v9 = vmax.f32 %v1800_v54, %v1701_v57  ;;  %v1702_v55 = vsel %vm1567_vm7, %v1147_v4, 0.0  ;;  %4358 = vmatprep.subr.bf16.mxu1 %v9211_v43  ;;  %4916 = vmatprep.subr.bf16.mxu0 %v9214_v42  ;;  %v9233_v54 = vld [vmem:[#allocation7 + $0x3e0] ss:$16 sps:$4 sm:$0xff]   ;;  %v9236_v22 = vld [vmem:[#allocation7 + $0x3e8] ss:$16 sps:$4 sm:$0xff]  }
 0x255   :  { %v11187_v17 = vmax.f32 %v1801_v8, %v1702_v55  ;;  %v1150_v48 = vpop.f32.mrb[36].mxu0  ;;  %v9241_v8 = vld [vmem:[#allocation7 + $0x404] ss:$16 sps:$4 sm:$0xff]   ;;  %v9244_v57 = vld [vmem:[#allocation7 + $0x40c] ss:$16 sps:$4 sm:$0xff]  }
 0x256   :  { %v11190_v19 = vpack.c.bf16 %v11185_v9, %v1842_v38  ;;  %v1151_v20 = vadd.f32 %v1150_v48, %v11107_v11  ;;  %v1152_v32 = vpop.f32.mrb[37].mxu0 }
 0x257   :  { %v11194_v18 = vpack.c.bf16 %v11187_v17, %v1843_v6  ;;  %v1153_v23 = vadd.f32 %v1152_v32, %v11111_v26  ;;  %v1154_v24 = vpop.f32.mrb[38].mxu0  ;;  %4359 = vmatpush1.bf16.msra.mxu1 %v9209_v40  ;;  %4917 = vmatpush1.bf16.msra.mxu0 %v9212_v21 }
 0x258   :  { %vm1569_vm8 = vcmp.gt.f32.partialorder %v1151_v20, 1e-06  ;;  %v1155_v35 = vadd.f32 %v1154_v24, %v11107_v11  ;;  %v1156_v52 = vpop.f32.mrb[39].mxu0  ;;  %4360 = vmatprep.subr.bf16.mxu1 %v9217_v12  ;;  %4918 = vmatprep.subr.bf16.mxu0 %v9220_v16 }
 0x259   :  { %vm1570_vm9 = vcmp.gt.f32.partialorder %v1153_v23, 1e-06  ;;  %v1157_v50 = vadd.f32 %v1156_v52, %v11111_v26  ;;  %4295 = vmatprep.mubr.bf16.mxu1 %v11194_v18  ;;  %4853 = vmatprep.mubr.bf16.mxu0 %v11194_v18  ;;  %v1704_v33 = vsel %vm1569_vm8, %v1151_v20, 0.0 }
 0x25a   :  { %vm1572_vm10 = vcmp.gt.f32.partialorder %v1155_v35, 1e-06  ;;  %4296 = vmatmul.mubr.bf16.gmra.mrb[64].mxu1 %v11190_v19  ;;  %4854 = vmatmul.mubr.bf16.gmra.mrb[96].mxu0 %v11190_v19  ;;  %v1705_v46 = vsel %vm1570_vm9, %v1153_v23, 0.0 }
 0x25b   :  { %v1707_v38 = vsel %vm1572_vm10, %v1155_v35, 0.0  ;;  %vm1573_vm11 = vcmp.gt.f32.partialorder %v1157_v50, 1e-06  ;;  %4361 = vmatpush1.bf16.msra.mxu1 %v9215_v10  ;;  %4919 = vmatpush1.bf16.msra.mxu0 %v9218_v28 }
 0x25c   :  { %v1803_v6 = vmax.f32 %v1704_v33, %v1707_v38  ;;  %v1708_v41 = vsel %vm1573_vm11, %v1157_v50, 0.0  ;;  %4362 = vmatprep.subr.bf16.mxu1 %v9223_v30  ;;  %4920 = vmatprep.subr.bf16.mxu0 %v9226_v13 }
 0x25d   :  { %v1804_v2 = vmax.f32 %v1705_v46, %v1708_v41  ;;  %v1160_v47 = vpop.f32.mrb[40].mxu0 }
 0x25e   :  { %v1161_v56 = vadd.f32 %v1160_v47, %v11107_v11  ;;  %v1162_v53 = vpop.f32.mrb[41].mxu0 }
 0x25f   :  { %v1163_v1 = vadd.f32 %v1162_v53, %v11111_v26  ;;  %v1164_v7 = vpop.f32.mrb[42].mxu0  ;;  %4363 = vmatpush1.bf16.msra.mxu1 %v9221_v36  ;;  %4921 = vmatpush1.bf16.msra.mxu0 %v9224_v39 }
 0x260   :  { %vm1575_vm12 = vcmp.gt.f32.partialorder %v1161_v56, 1e-06  ;;  %v1166_v43 = vpop.f32.mrb[43].mxu0  ;;  %4364 = vmatprep.subr.bf16.mxu1 %v9229_v34  ;;  %4922 = vmatprep.subr.bf16.mxu0 %v9232_v37  ;;  %v1165_v14 = vadd.f32 %v1164_v7, %v11107_v11 }
 0x261   :  { %v1710_v59 = vsel %vm1575_vm12, %v1161_v56, 0.0  ;;  %vm1576_vm13 = vcmp.gt.f32.partialorder %v1163_v1, 1e-06  ;;  %v1167_v3 = vadd.f32 %v1166_v43, %v11111_v26 }
 0x262   :  { %v1848_v42 = vmax.f32 %v1803_v6, %v1710_v59  ;;  %v1711_v60 = vsel %vm1576_vm13, %v1163_v1, 0.0  ;;  %vm1578_vm14 = vcmp.gt.f32.partialorder %v1165_v14, 1e-06 }
 0x263   :  { %v1849_v4 = vmax.f32 %v1804_v2, %v1711_v60  ;;  %4365 = vmatpush1.bf16.msra.mxu1 %v9227_v31  ;;  %4923 = vmatpush1.bf16.msra.mxu0 %v9230_v61  ;;  %vm1579_vm15 = vcmp.gt.f32.partialorder %v1167_v3, 1e-06  ;;  %v11235_v60 = vsub.s32 2, %v11095_v5 }
 0x264   :  { %v11208_v40 = vpack.c.bf16 %v1848_v42, %v11185_v9  ;;  %4366 = vmatprep.subr.bf16.mxu1 %v9235_v27  ;;  %4924 = vmatprep.subr.bf16.mxu0 %v9238_v63  ;;  %v1714_v35 = vsel %vm1579_vm15, %v1167_v3, 0.0 }
 0x265   :  { %v11211_v21 = vpack.c.bf16 %v1849_v4, %v11187_v17  ;;  %v1170_v55 = vpop.f32.mrb[44].mxu0  ;;  %v1713_v17 = vsel %vm1578_vm14, %v1165_v14, 0.0  ;;  %11770 = vst [vmem:[#allocation30_spill] sm:$0xff] %v11235_v60 }
 0x266   :  { %v1171_v12 = vadd.f32 %v1170_v55, %v11107_v11  ;;  %v1172_v16 = vpop.f32.mrb[45].mxu0 }
 0x267   :  { %v1173_v48 = vadd.f32 %v1172_v16, %v11111_v26  ;;  %v1174_v20 = vpop.f32.mrb[46].mxu0  ;;  %v11215_v32 = vpop.f32.mrb[0].mxu1  ;;  %4367 = vmatpush1.bf16.msra.mxu1 %v9233_v54  ;;  %4925 = vmatpush1.bf16.msra.mxu0 %v9236_v22 }
 0x268   :  { %vm1581_vm0 = vcmp.gt.f32.partialorder %v1171_v12, 1e-06  ;;  %v1175_v9 = vadd.f32 %v1174_v20, %v11107_v11  ;;  %v1176_v10 = vpop.f32.mrb[47].mxu0  ;;  %v11218_v23 = vpop.f32.mrb[1].mxu1  ;;  %4429 = vmatprep.subr.bf16.mxu1 %v9241_v8  ;;  %4987 = vmatprep.subr.bf16.mxu0 %v9244_v57 }
 0x269   :  { %v1716_v24 = vsel %vm1581_vm0, %v1171_v12, 0.0  ;;  %vm1582_vm1 = vcmp.gt.f32.partialorder %v1173_v48, 1e-06  ;;  %v1177_v28 = vadd.f32 %v1176_v10, %v11111_v26  ;;  %v1284_v30 = vpop.f32.mrb[2].mxu1 }
 0x26a   :  { %v1806_v52 = vmax.f32 %v1713_v17, %v1716_v24  ;;  %v1717_v13 = vsel %vm1582_vm1, %v1173_v48, 0.0  ;;  %vm1584_vm2 = vcmp.gt.f32.partialorder %v1175_v9, 1e-06  ;;  %v1285_v50 = vpop.f32.mrb[3].mxu1  ;;  %v11242_v48 = vrot.slane %v11100_v58, %v11235_v60 }
 0x26b   :  { %v1807_v36 = vmax.f32 %v1714_v35, %v1717_v13  ;;  %v1719_v33 = vsel %vm1584_vm2, %v1175_v9, 0.0  ;;  %vm1585_vm3 = vcmp.gt.f32.partialorder %v1177_v28, 1e-06 }
 0x26c   :  { %v1851_v38 = vmax.f32 %v1806_v52, %v1719_v33  ;;  %v1720_v39 = vsel %vm1585_vm3, %v1177_v28, 0.0 }
 0x26d   :  { %v1852_v46 = vmax.f32 %v1807_v36, %v1720_v39  ;;  %v1180_v6 = vpop.f32.mrb[48].mxu0 }
 0x26e   :  { %v11222_v41 = vpack.c.bf16 %v1851_v38, %v1848_v42  ;;  %v1181_v34 = vadd.f32 %v1180_v6, %v11107_v11  ;;  %v1182_v37 = vpop.f32.mrb[49].mxu0 }
 0x26f   :  { %v11225_v2 = vpack.c.bf16 %v1852_v46, %v1849_v4  ;;  %v1183_v47 = vadd.f32 %v1182_v37, %v11111_v26  ;;  %v1184_v56 = vpop.f32.mrb[50].mxu0 }
 0x270   :  { %vm1587_vm4 = vcmp.gt.f32.partialorder %v1181_v34, 1e-06  ;;  %v1185_v53 = vadd.f32 %v1184_v56, %v11107_v11  ;;  %v1186_v31 = vpop.f32.mrb[51].mxu0 }
 0x271   :  { %vm1588_vm5 = vcmp.gt.f32.partialorder %v1183_v47, 1e-06  ;;  %v1187_v1 = vadd.f32 %v1186_v31, %v11111_v26  ;;  %4305 = vmatprep.mubr.bf16.mxu1 %v11225_v2  ;;  %4863 = vmatprep.mubr.bf16.mxu0 %v11225_v2  ;;  %v1722_v7 = vsel %vm1587_vm4, %v1181_v34, 0.0 }
 0x272   :  { %vm1590_vm6 = vcmp.gt.f32.partialorder %v1185_v53, 1e-06  ;;  %4306 = vmatmul.mubr.bf16.gmra.mrb[68].mxu1 %v11222_v41  ;;  %4864 = vmatmul.mubr.bf16.gmra.mrb[100].mxu0 %v11222_v41  ;;  %v1723_v43 = vsel %vm1588_vm5, %v1183_v47, 0.0 }
 0x273   :  { %v1725_v61 = vsel %vm1590_vm6, %v1185_v53, 0.0  ;;  %vm1591_vm7 = vcmp.gt.f32.partialorder %v1187_v1, 1e-06  ;;  %v1288_v27 = vpop.f32.mrb[4].mxu1 }
 0x274   :  { %v1809_v63 = vmax.f32 %v1722_v7, %v1725_v61  ;;  %v1726_v59 = vsel %vm1591_vm7, %v1187_v1, 0.0  ;;  %v1289_v42 = vpop.f32.mrb[5].mxu1 }
 0x275   :  { %v1810_v14 = vmax.f32 %v1723_v43, %v1726_v59  ;;  %v1190_v4 = vpop.f32.mrb[52].mxu0  ;;  %v1290_v3 = vpop.f32.mrb[6].mxu1 }
 0x276   :  { %v1191_v54 = vadd.f32 %v1190_v4, %v11107_v11  ;;  %v1192_v22 = vpop.f32.mrb[53].mxu0  ;;  %v1291_v8 = vpop.f32.mrb[7].mxu1 }
 0x277   :  { %v1193_v57 = vadd.f32 %v1192_v22, %v11111_v26  ;;  %v1194_v55 = vpop.f32.mrb[54].mxu0 }
 0x278   :  { %vm1593_vm8 = vcmp.gt.f32.partialorder %v1191_v54, 1e-06  ;;  %v1195_v12 = vadd.f32 %v1194_v55, %v11107_v11  ;;  %v1196_v16 = vpop.f32.mrb[55].mxu0 }
 0x279   :  { %v1728_v20 = vsel %vm1593_vm8, %v1191_v54, 0.0  ;;  %vm1594_vm9 = vcmp.gt.f32.partialorder %v1193_v57, 1e-06  ;;  %v1197_v9 = vadd.f32 %v1196_v16, %v11111_v26 }
 0x27a   :  { %v1854_v10 = vmax.f32 %v1809_v63, %v1728_v20  ;;  %v1729_v17 = vsel %vm1594_vm9, %v1193_v57, 0.0  ;;  %vm1596_vm10 = vcmp.gt.f32.partialorder %v1195_v12, 1e-06 }
 0x27b   :  { %v11245_v24 = vmax.f32 %v1810_v14, %v1729_v17  ;;  %v8208_v28 = vpop.f32.mrb[8].mxu1  ;;  %vm1597_vm11 = vcmp.gt.f32.partialorder %v1197_v9, 1e-06  ;;  %v1731_v33 = vsel %vm1596_vm10, %v1195_v12, 0.0 }
 0x27c   :  { %v11247_v30 = vpack.c.bf16 %v1854_v10, %v1851_v38  ;;  %v1336_v35 = vadd.f32 %v8208_v28, %v11242_v48  ;;  %v1327_v52 = vpop.f32.mrb[9].mxu1  ;;  %v1732_v37 = vsel %vm1597_vm11, %v1197_v9, 0.0 }
 0x27d   :  { %v11251_v13 = vpack.c.bf16 %v11245_v24, %v1852_v46  ;;  %v1200_v58 = vpop.f32.mrb[56].mxu0  ;;  %v1328_v50 = vadd.f32 %v1327_v52, %v11242_v48  ;;  %v8209_v36 = vpop.f32.mrb[10].mxu1 }
 0x27e   :  { %v1201_v39 = vadd.f32 %v1200_v58, %v11107_v11  ;;  %v1202_v6 = vpop.f32.mrb[57].mxu0  ;;  %v1330_v34 = vpop.f32.mrb[11].mxu1  ;;  %vm1523_vm13 = vcmp.gt.f32.partialorder %v1336_v35, 1e-06  ;;  %v1339_v46 = vadd.f32 %v8209_v36, %v11242_v48 }
 0x27f   :  { %vm1517_vm12 = vcmp.gt.f32.partialorder %v1328_v50, 1e-06  ;;  %v1203_v38 = vadd.f32 %v1202_v6, %v11111_v26  ;;  %v1204_v47 = vpop.f32.mrb[58].mxu0  ;;  %v1331_v56 = vadd.f32 %v1330_v34, %v11242_v48  ;;  %v1658_v3 = vsel %vm1523_vm13, %v1336_v35, 0.0 }
 0x280   :  { %vm1599_vm14 = vcmp.gt.f32.partialorder %v1201_v39, 1e-06  ;;  %v1205_v53 = vadd.f32 %v1204_v47, %v11107_v11  ;;  %v1206_v31 = vpop.f32.mrb[59].mxu0  ;;  %v1652_v7 = vsel %vm1517_vm12, %v1328_v50, 0.0  ;;  %vm1526_vm2 = vcmp.gt.f32.partialorder %v1339_v46, 1e-06 }
 0x281   :  { %v1734_v1 = vsel %vm1599_vm14, %v1201_v39, 0.0  ;;  %vm1600_vm15 = vcmp.gt.f32.partialorder %v1203_v38, 1e-06  ;;  %vm1520_vm0 = vcmp.gt.f32.partialorder %v1331_v56, 1e-06  ;;  %v1207_v14 = vadd.f32 %v1206_v31, %v11111_v26 }
 0x282   :  { %v1812_v61 = vmax.f32 %v1731_v33, %v1734_v1  ;;  %v1735_v27 = vsel %vm1600_vm15, %v1203_v38, 0.0  ;;  %vm1602_vm1 = vcmp.gt.f32.partialorder %v1205_v53, 1e-06  ;;  %v1655_v43 = vsel %vm1520_vm0, %v1331_v56, 0.0 }
 0x283   :  { %v1813_v63 = vmax.f32 %v1732_v37, %v1735_v27  ;;  %v1737_v59 = vsel %vm1602_vm1, %v1205_v53, 0.0  ;;  %v1787_v42 = vmax.f32 %v1652_v7, %v1655_v43  ;;  %v8212_v4 = vpop.f32.mrb[12].mxu1  ;;  %vm1603_vm3 = vcmp.gt.f32.partialorder %v1207_v14, 1e-06 }
 0x284   :  { %v11261_v54 = vmax.f32 %v1812_v61, %v1737_v59  ;;  %v1352_v22 = vadd.f32 %v8212_v4, %v11242_v48  ;;  %v1343_v8 = vpop.f32.mrb[13].mxu1  ;;  %v1738_v9 = vsel %vm1603_vm3, %v1207_v14, 0.0  ;;  %v1661_v52 = vsel %vm1526_vm2, %v1339_v46, 0.0 }
 0x285   :  { %v1832_v57 = vmax.f32 %v1787_v42, %v1658_v3  ;;  %v1210_v55 = vpop.f32.mrb[60].mxu0  ;;  %v1344_v12 = vadd.f32 %v1343_v8, %v11242_v48  ;;  %v8213_v16 = vpop.f32.mrb[14].mxu1  ;;  %v11269_v58 = vmax.f32 %v1813_v63, %v1738_v9  ;;  %v11276_v34 = vadd.f32 %v11215_v32, %v11107_v11 }
 0x286   :  { %v11266_v20 = vpack.c.bf16 %v11261_v54, %v1854_v10  ;;  %vm1535_vm4 = vcmp.gt.f32.partialorder %v1352_v22, 1e-06  ;;  %v1211_v17 = vadd.f32 %v1210_v55, %v11107_v11  ;;  %v1212_v28 = vpop.f32.mrb[61].mxu0  ;;  %v1346_v35 = vpop.f32.mrb[15].mxu1  ;;  %v1355_v39 = vadd.f32 %v8213_v16, %v11242_v48 }
 0x287   :  { %vm1529_vm5 = vcmp.gt.f32.partialorder %v1344_v12, 1e-06  ;;  %v1213_v50 = vadd.f32 %v1212_v28, %v11111_v26  ;;  %v1214_v36 = vpop.f32.mrb[62].mxu0  ;;  %v11280_v37 = vpack.c.bf16 %v11269_v58, %v11245_v24  ;;  %v1670_v38 = vsel %vm1535_vm4, %v1352_v22, 0.0 }
 0x288   :  { %vm1605_vm6 = vcmp.gt.f32.partialorder %v1211_v17, 1e-06  ;;  %v1664_v33 = vsel %vm1529_vm5, %v1344_v12, 0.0  ;;  %v1215_v10 = vadd.f32 %v1214_v36, %v11107_v11  ;;  %v1216_v6 = vpop.f32.mrb[63].mxu0  ;;  %vm1538_vm8 = vcmp.gt.f32.partialorder %v1355_v39, 1e-06 }
 0x289   :  { %v1790_v47 = vmax.f32 %v1661_v52, %v1664_v33  ;;  %vm1606_vm7 = vcmp.gt.f32.partialorder %v1213_v50, 1e-06  ;;  %v1347_v56 = vadd.f32 %v1346_v35, %v11242_v48  ;;  %v1740_v46 = vsel %vm1605_vm6, %v1211_v17, 0.0  ;;  %4315 = vmatprep.mubr.bf16.mxu1 %v11280_v37  ;;  %4873 = vmatprep.mubr.bf16.mxu0 %v11280_v37 }
 0x28a   :  { %vm1608_vm9 = vcmp.gt.f32.partialorder %v1215_v10, 1e-06  ;;  %v1673_v53 = vsel %vm1538_vm8, %v1355_v39, 0.0  ;;  %v1217_v1 = vadd.f32 %v1216_v6, %v11111_v26  ;;  %4316 = vmatmul.mubr.bf16.gmra.mrb[72].mxu1 %v11266_v20  ;;  %4874 = vmatmul.mubr.bf16.gmra.mrb[104].mxu0 %v11266_v20  ;;  %v1741_v43 = vsel %vm1606_vm7, %v1213_v50, 0.0 }
 0x28b   :  { %v1743_v31 = vsel %vm1608_vm9, %v1215_v10, 0.0  ;;  %v8216_v32 = vpop.f32.mrb[16].mxu1  ;;  %v1793_v24 = vmax.f32 %v1670_v38, %v1673_v53  ;;  %vm1532_vm10 = vcmp.gt.f32.partialorder %v1347_v56, 1e-06 }
 0x28c   :  { %v1815_v7 = vmax.f32 %v1740_v46, %v1743_v31  ;;  %v1368_v61 = vadd.f32 %v8216_v32, %v11242_v48  ;;  %v1359_v27 = vpop.f32.mrb[17].mxu1  ;;  %v1667_v63 = vsel %vm1532_vm10, %v1347_v56, 0.0  ;;  %vm1609_vm11 = vcmp.gt.f32.partialorder %v1217_v1, 1e-06 }
 0x28d   :  { %v1220_v59 = vpop.f32.mrb[64].mxu0  ;;  %v1360_v42 = vadd.f32 %v1359_v27, %v11242_v48  ;;  %v8217_v14 = vpop.f32.mrb[18].mxu1  ;;  %v11292_v4 = vmax.f32 %v1790_v47, %v1667_v63  ;;  %v1744_v3 = vsel %vm1609_vm11, %v1217_v1, 0.0 }
 0x28e   :  { %vm1547_vm12 = vcmp.gt.f32.partialorder %v1368_v61, 1e-06  ;;  %v1221_v22 = vadd.f32 %v1220_v59, %v11107_v11  ;;  %v1222_v8 = vpop.f32.mrb[65].mxu0  ;;  %v1362_v55 = vpop.f32.mrb[19].mxu1  ;;  %v1816_v12 = vmax.f32 %v1741_v43, %v1744_v3  ;;  %v1371_v52 = vadd.f32 %v8217_v14, %v11242_v48 }
 0x28f   :  { %v1682_v16 = vsel %vm1547_vm12, %v1368_v61, 0.0  ;;  %vm1541_vm13 = vcmp.gt.f32.partialorder %v1360_v42, 1e-06  ;;  %v1223_v9 = vadd.f32 %v1222_v8, %v11111_v26  ;;  %v1224_v17 = vpop.f32.mrb[66].mxu0  ;;  %v11297_v28 = vpack.c.bf16 %v11292_v4, %v1832_v57 }
 0x290   :  { %vm1611_vm14 = vcmp.gt.f32.partialorder %v1221_v22, 1e-06  ;;  %v1676_v35 = vsel %vm1541_vm13, %v1360_v42, 0.0  ;;  %v1226_v50 = vpop.f32.mrb[67].mxu0  ;;  %v1225_v39 = vadd.f32 %v1224_v17, %v11107_v11  ;;  %vm1550_vm0 = vcmp.gt.f32.partialorder %v1371_v52, 1e-06 }
 0x291   :  { %v1746_v36 = vsel %vm1611_vm14, %v1221_v22, 0.0  ;;  %v1838_v33 = vmax.f32 %v1793_v24, %v1676_v35  ;;  %vm1612_vm15 = vcmp.gt.f32.partialorder %v1223_v9, 1e-06  ;;  %v1363_v38 = vadd.f32 %v1362_v55, %v11242_v48 }
 0x292   :  { %v1860_v10 = vmax.f32 %v1815_v7, %v1746_v36  ;;  %v1747_v6 = vsel %vm1612_vm15, %v1223_v9, 0.0  ;;  %v1685_v56 = vsel %vm1550_vm0, %v1371_v52, 0.0  ;;  %vm1614_vm1 = vcmp.gt.f32.partialorder %v1225_v39, 1e-06 }
 0x293   :  { %v11302_v47 = vmax.f32 %v1816_v12, %v1747_v6  ;;  %v1227_v57 = vadd.f32 %v1226_v50, %v11111_v26  ;;  %v8220_v46 = vpop.f32.mrb[20].mxu1  ;;  %v1749_v31 = vsel %vm1614_vm1, %v1225_v39, 0.0  ;;  %vm1544_vm2 = vcmp.gt.f32.partialorder %v1363_v38, 1e-06 }
 0x294   :  { %v11306_v53 = vpack.c.bf16 %v1860_v10, %v11261_v54  ;;  %v1384_v1 = vadd.f32 %v8220_v46, %v11242_v48  ;;  %v1375_v32 = vpop.f32.mrb[21].mxu1  ;;  %v1679_v7 = vsel %vm1544_vm2, %v1363_v38, 0.0  ;;  %vm1647_vm2 = vcmp.gt.f32.partialorder %v11276_v34, 1e-06 }
 0x295   :  { %v11311_v24 = vpack.c.bf16 %v11302_v47, %v11269_v58  ;;  %vm1615_vm3 = vcmp.gt.f32.partialorder %v1227_v57, 1e-06  ;;  %v1230_v61 = vpop.f32.mrb[68].mxu0  ;;  %v1376_v27 = vadd.f32 %v1375_v32, %v11242_v48  ;;  %v8221_v43 = vpop.f32.mrb[22].mxu1  ;;  %v1796_v63 = vmax.f32 %v1679_v7, %v1682_v16 }
 0x296   :  { %v1750_v59 = vsel %vm1615_vm3, %v1227_v57, 0.0  ;;  %vm1559_vm4 = vcmp.gt.f32.partialorder %v1384_v1, 1e-06  ;;  %v1231_v54 = vadd.f32 %v1230_v61, %v11107_v11  ;;  %v1232_v42 = vpop.f32.mrb[69].mxu0  ;;  %v1378_v14 = vpop.f32.mrb[23].mxu1  ;;  %v1387_v58 = vadd.f32 %v8221_v43, %v11242_v48 }
 0x297   :  { %v1694_v3 = vsel %vm1559_vm4, %v1384_v1, 0.0  ;;  %vm1553_vm5 = vcmp.gt.f32.partialorder %v1376_v27, 1e-06  ;;  %v1233_v22 = vadd.f32 %v1232_v42, %v11111_v26  ;;  %v1234_v8 = vpop.f32.mrb[70].mxu0  ;;  %v11317_v55 = vmax.f32 %v1796_v63, %v1685_v56 }
 0x298   :  { %vm1617_vm6 = vcmp.gt.f32.partialorder %v1231_v54, 1e-06  ;;  %v1688_v12 = vsel %vm1553_vm5, %v1376_v27, 0.0  ;;  %v1235_v9 = vadd.f32 %v1234_v8, %v11107_v11  ;;  %v1236_v16 = vpop.f32.mrb[71].mxu0  ;;  %vm1562_vm8 = vcmp.gt.f32.partialorder %v1387_v58, 1e-06 }
 0x299   :  { %v1752_v17 = vsel %vm1617_vm6, %v1231_v54, 0.0  ;;  %vm1618_vm7 = vcmp.gt.f32.partialorder %v1233_v22, 1e-06  ;;  %v1379_v35 = vadd.f32 %v1378_v14, %v11242_v48  ;;  %v1697_v36 = vsel %vm1562_vm8, %v1387_v58, 0.0 }
 0x29a   :  { %v1818_v52 = vmax.f32 %v1749_v31, %v1752_v17  ;;  %v1753_v50 = vsel %vm1618_vm7, %v1233_v22, 0.0  ;;  %vm1620_vm9 = vcmp.gt.f32.partialorder %v1235_v9, 1e-06  ;;  %v1237_v38 = vadd.f32 %v1236_v16, %v11111_v26 }
 0x29b   :  { %v1819_v39 = vmax.f32 %v1750_v59, %v1753_v50  ;;  %v1755_v6 = vsel %vm1620_vm9, %v1235_v9, 0.0  ;;  %vm1556_vm10 = vcmp.gt.f32.partialorder %v1379_v35, 1e-06  ;;  %v8224_v56 = vpop.f32.mrb[24].mxu1  ;;  %v11326_v7 = vpack.c.bf16 %v11317_v55, %v1838_v33 }
 0x29c   :  { %v11322_v57 = vmax.f32 %v1818_v52, %v1755_v6  ;;  %v1691_v46 = vsel %vm1556_vm10, %v1379_v35, 0.0  ;;  %v1400_v1 = vadd.f32 %v8224_v56, %v11242_v48  ;;  %v1391_v32 = vpop.f32.mrb[25].mxu1  ;;  %vm1621_vm11 = vcmp.gt.f32.partialorder %v1237_v38, 1e-06 }
 0x29d   :  { %v1799_v61 = vmax.f32 %v1688_v12, %v1691_v46  ;;  %v1392_v31 = vadd.f32 %v1391_v32, %v11242_v48  ;;  %v8225_v27 = vpop.f32.mrb[26].mxu1  ;;  %v1240_v43 = vpop.f32.mrb[72].mxu0  ;;  %v11330_v63 = vpack.c.bf16 %v1838_v33, %v11292_v4  ;;  %v1756_v54 = vsel %vm1621_vm11, %v1237_v38, 0.0 }
 0x29e   :  { %v11333_v59 = vpack.c.bf16 %v11322_v57, %v1860_v10  ;;  %vm1571_vm12 = vcmp.gt.f32.partialorder %v1400_v1, 1e-06  ;;  %v1403_v42 = vadd.f32 %v8225_v27, %v11242_v48  ;;  %v1394_v14 = vpop.f32.mrb[27].mxu1  ;;  %v1242_v22 = vpop.f32.mrb[73].mxu0  ;;  %v11336_v8 = vmax.f32 %v1819_v39, %v1756_v54 }
 0x29f   :  { %v1844_v58 = vmax.f32 %v1799_v61, %v1694_v3  ;;  %v1706_v12 = vsel %vm1571_vm12, %v1400_v1, 0.0  ;;  %vm1565_vm13 = vcmp.gt.f32.partialorder %v1392_v31, 1e-06  ;;  %v1244_v9 = vpop.f32.mrb[74].mxu0  ;;  %v1395_v4 = vadd.f32 %v1394_v14, %v11242_v48 }
 0x2a0   :  { %v1700_v16 = vsel %vm1565_vm13, %v1392_v31, 0.0  ;;  %vm1574_vm14 = vcmp.gt.f32.partialorder %v1403_v42, 1e-06  ;;  %v1241_v33 = vadd.f32 %v1240_v43, %v11107_v11  ;;  %v1246_v10 = vpop.f32.mrb[75].mxu0  ;;  %v11342_v17 = vpack.c.bf16 %v11336_v8, %v11302_v47 }
 0x2a1   :  { %v1802_v35 = vmax.f32 %v1697_v36, %v1700_v16  ;;  %v1709_v52 = vsel %vm1574_vm14, %v1403_v42, 0.0  ;;  %v1243_v3 = vadd.f32 %v1242_v22, %v11111_v26  ;;  %vm1568_vm15 = vcmp.gt.f32.partialorder %v1395_v4, 1e-06 }
 0x2a2   :  { %v1805_v50 = vmax.f32 %v1706_v12, %v1709_v52  ;;  %vm1623_vm0 = vcmp.gt.f32.partialorder %v1241_v33, 1e-06  ;;  %v1245_v39 = vadd.f32 %v1244_v9, %v11107_v11  ;;  %v1703_v6 = vsel %vm1568_vm15, %v1395_v4, 0.0  ;;  %4325 = vmatprep.mubr.bf16.mxu1 %v11342_v17  ;;  %4883 = vmatprep.mubr.bf16.mxu0 %v11342_v17  ;;  %v9239_v52 = vld [vmem:[#allocation7 + $0x400] ss:$16 sps:$4 sm:$0xff]  }
 0x2a3   :  { %v1758_v38 = vsel %vm1623_vm0, %v1241_v33, 0.0  ;;  %vm1624_vm1 = vcmp.gt.f32.partialorder %v1243_v3, 1e-06  ;;  %v1247_v56 = vadd.f32 %v1246_v10, %v11111_v26  ;;  %v8228_v47 = vpop.f32.mrb[28].mxu1  ;;  %v1847_v36 = vmax.f32 %v1802_v35, %v1703_v6  ;;  %4326 = vmatmul.mubr.bf16.gmra.mrb[76].mxu1 %v11333_v59  ;;  %4884 = vmatmul.mubr.bf16.gmra.mrb[108].mxu0 %v11333_v59 }
 0x2a4   :  { %v1759_v46 = vsel %vm1624_vm1, %v1243_v3, 0.0  ;;  %vm1626_vm3 = vcmp.gt.f32.partialorder %v1245_v39, 1e-06  ;;  %v1407_v1 = vpop.f32.mrb[29].mxu1  ;;  %4368 = vmatprep.mubr.bf16.mxu1 %v11140_v29  ;;  %4926 = vmatprep.mubr.bf16.mxu0 %v11140_v29  ;;  %v11356_v43 = vpack.c.bf16 %v1844_v58, %v11317_v55  ;;  %v1416_v22 = vadd.f32 %v8228_v47, %v11242_v48  ;;  %v9242_v3 = vld [vmem:[#allocation7 + $0x408] ss:$16 sps:$4 sm:$0xff]  }
 0x2a5   :  { %v1761_v32 = vsel %vm1626_vm3, %v1245_v39, 0.0  ;;  %vm1627_vm4 = vcmp.gt.f32.partialorder %v1247_v56, 1e-06  ;;  %v1250_v61 = vpop.f32.mrb[76].mxu0  ;;  %v1408_v31 = vadd.f32 %v1407_v1, %v11242_v48  ;;  %v8229_v27 = vpop.f32.mrb[30].mxu1  ;;  %v11358_v54 = vpack.c.bf16 %v1847_v36, %v1844_v58 }
 0x2a6   :  { %v1821_v42 = vmax.f32 %v1758_v38, %v1761_v32  ;;  %v1762_v14 = vsel %vm1627_vm4, %v1247_v56, 0.0  ;;  %v1252_v12 = vpop.f32.mrb[77].mxu0  ;;  %v1410_v9 = vpop.f32.mrb[31].mxu1  ;;  %v11363_v16 = vadd.f32 %v11218_v23, %v11111_v26  ;;  %v1251_v4 = vadd.f32 %v1250_v61, %v11107_v11  ;;  %v9247_v38 = vld [vmem:[#allocation7 + $0x424] ss:$16 sps:$4 sm:$0xff]  }
 0x2a7   :  { %v1822_v29 = vmax.f32 %v1759_v46, %v1762_v14  ;;  %vm1577_vm5 = vcmp.gt.f32.partialorder %v1408_v31, 1e-06  ;;  %v1254_v33 = vpop.f32.mrb[78].mxu0  ;;  %v1253_v55 = vadd.f32 %v1252_v12, %v11111_v26  ;;  %v1419_v58 = vadd.f32 %v8229_v27, %v11242_v48  ;;  %v9250_v56 = vld [vmem:[#allocation7 + $0x42c] ss:$16 sps:$4 sm:$0xff]  }
 0x2a8   :  { %v1712_v10 = vsel %vm1577_vm5, %v1408_v31, 0.0  ;;  %v1411_v35 = vadd.f32 %v1410_v9, %v11242_v48  ;;  %v1256_v39 = vpop.f32.mrb[79].mxu0  ;;  %v11372_v23 = vsel %vm1647_vm2, %v11276_v34, 0.0  ;;  %vm1629_vm6 = vcmp.gt.f32.partialorder %v1251_v4, 1e-06 }
 0x2a9   :  { %v11374_v6 = vmax.f32 %v1805_v50, %v1712_v10  ;;  %v1255_v47 = vadd.f32 %v1254_v33, %v11107_v11  ;;  %vm1583_vm7 = vcmp.gt.f32.partialorder %v1416_v22, 1e-06  ;;  %v1764_v46 = vsel %vm1629_vm6, %v1251_v4, 0.0  ;;  %v9245_v27 = vld [vmem:[#allocation7 + $0x420] ss:$16 sps:$4 sm:$0xff]  }
 0x2aa   :  { %vm1630_vm8 = vcmp.gt.f32.partialorder %v1253_v55, 1e-06  ;;  %v1257_v1 = vadd.f32 %v1256_v39, %v11111_v26  ;;  %v11378_v32 = vmax.f32 %v1821_v42, %v1764_v46  ;;  %vm1586_vm9 = vcmp.gt.f32.partialorder %v1419_v58, 1e-06  ;;  %v9248_v50 = vld [vmem:[#allocation7 + $0x428] ss:$16 sps:$4 sm:$0xff]  }
 0x2ab   :  { %v11381_v61 = vpack.c.bf16 %v11374_v6, %v1847_v36  ;;  %v1765_v31 = vsel %vm1630_vm8, %v1253_v55, 0.0  ;;  %v8232_v34 = vpop.f32.mrb[32].mxu1  ;;  %vm1580_vm10 = vcmp.gt.f32.partialorder %v1411_v35, 1e-06  ;;  %4369 = vmatmul.mubr.bf16.vlgmr.msra.gmra.mrb[56].mxu1 %v11297_v28  ;;  %4927 = vmatmul.mubr.bf16.vlgmr.msra.gmra.mrb[88].mxu0 %v11297_v28  ;;  %vm1632_vm11 = vcmp.gt.f32.partialorder %v1255_v47, 1e-06 }
 0x2ac   :  { %v11383_v14 = vmax.f32 %v1822_v29, %v1765_v31  ;;  %v1432_v12 = vadd.f32 %v8232_v34, %v11242_v48  ;;  %v1423_v9 = vpop.f32.mrb[33].mxu1  ;;  %v1718_v42 = vsel %vm1583_vm7, %v1416_v22, 0.0  ;;  %v11391_v36 = vpack.c.bf16 %v11378_v32, %v11322_v57  ;;  %4430 = vmatpush1.bf16.msra.mxu1 %v9239_v52  ;;  %4988 = vmatpush1.bf16.msra.mxu0 %v9242_v3  ;;  %v9253_v55 = vld [vmem:[#allocation7 + $0x444] ss:$16 sps:$4 sm:$0xff]  }
 0x2ad   :  { %v1715_v4 = vsel %vm1580_vm10, %v1411_v35, 0.0  ;;  %v1424_v29 = vadd.f32 %v1423_v9, %v11242_v48  ;;  %v8233_v33 = vpop.f32.mrb[34].mxu1  ;;  %v1260_v10 = vpop.f32.mrb[80].mxu0  ;;  %v1721_v39 = vsel %vm1586_vm9, %v1419_v58, 0.0  ;;  %4378 = vmatprep.mubr.bf16.mxu1 %v11174_v45  ;;  %4936 = vmatprep.mubr.bf16.mxu0 %v11174_v45  ;;  %v9256_v35 = vld [vmem:[#allocation7 + $0x44c] ss:$16 sps:$4 sm:$0xff]  }
 0x2ae   :  { %v11396_v28 = vpack.c.bf16 %v11383_v14, %v11336_v8  ;;  %v1808_v46 = vmax.f32 %v1715_v4, %v1718_v42  ;;  %v11402_v57 = vadd.f32 %v8233_v33, %v11242_v48  ;;  %v1426_v22 = vpop.f32.mrb[35].mxu1  ;;  %v1262_v52 = vpop.f32.mrb[81].mxu0  ;;  %4431 = vmatprep.subr.bf16.mxu1 %v9247_v38  ;;  %4989 = vmatprep.subr.bf16.mxu0 %v9250_v56  ;;  %v1767_v3 = vsel %vm1632_vm11, %v1255_v47, 0.0  ;;  %v9251_v58 = vld [vmem:[#allocation7 + $0x440] ss:$16 sps:$4 sm:$0xff]  }
 0x2af   :  { %vm1589_vm12 = vcmp.gt.f32.partialorder %v1424_v29, 1e-06  ;;  %v1427_v8 = vadd.f32 %v1426_v22, %v11242_v48  ;;  %vm1633_vm13 = vcmp.gt.f32.partialorder %v1257_v1, 1e-06  ;;  %v1264_v31 = vpop.f32.mrb[82].mxu0  ;;  %v1261_v38 = vadd.f32 %v1260_v10, %v11107_v11 }
 0x2b0   :  { %v11406_v34 = vmax.f32 %v1808_v46, %v1721_v39  ;;  %vm1595_vm14 = vcmp.gt.f32.partialorder %v1432_v12, 1e-06  ;;  %v1724_v9 = vsel %vm1589_vm12, %v1424_v29, 0.0  ;;  %vm1598_vm15 = vcmp.gt.f32.partialorder %v11402_v57, 1e-06  ;;  %v1266_v42 = vpop.f32.mrb[83].mxu0  ;;  %4432 = vmatpush1.bf16.msra.mxu1 %v9245_v27  ;;  %4990 = vmatpush1.bf16.msra.mxu0 %v9248_v50 }
 0x2b1   :  { %vm1592_vm0 = vcmp.gt.f32.partialorder %v1427_v8, 1e-06  ;;  %v1768_v4 = vsel %vm1633_vm13, %v1257_v1, 0.0  ;;  %v9254_v56 = vld [vmem:[#allocation7 + $0x448] ss:$16 sps:$4 sm:$0xff]   ;;  %v1263_v47 = vadd.f32 %v1262_v52, %v11111_v26  ;;  %4433 = vmatprep.subr.bf16.mxu1 %v9253_v55  ;;  %4991 = vmatprep.subr.bf16.mxu0 %v9256_v35  ;;  %v1265_v39 = vadd.f32 %v1264_v31, %v11107_v11 }
 0x2b2   :  { %v1727_v33 = vsel %vm1592_vm0, %v1427_v8, 0.0  ;;  %v1267_v46 = vadd.f32 %v1266_v42, %v11111_v26  ;;  %v9259_v29 = vld [vmem:[#allocation7 + $0x464] ss:$16 sps:$4 sm:$0xff]   ;;  %v9262_v22 = vld [vmem:[#allocation7 + $0x46c] ss:$16 sps:$4 sm:$0xff]   ;;  %v11415_v27 = vpack.c.bf16 %v11406_v34, %v11374_v6  ;;  %v1730_v1 = vsel %vm1595_vm14, %v1432_v12, 0.0 }
 0x2b3   :  { %vm1648_vm1 = vcmp.gt.f32.partialorder %v11363_v16, 1e-06  ;;  %v1811_v50 = vmax.f32 %v1724_v9, %v1727_v33  ;;  %vm1635_vm2 = vcmp.gt.f32.partialorder %v1261_v38, 1e-06  ;;  %vm1636_vm3 = vcmp.gt.f32.partialorder %v1263_v47, 1e-06  ;;  %4379 = vmatmul.mubr.bf16.gmra.mrb[60].mxu1 %v11326_v7  ;;  %4937 = vmatmul.mubr.bf16.gmra.mrb[92].mxu0 %v11326_v7 }
 0x2b4   :  { %v8236_v10 = vpop.f32.mrb[36].mxu1  ;;  %v9257_v55 = vld [vmem:[#allocation7 + $0x460] ss:$16 sps:$4 sm:$0xff]   ;;  %v9260_v35 = vld [vmem:[#allocation7 + $0x468] ss:$16 sps:$4 sm:$0xff]   ;;  %v1770_v52 = vsel %vm1635_vm2, %v1261_v38, 0.0  ;;  %4434 = vmatpush1.bf16.msra.mxu1 %v9251_v58  ;;  %4992 = vmatpush1.bf16.msra.mxu0 %v9254_v56 }
 0x2b5   :  { %v1771_v8 = vsel %vm1636_vm3, %v1263_v47, 0.0  ;;  %vm1638_vm4 = vcmp.gt.f32.partialorder %v1265_v39, 1e-06  ;;  %vm1639_vm5 = vcmp.gt.f32.partialorder %v1267_v46, 1e-06  ;;  %v11421_v6 = vmax.f32 %v1811_v50, %v1730_v1  ;;  %v1270_v9 = vpop.f32.mrb[84].mxu0  ;;  %4388 = vmatprep.mubr.bf16.mxu1 %v11208_v40  ;;  %4946 = vmatprep.mubr.bf16.mxu0 %v11208_v40 }
 0x2b6   :  { %v1824_v31 = vmax.f32 %v1767_v3, %v1770_v52  ;;  %v1825_v42 = vmax.f32 %v1768_v4, %v1771_v8  ;;  %v1773_v12 = vsel %vm1638_vm4, %v1265_v39, 0.0  ;;  %v1439_v33 = vpop.f32.mrb[37].mxu1  ;;  %v1774_v38 = vsel %vm1639_vm5, %v1267_v46, 0.0  ;;  %v1272_v50 = vpop.f32.mrb[85].mxu0  ;;  %v9268_v4 = vld [vmem:[#allocation7 + $0x48c] ss:$16 sps:$4 sm:$0xff]   ;;  %4435 = vmatprep.subr.bf16.mxu1 %v9259_v29  ;;  %4993 = vmatprep.subr.bf16.mxu0 %v9262_v22 }
 0x2b7   :  { %v1448_v47 = vadd.f32 %v8236_v10, %v11242_v48  ;;  %v1271_v25 = vadd.f32 %v1270_v9, %v11107_v11  ;;  %v1440_v1 = vadd.f32 %v1439_v33, %v11242_v48  ;;  %v8237_v3 = vpop.f32.mrb[38].mxu1  ;;  %v1733_v58 = vsel %vm1598_vm15, %v11402_v57, 0.0  ;;  %v1274_v10 = vpop.f32.mrb[86].mxu0  ;;  %v9263_v8 = vld [vmem:[#allocation7 + $0x480] ss:$16 sps:$4 sm:$0xff]  }
 0x2b8   :  { %v11431_v56 = vmax.f32 %v1824_v31, %v1773_v12  ;;  %v11433_v39 = vmax.f32 %v1825_v42, %v1774_v38  ;;  %v1273_v46 = vadd.f32 %v1272_v50, %v11111_v26  ;;  %v1442_v52 = vpop.f32.mrb[39].mxu1  ;;  %v9266_v9 = vld [vmem:[#allocation7 + $0x488] ss:$16 sps:$4 sm:$0xff]   ;;  %v1451_v33 = vadd.f32 %v8237_v3, %v11242_v48  ;;  %4436 = vmatpush1.bf16.msra.mxu1 %v9257_v55  ;;  %v1276_v31 = vpop.f32.mrb[87].mxu0  ;;  %v9271_v29 = vld [vmem:[#allocation7 + $0x4a4] ss:$16 sps:$4 sm:$0xff]  }
 0x2b9   :  { %vm1607_vm6 = vcmp.gt.f32.partialorder %v1448_v47, 1e-06  ;;  %vm1641_vm7 = vcmp.gt.f32.partialorder %v1271_v25, 1e-06  ;;  %vm1601_vm8 = vcmp.gt.f32.partialorder %v1440_v1, 1e-06  ;;  %4994 = vmatpush1.bf16.msra.mxu0 %v9260_v35  ;;  %v1275_v12 = vadd.f32 %v1274_v10, %v11107_v11  ;;  %4437 = vmatprep.subr.bf16.mxu1 %v9265_v0 }
 0x2ba   :  { %v1742_v60 = vsel %vm1607_vm6, %v1448_v47, 0.0  ;;  %v1776_v49 = vsel %vm1641_vm7, %v1271_v25, 0.0  ;;  %v1736_v57 = vsel %vm1601_vm8, %v1440_v1, 0.0  ;;  %vm1642_vm9 = vcmp.gt.f32.partialorder %v1273_v46, 1e-06  ;;  %4995 = vmatprep.subr.bf16.mxu0 %v9268_v4 }
 0x2bb   :  { %v1814_v22 = vmax.f32 %v1733_v58, %v1736_v57  ;;  %v1777_v42 = vsel %vm1642_vm9, %v1273_v46, 0.0  ;;  %vm1610_vm10 = vcmp.gt.f32.partialorder %v1451_v33, 1e-06  ;;  %v9274_v38 = vld [vmem:[#allocation7 + $0x4ac] ss:$16 sps:$4 sm:$0xff]   ;;  %v1443_v5 = vadd.f32 %v1442_v52, %v11242_v48  ;;  %v8240_v25 = vpop.f32.mrb[40].mxu1  ;;  %4389 = vmatmul.mubr.bf16.gmra.mrb[64].mxu1 %v11358_v54  ;;  %4947 = vmatmul.mubr.bf16.gmra.mrb[96].mxu0 %v11358_v54 }
 0x2bc   :  { %v1745_v50 = vsel %vm1610_vm10, %v1451_v33, 0.0  ;;  %v1277_v47 = vadd.f32 %v1276_v31, %v11111_v26  ;;  %v9269_v1 = vld [vmem:[#allocation7 + $0x4a0] ss:$16 sps:$4 sm:$0xff]   ;;  %v9272_v3 = vld [vmem:[#allocation7 + $0x4a8] ss:$16 sps:$4 sm:$0xff]   ;;  %v11442_v55 = vpack.c.bf16 %v11421_v6, %v11406_v34  ;;  %v1464_v0 = vadd.f32 %v8240_v25, %v11242_v48  ;;  %v1455_v11 = vpop.f32.mrb[41].mxu1  ;;  %4438 = vmatpush1.bf16.msra.mxu1 %v9263_v8  ;;  %4398 = vmatprep.mubr.bf16.mxu1 %v11247_v30 }
 0x2bd   :  { %v1817_v35 = vmax.f32 %v1742_v60, %v1745_v50  ;;  %vm1644_vm11 = vcmp.gt.f32.partialorder %v1275_v12, 1e-06  ;;  %v9277_v4 = vld [vmem:[#allocation7 + $0x4c4] ss:$16 sps:$4 sm:$0xff]   ;;  %v11449_v26 = vpack.c.bf16 %v11433_v39, %v11383_v14  ;;  %vm1604_vm12 = vcmp.gt.f32.partialorder %v1443_v5, 1e-06  ;;  %4996 = vmatpush1.bf16.msra.mxu0 %v9266_v9  ;;  %4956 = vmatprep.mubr.bf16.mxu0 %v11247_v30 }
 0x2be   :  { %v1779_v58 = vsel %vm1644_vm11, %v1275_v12, 0.0  ;;  %vm1645_vm13 = vcmp.gt.f32.partialorder %v1277_v47, 1e-06  ;;  %v1456_v60 = vadd.f32 %v1455_v11, %v11242_v48  ;;  %v8241_v34 = vpop.f32.mrb[42].mxu1  ;;  %v1783_v46 = vsel %vm1648_vm1, %v11363_v16, 0.0  ;;  %4439 = vmatprep.subr.bf16.mxu1 %v9271_v29  ;;  %4997 = vmatprep.subr.bf16.mxu0 %v9274_v38 }
 0x2bf   :  { %v1827_v10 = vmax.f32 %v1776_v49, %v1779_v58  ;;  %v1739_v52 = vsel %vm1604_vm12, %v1443_v5, 0.0  ;;  %v1780_v33 = vsel %vm1645_vm13, %v1277_v47, 0.0  ;;  %v1458_v14 = vpop.f32.mrb[43].mxu1  ;;  %v9280_v57 = vld [vmem:[#allocation7 + $0x4cc] ss:$16 sps:$4 sm:$0xff]   ;;  %v1467_v16 = vadd.f32 %v8241_v34, %v11242_v48 }
 0x2c0   :  { %v1859_v31 = vmax.f32 %v1814_v22, %v1739_v52  ;;  %v1828_v12 = vmax.f32 %v1777_v42, %v1780_v33  ;;  %vm1619_vm14 = vcmp.gt.f32.partialorder %v1464_v0, 1e-06  ;;  %vm1613_vm15 = vcmp.gt.f32.partialorder %v1456_v60, 1e-06  ;;  %4440 = vmatpush1.bf16.msra.mxu1 %v9269_v1  ;;  %v9275_v22 = vld [vmem:[#allocation7 + $0x4c0] ss:$16 sps:$4 sm:$0xff]  }
 0x2c1   :  { %v1872_v8 = vmax.f32 %v1827_v10, %v11372_v23  ;;  %v1748_v9 = vsel %vm1613_vm15, %v1456_v60, 0.0  ;;  %v1459_v5 = vadd.f32 %v1458_v14, %v11242_v48  ;;  %4998 = vmatpush1.bf16.msra.mxu0 %v9272_v3  ;;  %v9278_v42 = vld [vmem:[#allocation7 + $0x4c8] ss:$16 sps:$4 sm:$0xff]   ;;  %vm1622_vm0 = vcmp.gt.f32.partialorder %v1467_v16, 1e-06  ;;  %4441 = vmatprep.subr.bf16.mxu1 %v9277_v4 }
 0x2c2   :  { %v11461_v49 = vpack.c.bf16 %v1859_v31, %v11421_v6  ;;  %v1873_v50 = vmax.f32 %v1828_v12, %v1783_v46  ;;  %v1862_v47 = vmax.f32 %v1817_v35, %v1748_v9  ;;  %4999 = vmatprep.subr.bf16.mxu0 %v9280_v57  ;;  %v9283_v29 = vld [vmem:[#allocation7 + $0x4e4] ss:$16 sps:$4 sm:$0xff]   ;;  %v11465_v23 = vpack.c.bf16 %v11431_v56, %v11378_v32  ;;  %v9286_v35 = vld [vmem:[#allocation7 + $0x4ec] ss:$16 sps:$4 sm:$0xff]   ;;  %v9281_v60 = vld [vmem:[#allocation7 + $0x4e0] ss:$16 sps:$4 sm:$0xff]  }
 0x2c3   :  { %vm1616_vm1 = vcmp.gt.f32.partialorder %v1459_v5, 1e-06  ;;  %v11468_v38 = vpack.c.bf16 %v1872_v8, %v11431_v56  ;;  %v1754_v6 = vsel %vm1619_vm14, %v1464_v0, 0.0  ;;  %v8244_v3 = vpop.f32.mrb[44].mxu1  ;;  %4399 = vmatmul.mubr.bf16.gmra.mrb[68].mxu1 %v11415_v27  ;;  %4957 = vmatmul.mubr.bf16.gmra.mrb[100].mxu0 %v11415_v27  ;;  %v1757_v56 = vsel %vm1622_vm0, %v1467_v16, 0.0 }
 0x2c4   :  { %v11471_v25 = vpack.c.bf16 %v1862_v47, %v1859_v31  ;;  %v1751_v1 = vsel %vm1616_vm1, %v1459_v5, 0.0  ;;  %v11474_v11 = vpack.c.bf16 %v1873_v50, %v11433_v39  ;;  %v1480_v32 = vadd.f32 %v8244_v3, %v11242_v48  ;;  %v1471_v58 = vpop.f32.mrb[45].mxu1  ;;  %4442 = vmatpush1.bf16.msra.mxu1 %v9275_v22  ;;  %v9284_v34 = vld [vmem:[#allocation7 + $0x4e8] ss:$16 sps:$4 sm:$0xff]   ;;  %4408 = vmatprep.mubr.bf16.mxu1 %v11306_v53  ;;  %v9289_v52 = vld [vmem:[#allocation7 + $0x504] ss:$16 sps:$4 sm:$0xff]  }
 0x2c5   :  { %v1820_v4 = vmax.f32 %v1751_v1, %v1754_v6  ;;  %5000 = vmatpush1.bf16.msra.mxu0 %v9278_v42  ;;  %v1472_v0 = vadd.f32 %v1471_v58, %v11242_v48  ;;  %v8245_v46 = vpop.f32.mrb[46].mxu1  ;;  %4966 = vmatprep.mubr.bf16.mxu0 %v11306_v53  ;;  %v9292_v33 = vld [vmem:[#allocation7 + $0x50c] ss:$16 sps:$4 sm:$0xff]   ;;  %v9287_v8 = vld [vmem:[#allocation7 + $0x500] ss:$16 sps:$4 sm:$0xff]  }
 0x2c6   :  { %v1474_v39 = vpop.f32.mrb[47].mxu1  ;;  %vm1631_vm2 = vcmp.gt.f32.partialorder %v1480_v32, 1e-06  ;;  %4443 = vmatprep.subr.bf16.mxu1 %v9283_v29  ;;  %5001 = vmatprep.subr.bf16.mxu0 %v9286_v35  ;;  %v1483_v14 = vadd.f32 %v8245_v46, %v11242_v48  ;;  %v9290_v9 = vld [vmem:[#allocation7 + $0x508] ss:$16 sps:$4 sm:$0xff]  }
 0x2c7   :  { %v1865_v10 = vmax.f32 %v1820_v4, %v1757_v56  ;;  %vm1625_vm3 = vcmp.gt.f32.partialorder %v1472_v0, 1e-06  ;;  %v1475_v57 = vadd.f32 %v1474_v39, %v11242_v48  ;;  %v1766_v16 = vsel %vm1631_vm2, %v1480_v32, 0.0  ;;  %v9295_v50 = vld [vmem:[#allocation7 + $0x524] ss:$16 sps:$4 sm:$0xff]  }
 0x2c8   :  { %v1760_v31 = vsel %vm1625_vm3, %v1472_v0, 0.0  ;;  %4444 = vmatpush1.bf16.msra.mxu1 %v9281_v60  ;;  %vm1634_vm5 = vcmp.gt.f32.partialorder %v1483_v14, 1e-06  ;;  %v9298_v42 = vld [vmem:[#allocation7 + $0x52c] ss:$16 sps:$4 sm:$0xff]  }
 0x2c9   :  { %v11485_v12 = vpack.c.bf16 %v1865_v10, %v1862_v47  ;;  %5002 = vmatpush1.bf16.msra.mxu0 %v9284_v34  ;;  %vm1628_vm4 = vcmp.gt.f32.partialorder %v1475_v57, 1e-06  ;;  %4445 = vmatprep.subr.bf16.mxu1 %v9289_v52  ;;  %v9293_v47 = vld [vmem:[#allocation7 + $0x520] ss:$16 sps:$4 sm:$0xff]   ;;  %v9296_v35 = vld [vmem:[#allocation7 + $0x528] ss:$16 sps:$4 sm:$0xff]  }
 0x2ca   :  { %v1763_v5 = vsel %vm1628_vm4, %v1475_v57, 0.0  ;;  %5003 = vmatprep.subr.bf16.mxu0 %v9292_v33  ;;  %v9301_v32 = vld [vmem:[#allocation7 + $0x544] ss:$16 sps:$4 sm:$0xff]   ;;  %v1769_v56 = vsel %vm1634_vm5, %v1483_v14, 0.0  ;;  %v9304_v0 = vld [vmem:[#allocation7 + $0x54c] ss:$16 sps:$4 sm:$0xff]  }
 0x2cb   :  { %v1823_v22 = vmax.f32 %v1760_v31, %v1763_v5  ;;  %v8248_v29 = vpop.f32.mrb[48].mxu1  ;;  %4409 = vmatmul.mubr.bf16.gmra.mrb[72].mxu1 %v11461_v49  ;;  %4967 = vmatmul.mubr.bf16.gmra.mrb[104].mxu0 %v11461_v49  ;;  %v9299_v57 = vld [vmem:[#allocation7 + $0x540] ss:$16 sps:$4 sm:$0xff]   ;;  %v9302_v31 = vld [vmem:[#allocation7 + $0x548] ss:$16 sps:$4 sm:$0xff]  }
 0x2cc   :  { %v1496_v6 = vadd.f32 %v8248_v29, %v11242_v48  ;;  %v1487_v1 = vpop.f32.mrb[49].mxu1  ;;  %4446 = vmatpush1.bf16.msra.mxu1 %v9287_v8  ;;  %4418 = vmatprep.mubr.bf16.mxu1 %v11391_v36 }
 0x2cd   :  { %v1868_v3 = vmax.f32 %v1823_v22, %v1766_v16  ;;  %5004 = vmatpush1.bf16.msra.mxu0 %v9290_v9  ;;  %v1488_v4 = vadd.f32 %v1487_v1, %v11242_v48  ;;  %v8249_v58 = vpop.f32.mrb[50].mxu1  ;;  %4976 = vmatprep.mubr.bf16.mxu0 %v11391_v36  ;;  %v9307_v22 = vld [vmem:[#allocation7 + $0x564] ss:$16 sps:$4 sm:$0xff]  }
 0x2ce   :  { %vm1643_vm6 = vcmp.gt.f32.partialorder %v1496_v6, 1e-06  ;;  %v1499_v60 = vadd.f32 %v8249_v58, %v11242_v48  ;;  %v1490_v34 = vpop.f32.mrb[51].mxu1  ;;  %4447 = vmatprep.subr.bf16.mxu1 %v9295_v50  ;;  %5005 = vmatprep.subr.bf16.mxu0 %v9298_v42  ;;  %v9310_v42 = vld [vmem:[#allocation7 + $0x56c] ss:$16 sps:$4 sm:$0xff]  }
 0x2cf   :  { %v1778_v46 = vsel %vm1643_vm6, %v1496_v6, 0.0  ;;  %vm1637_vm7 = vcmp.gt.f32.partialorder %v1488_v4, 1e-06  ;;  %v1491_v39 = vadd.f32 %v1490_v34, %v11242_v48  ;;  %v11496_v52 = vpack.c.bf16 %v1868_v3, %v1865_v10  ;;  %v9308_v6 = vld [vmem:[#allocation7 + $0x568] ss:$16 sps:$4 sm:$0xff]  }
 0x2d0   :  { %v1772_v33 = vsel %vm1637_vm7, %v1488_v4, 0.0  ;;  %vm1646_vm8 = vcmp.gt.f32.partialorder %v1499_v60, 1e-06  ;;  %4448 = vmatpush1.bf16.msra.mxu1 %v9293_v47  ;;  %v9305_v47 = vld [vmem:[#allocation7 + $0x560] ss:$16 sps:$4 sm:$0xff]  }
 0x2d1   :  { %5006 = vmatpush1.bf16.msra.mxu0 %v9296_v35  ;;  %v1826_v14 = vmax.f32 %v1769_v56, %v1772_v33  ;;  %v1781_v8 = vsel %vm1646_vm8, %v1499_v60, 0.0  ;;  %vm1640_vm9 = vcmp.gt.f32.partialorder %v1491_v39, 1e-06  ;;  %4449 = vmatprep.subr.bf16.mxu1 %v9301_v32  ;;  %v9313_v32 = vld [vmem:[#allocation7 + $0x584] ss:$16 sps:$4 sm:$0xff]  }
 0x2d2   :  { %5007 = vmatprep.subr.bf16.mxu0 %v9304_v0  ;;  %v1829_v9 = vmax.f32 %v1778_v46, %v1781_v8  ;;  %v1775_v16 = vsel %vm1640_vm9, %v1491_v39, 0.0  ;;  %v9316_v58 = vld [vmem:[#allocation7 + $0x58c] ss:$16 sps:$4 sm:$0xff]   ;;  %v9314_v60 = vld [vmem:[#allocation7 + $0x588] ss:$16 sps:$4 sm:$0xff]  }
 0x2d3   :  { %v1871_v5 = vmax.f32 %v1826_v14, %v1775_v16  ;;  %v8252_v50 = vpop.f32.mrb[52].mxu1  ;;  %4419 = vmatmul.mubr.bf16.gmra.mrb[76].mxu1 %v11485_v12  ;;  %4977 = vmatmul.mubr.bf16.gmra.mrb[108].mxu0 %v11485_v12  ;;  %v9322_v34 = vld [vmem:[#allocation7 + $0x5ac] ss:$16 sps:$4 sm:$0xff]   ;;  %v9320_v39 = vld [vmem:[#allocation7 + $0x5a8] ss:$16 sps:$4 sm:$0xff]  }
 0x2d4   :  { %v1503_v10 = vpop.f32.mrb[53].mxu1  ;;  %4450 = vmatpush1.bf16.msra.mxu1 %v9299_v57  ;;  %4461 = vmatprep.mubr.bf16.mxu1 %v11330_v63  ;;  %v9325_v33 = vld [vmem:[#allocation7 + $0x5c4] ss:$16 sps:$4 sm:$0xff]   ;;  %v9328_v57 = vld [vmem:[#allocation7 + $0x5cc] ss:$16 sps:$4 sm:$0xff]  }
 0x2d5   :  { %5008 = vmatpush1.bf16.msra.mxu0 %v9302_v31  ;;  %v1504_v29 = vadd.f32 %v1503_v10, %v11242_v48  ;;  %v8253_v1 = vpop.f32.mrb[54].mxu1  ;;  %v11501_v35 = vpack.c.bf16 %v1871_v5, %v1868_v3  ;;  %5019 = vmatprep.mubr.bf16.mxu0 %v11330_v63  ;;  %v9311_v48 = vld [vmem:[#allocation7 + $0x580] ss:$16 sps:$4 sm:$0xff]   ;;  %v9319_v3 = vld [vmem:[#allocation7 + $0x5a4] ss:$16 sps:$4 sm:$0xff]  }
 0x2d6   :  { %v1506_v4 = vpop.f32.mrb[55].mxu1  ;;  %4451 = vmatprep.subr.bf16.mxu1 %v9307_v22  ;;  %5009 = vmatprep.subr.bf16.mxu0 %v9310_v42  ;;  %v9317_v63 = vld [vmem:[#allocation7 + $0x5a0] ss:$16 sps:$4 sm:$0xff]   ;;  %v9326_v31 = vld [vmem:[#allocation7 + $0x5c8] ss:$16 sps:$4 sm:$0xff]  }
 0x2d7   :  { %vm1649_vm10 = vcmp.gt.f32.partialorder %v1504_v29, 1e-06  ;;  %v9323_v14 = vld [vmem:[#allocation7 + $0x5c0] ss:$16 sps:$4 sm:$0xff]   ;;  %v9331_v8 = vld [vmem:[#allocation7 + $0x5e4] ss:$16 sps:$4 sm:$0xff]  }
 0x2d8   :  { %v1784_v56 = vsel %vm1649_vm10, %v1504_v29, 0.0  ;;  %4452 = vmatpush1.bf16.msra.mxu1 %v9305_v47  ;;  %v9329_v16 = vld [vmem:[#allocation7 + $0x5e0] ss:$16 sps:$4 sm:$0xff]   ;;  %v9337_v50 = vld [vmem:[#allocation7 + $0x604] ss:$16 sps:$4 sm:$0xff]  }
 0x2d9   :  { %v1874_v0 = vmax.f32 %v1829_v9, %v1784_v56  ;;  %5010 = vmatpush1.bf16.msra.mxu0 %v9308_v6  ;;  %4453 = vmatprep.subr.bf16.mxu1 %v9313_v32  ;;  %v9334_v9 = vld [vmem:[#allocation7 + $0x5ec] ss:$16 sps:$4 sm:$0xff]   ;;  %v9335_v42 = vld [vmem:[#allocation7 + $0x600] ss:$16 sps:$4 sm:$0xff]   ;;  %v9338_v10 = vld [vmem:[#allocation7 + $0x608] ss:$16 sps:$4 sm:$0xff]  }
 0x2da   :  { %5011 = vmatprep.subr.bf16.mxu0 %v9316_v58  ;;  %v9340_v22 = vld [vmem:[#allocation7 + $0x60c] ss:$16 sps:$4 sm:$0xff]   ;;  %v9343_v29 = vld [vmem:[#allocation7 + $0x624] ss:$16 sps:$4 sm:$0xff]   ;;  %v9341_v6 = vld [vmem:[#allocation7 + $0x620] ss:$16 sps:$4 sm:$0xff]  }
 0x2db   :  { %v11505_v46 = vpack.c.bf16 %v1874_v0, %v1871_v5  ;;  %v9332_v5 = vld [vmem:[#allocation7 + $0x5e8] ss:$16 sps:$4 sm:$0xff]   ;;  %v9346_v47 = vld [vmem:[#allocation7 + $0x62c] ss:$16 sps:$4 sm:$0xff]   ;;  %v9349_v4 = vld [vmem:[#allocation7 + $0x644] ss:$16 sps:$4 sm:$0xff]  }
 0x2dc   :  { %4454 = vmatpush1.bf16.msra.mxu1 %v9311_v48  ;;  %v9344_v1 = vld [vmem:[#allocation7 + $0x628] ss:$16 sps:$4 sm:$0xff]   ;;  %v9352_v32 = vld [vmem:[#allocation7 + $0x64c] ss:$16 sps:$4 sm:$0xff]   ;;  %v9347_v58 = vld [vmem:[#allocation7 + $0x640] ss:$16 sps:$4 sm:$0xff]  }
 0x2dd   :  { %5012 = vmatpush1.bf16.msra.mxu0 %v9314_v60  ;;  %4455 = vmatprep.subr.bf16.mxu1 %v9319_v3  ;;  %v9350_v56 = vld [vmem:[#allocation7 + $0x648] ss:$16 sps:$4 sm:$0xff]   ;;  %v9355_v0 = vld [vmem:[#allocation7 + $0x664] ss:$16 sps:$4 sm:$0xff]   ;;  %v9353_v48 = vld [vmem:[#allocation7 + $0x660] ss:$16 sps:$4 sm:$0xff]  }
 0x2de   :  { %5013 = vmatprep.subr.bf16.mxu0 %v9322_v34  ;;  %v9356_v60 = vld [vmem:[#allocation7 + $0x668] ss:$16 sps:$4 sm:$0xff]   ;;  %v9361_v3 = vld [vmem:[#allocation7 + $0x684] ss:$16 sps:$4 sm:$0xff]   ;;  %v9364_v34 = vld [vmem:[#allocation7 + $0x68c] ss:$16 sps:$4 sm:$0xff]  }
 0x2e0   :  { %4456 = vmatpush1.bf16.msra.mxu1 %v9317_v63  ;;  %v9359_v63 = vld [vmem:[#allocation7 + $0x680] ss:$16 sps:$4 sm:$0xff]  }
 0x2e1   :  { %5014 = vmatpush1.bf16.msra.mxu0 %v9320_v39  ;;  %4457 = vmatprep.subr.bf16.mxu1 %v9325_v33  ;;  %v9362_v39 = vld [vmem:[#allocation7 + $0x688] ss:$16 sps:$4 sm:$0xff]   ;;  %v9367_v33 = vld [vmem:[#allocation7 + $0x6a4] ss:$16 sps:$4 sm:$0xff]  }
 0x2e2   :  { %5015 = vmatprep.subr.bf16.mxu0 %v9328_v57  ;;  %v9370_v57 = vld [vmem:[#allocation7 + $0x6ac] ss:$16 sps:$4 sm:$0xff]  }
 0x2e4   :  { %4458 = vmatpush1.bf16.msra.mxu1 %v9323_v14  ;;  %v9365_v14 = vld [vmem:[#allocation7 + $0x6a0] ss:$16 sps:$4 sm:$0xff]  }
 0x2e5   :  { %5016 = vmatpush1.bf16.msra.mxu0 %v9326_v31  ;;  %4459 = vmatprep.subr.bf16.mxu1 %v9331_v8  ;;  %v9368_v31 = vld [vmem:[#allocation7 + $0x6a8] ss:$16 sps:$4 sm:$0xff]   ;;  %v9373_v8 = vld [vmem:[#allocation7 + $0x6c4] ss:$16 sps:$4 sm:$0xff]  }
 0x2e6   :  { %5017 = vmatprep.subr.bf16.mxu0 %v9334_v9  ;;  %v9376_v9 = vld [vmem:[#allocation7 + $0x6cc] ss:$16 sps:$4 sm:$0xff]  }
 0x2e8   :  { %4460 = vmatpush1.bf16.msra.mxu1 %v9329_v16  ;;  %v9371_v16 = vld [vmem:[#allocation7 + $0x6c0] ss:$16 sps:$4 sm:$0xff]  }
 0x2e9   :  { %5018 = vmatpush1.bf16.msra.mxu0 %v9332_v5  ;;  %4522 = vmatprep.subr.bf16.mxu1 %v9337_v50  ;;  %v9374_v5 = vld [vmem:[#allocation7 + $0x6c8] ss:$16 sps:$4 sm:$0xff]   ;;  %v9379_v50 = vld [vmem:[#allocation7 + $0x6e4] ss:$16 sps:$4 sm:$0xff]  }
 0x2ea   :  { %5080 = vmatprep.subr.bf16.mxu0 %v9340_v22  ;;  %v9382_v22 = vld [vmem:[#allocation7 + $0x6ec] ss:$16 sps:$4 sm:$0xff]  }
 0x2eb   :  { %4462 = vmatmul.mubr.bf16.vlgmr.msra.gmra.mrb[56].mxu1 %v11143_v15 }
 0x2ec   :  { %5020 = vmatmul.mubr.bf16.vlgmr.msra.gmra.mrb[88].mxu0 %v11143_v15  ;;  %4471 = vmatprep.mubr.bf16.mxu1 %v11356_v43  ;;  %v9358_v15 = vld [vmem:[#allocation7 + $0x66c] ss:$16 sps:$4 sm:$0xff]  }
 0x2ed   :  { %4523 = vmatpush1.bf16.msra.mxu1 %v9335_v42  ;;  %5029 = vmatprep.mubr.bf16.mxu0 %v11356_v43  ;;  %v9377_v42 = vld [vmem:[#allocation7 + $0x6e0] ss:$16 sps:$4 sm:$0xff]  }
 0x2ee   :  { %5081 = vmatpush1.bf16.msra.mxu0 %v9338_v10  ;;  %4524 = vmatprep.subr.bf16.mxu1 %v9343_v29  ;;  %v9380_v10 = vld [vmem:[#allocation7 + $0x6e8] ss:$16 sps:$4 sm:$0xff]   ;;  %v9385_v29 = vld [vmem:[#allocation7 + $0x704] ss:$16 sps:$4 sm:$0xff]  }
 0x2ef   :  { %5082 = vmatprep.subr.bf16.mxu0 %v9346_v47  ;;  %v9388_v47 = vld [vmem:[#allocation7 + $0x70c] ss:$16 sps:$4 sm:$0xff]  }
 0x2f1   :  { %4525 = vmatpush1.bf16.msra.mxu1 %v9341_v6  ;;  %v9383_v6 = vld [vmem:[#allocation7 + $0x700] ss:$16 sps:$4 sm:$0xff]  }
 0x2f2   :  { %5083 = vmatpush1.bf16.msra.mxu0 %v9344_v1  ;;  %4526 = vmatprep.subr.bf16.mxu1 %v9349_v4  ;;  %v9386_v1 = vld [vmem:[#allocation7 + $0x708] ss:$16 sps:$4 sm:$0xff]   ;;  %v9391_v4 = vld [vmem:[#allocation7 + $0x724] ss:$16 sps:$4 sm:$0xff]  }
 0x2f3   :  { %5084 = vmatprep.subr.bf16.mxu0 %v9352_v32  ;;  %4472 = vmatmul.mubr.bf16.gmra.mrb[60].mxu1 %v11177_v51  ;;  %v9394_v32 = vld [vmem:[#allocation7 + $0x72c] ss:$16 sps:$4 sm:$0xff]  }
 0x2f4   :  { %5030 = vmatmul.mubr.bf16.gmra.mrb[92].mxu0 %v11177_v51  ;;  %4481 = vmatprep.mubr.bf16.mxu1 %v11381_v61 }
 0x2f5   :  { %4527 = vmatpush1.bf16.msra.mxu1 %v9347_v58  ;;  %5039 = vmatprep.mubr.bf16.mxu0 %v11381_v61  ;;  %v9389_v58 = vld [vmem:[#allocation7 + $0x720] ss:$16 sps:$4 sm:$0xff]  }
 0x2f6   :  { %5085 = vmatpush1.bf16.msra.mxu0 %v9350_v56  ;;  %4528 = vmatprep.subr.bf16.mxu1 %v9355_v0  ;;  %v9392_v56 = vld [vmem:[#allocation7 + $0x728] ss:$16 sps:$4 sm:$0xff]   ;;  %v9397_v0 = vld [vmem:[#allocation7 + $0x744] ss:$16 sps:$4 sm:$0xff]  }
 0x2f7   :  { %5086 = vmatprep.subr.bf16.mxu0 %v9358_v15  ;;  %v9400_v15 = vld [vmem:[#allocation7 + $0x74c] ss:$16 sps:$4 sm:$0xff]  }
 0x2f9   :  { %4529 = vmatpush1.bf16.msra.mxu1 %v9353_v48  ;;  %v9395_v48 = vld [vmem:[#allocation7 + $0x740] ss:$16 sps:$4 sm:$0xff]  }
 0x2fa   :  { %5087 = vmatpush1.bf16.msra.mxu0 %v9356_v60  ;;  %4530 = vmatprep.subr.bf16.mxu1 %v9361_v3  ;;  %v9398_v60 = vld [vmem:[#allocation7 + $0x748] ss:$16 sps:$4 sm:$0xff]   ;;  %v9403_v3 = vld [vmem:[#allocation7 + $0x764] ss:$16 sps:$4 sm:$0xff]  }
 0x2fb   :  { %5088 = vmatprep.subr.bf16.mxu0 %v9364_v34  ;;  %4482 = vmatmul.mubr.bf16.gmra.mrb[64].mxu1 %v11211_v21  ;;  %v9406_v34 = vld [vmem:[#allocation7 + $0x76c] ss:$16 sps:$4 sm:$0xff]  }
 0x2fc   :  { %5040 = vmatmul.mubr.bf16.gmra.mrb[96].mxu0 %v11211_v21  ;;  %4491 = vmatprep.mubr.bf16.mxu1 %v11442_v55 }
 0x2fd   :  { %4531 = vmatpush1.bf16.msra.mxu1 %v9359_v63  ;;  %5049 = vmatprep.mubr.bf16.mxu0 %v11442_v55  ;;  %v9401_v63 = vld [vmem:[#allocation7 + $0x760] ss:$16 sps:$4 sm:$0xff]  }
 0x2fe   :  { %5089 = vmatpush1.bf16.msra.mxu0 %v9362_v39  ;;  %4532 = vmatprep.subr.bf16.mxu1 %v9367_v33  ;;  %v9404_v39 = vld [vmem:[#allocation7 + $0x768] ss:$16 sps:$4 sm:$0xff]   ;;  %v9409_v33 = vld [vmem:[#allocation7 + $0x784] ss:$16 sps:$4 sm:$0xff]  }
 0x2ff   :  { %5090 = vmatprep.subr.bf16.mxu0 %v9370_v57  ;;  %v9412_v57 = vld [vmem:[#allocation7 + $0x78c] ss:$16 sps:$4 sm:$0xff]  }
 0x301   :  { %4533 = vmatpush1.bf16.msra.mxu1 %v9365_v14  ;;  %v9407_v14 = vld [vmem:[#allocation7 + $0x780] ss:$16 sps:$4 sm:$0xff]  }
 0x302   :  { %5091 = vmatpush1.bf16.msra.mxu0 %v9368_v31  ;;  %4534 = vmatprep.subr.bf16.mxu1 %v9373_v8  ;;  %v9410_v31 = vld [vmem:[#allocation7 + $0x788] ss:$16 sps:$4 sm:$0xff]   ;;  %v9415_v8 = vld [vmem:[#allocation7 + $0x7a4] ss:$16 sps:$4 sm:$0xff]  }
 0x303   :  { %5092 = vmatprep.subr.bf16.mxu0 %v9376_v9  ;;  %4492 = vmatmul.mubr.bf16.gmra.mrb[68].mxu1 %v11251_v13  ;;  %v9418_v9 = vld [vmem:[#allocation7 + $0x7ac] ss:$16 sps:$4 sm:$0xff]  }
 0x304   :  { %5050 = vmatmul.mubr.bf16.gmra.mrb[100].mxu0 %v11251_v13  ;;  %4501 = vmatprep.mubr.bf16.mxu1 %v11471_v25 }
 0x305   :  { %4535 = vmatpush1.bf16.msra.mxu1 %v9371_v16  ;;  %5059 = vmatprep.mubr.bf16.mxu0 %v11471_v25  ;;  %v9413_v16 = vld [vmem:[#allocation7 + $0x7a0] ss:$16 sps:$4 sm:$0xff]  }
 0x306   :  { %5093 = vmatpush1.bf16.msra.mxu0 %v9374_v5  ;;  %4536 = vmatprep.subr.bf16.mxu1 %v9379_v50  ;;  %v9416_v5 = vld [vmem:[#allocation7 + $0x7a8] ss:$16 sps:$4 sm:$0xff]   ;;  %v9421_v50 = vld [vmem:[#allocation7 + $0x7c4] ss:$16 sps:$4 sm:$0xff]  }
 0x307   :  { %5094 = vmatprep.subr.bf16.mxu0 %v9382_v22  ;;  %v9419_v22 = vld [vmem:[#allocation7 + $0x7c0] ss:$16 sps:$4 sm:$0xff]  }
 0x309   :  { %4537 = vmatpush1.bf16.msra.mxu1 %v9377_v42  ;;  %v9422_v42 = vld [vmem:[#allocation7 + $0x7c8] ss:$16 sps:$4 sm:$0xff]  }
 0x30a   :  { %5095 = vmatpush1.bf16.msra.mxu0 %v9380_v10  ;;  %4538 = vmatprep.subr.bf16.mxu1 %v9385_v29  ;;  %v9427_v10 = vld [vmem:[#allocation7 + $0x7e4] ss:$16 sps:$4 sm:$0xff]   ;;  %v9430_v29 = vld [vmem:[#allocation7 + $0x7ec] ss:$16 sps:$4 sm:$0xff]  }
 0x30b   :  { %5096 = vmatprep.subr.bf16.mxu0 %v9388_v47  ;;  %4502 = vmatmul.mubr.bf16.gmra.mrb[72].mxu1 %v11311_v24  ;;  %v9425_v47 = vld [vmem:[#allocation7 + $0x7e0] ss:$16 sps:$4 sm:$0xff]  }
 0x30c   :  { %5060 = vmatmul.mubr.bf16.gmra.mrb[104].mxu0 %v11311_v24  ;;  %4511 = vmatprep.mubr.bf16.mxu1 %v11496_v52 }
 0x30d   :  { %4539 = vmatpush1.bf16.msra.mxu1 %v9383_v6  ;;  %5069 = vmatprep.mubr.bf16.mxu0 %v11496_v52  ;;  %v9428_v6 = vld [vmem:[#allocation7 + $0x7e8] ss:$16 sps:$4 sm:$0xff]  }
 0x30e   :  { %5097 = vmatpush1.bf16.msra.mxu0 %v9386_v1  ;;  %4540 = vmatprep.subr.bf16.mxu1 %v9391_v4  ;;  %v9433_v1 = vld [vmem:[#allocation7 + $0x804] ss:$16 sps:$4 sm:$0xff]   ;;  %v9436_v4 = vld [vmem:[#allocation7 + $0x80c] ss:$16 sps:$4 sm:$0xff]  }
 0x30f   :  { %5098 = vmatprep.subr.bf16.mxu0 %v9394_v32  ;;  %v9431_v32 = vld [vmem:[#allocation7 + $0x800] ss:$16 sps:$4 sm:$0xff]  }
 0x311   :  { %4541 = vmatpush1.bf16.msra.mxu1 %v9389_v58  ;;  %v9434_v58 = vld [vmem:[#allocation7 + $0x808] ss:$16 sps:$4 sm:$0xff]  }
 0x312   :  { %5099 = vmatpush1.bf16.msra.mxu0 %v9392_v56  ;;  %4542 = vmatprep.subr.bf16.mxu1 %v9397_v0  ;;  %v9439_v56 = vld [vmem:[#allocation7 + $0x824] ss:$16 sps:$4 sm:$0xff]   ;;  %v9442_v0 = vld [vmem:[#allocation7 + $0x82c] ss:$16 sps:$4 sm:$0xff]  }
 0x313   :  { %5100 = vmatprep.subr.bf16.mxu0 %v9400_v15  ;;  %4512 = vmatmul.mubr.bf16.gmra.mrb[76].mxu1 %v11396_v28  ;;  %v9437_v15 = vld [vmem:[#allocation7 + $0x820] ss:$16 sps:$4 sm:$0xff]  }
 0x314   :  { %5070 = vmatmul.mubr.bf16.gmra.mrb[108].mxu0 %v11396_v28  ;;  %4554 = vmatprep.mubr.bf16.mxu1 %v11160_v62 }
 0x315   :  { %4543 = vmatpush1.bf16.msra.mxu1 %v9395_v48  ;;  %5112 = vmatprep.mubr.bf16.mxu0 %v11160_v62  ;;  %v9424_v62 = vld [vmem:[#allocation7 + $0x7cc] ss:$16 sps:$4 sm:$0xff]   ;;  %v9440_v48 = vld [vmem:[#allocation7 + $0x828] ss:$16 sps:$4 sm:$0xff]  }
 0x316   :  { %5101 = vmatpush1.bf16.msra.mxu0 %v9398_v60  ;;  %4544 = vmatprep.subr.bf16.mxu1 %v9403_v3  ;;  %v9445_v60 = vld [vmem:[#allocation7 + $0x844] ss:$16 sps:$4 sm:$0xff]   ;;  %v9448_v3 = vld [vmem:[#allocation7 + $0x84c] ss:$16 sps:$4 sm:$0xff]  }
 0x317   :  { %5102 = vmatprep.subr.bf16.mxu0 %v9406_v34  ;;  %v9443_v34 = vld [vmem:[#allocation7 + $0x840] ss:$16 sps:$4 sm:$0xff]  }
 0x319   :  { %4545 = vmatpush1.bf16.msra.mxu1 %v9401_v63  ;;  %v9446_v63 = vld [vmem:[#allocation7 + $0x848] ss:$16 sps:$4 sm:$0xff]  }
 0x31a   :  { %5103 = vmatpush1.bf16.msra.mxu0 %v9404_v39  ;;  %4546 = vmatprep.subr.bf16.mxu1 %v9409_v33  ;;  %v9451_v39 = vld [vmem:[#allocation7 + $0x864] ss:$16 sps:$4 sm:$0xff]   ;;  %v9452_v33 = vld [vmem:[#allocation7 + $0x868] ss:$16 sps:$4 sm:$0xff]  }
 0x31b   :  { %5104 = vmatprep.subr.bf16.mxu0 %v9412_v57  ;;  %v9457_v57 = vld [vmem:[#allocation7 + $0x884] ss:$16 sps:$4 sm:$0xff]  }
 0x31d   :  { %4547 = vmatpush1.bf16.msra.mxu1 %v9407_v14  ;;  %v9460_v14 = vld [vmem:[#allocation7 + $0x88c] ss:$16 sps:$4 sm:$0xff]  }
 0x31e   :  { %5105 = vmatpush1.bf16.msra.mxu0 %v9410_v31  ;;  %4548 = vmatprep.subr.bf16.mxu1 %v9415_v8  ;;  %v9455_v31 = vld [vmem:[#allocation7 + $0x880] ss:$16 sps:$4 sm:$0xff]   ;;  %v9458_v8 = vld [vmem:[#allocation7 + $0x888] ss:$16 sps:$4 sm:$0xff]  }
 0x31f   :  { %5106 = vmatprep.subr.bf16.mxu0 %v9418_v9  ;;  %v9463_v9 = vld [vmem:[#allocation7 + $0x8a4] ss:$16 sps:$4 sm:$0xff]  }
 0x321   :  { %4549 = vmatpush1.bf16.msra.mxu1 %v9413_v16  ;;  %v9464_v16 = vld [vmem:[#allocation7 + $0x8a8] ss:$16 sps:$4 sm:$0xff]  }
 0x322   :  { %5107 = vmatpush1.bf16.msra.mxu0 %v9416_v5  ;;  %4550 = vmatprep.subr.bf16.mxu1 %v9421_v50  ;;  %v9469_v5 = vld [vmem:[#allocation7 + $0x8c4] ss:$16 sps:$4 sm:$0xff]   ;;  %v9472_v50 = vld [vmem:[#allocation7 + $0x8cc] ss:$16 sps:$4 sm:$0xff]  }
 0x323   :  { %5108 = vmatprep.subr.bf16.mxu0 %v9424_v62  ;;  %v9467_v62 = vld [vmem:[#allocation7 + $0x8c0] ss:$16 sps:$4 sm:$0xff]  }
 0x325   :  { %4551 = vmatpush1.bf16.msra.mxu1 %v9419_v22  ;;  %v9470_v22 = vld [vmem:[#allocation7 + $0x8c8] ss:$16 sps:$4 sm:$0xff]  }
 0x326   :  { %5109 = vmatpush1.bf16.msra.mxu0 %v9422_v42  ;;  %4552 = vmatprep.subr.bf16.mxu1 %v9427_v10  ;;  %v9475_v42 = vld [vmem:[#allocation7 + $0x8e4] ss:$16 sps:$4 sm:$0xff]   ;;  %v9476_v10 = vld [vmem:[#allocation7 + $0x8e8] ss:$16 sps:$4 sm:$0xff]  }
 0x327   :  { %5110 = vmatprep.subr.bf16.mxu0 %v9430_v29  ;;  %v9481_v29 = vld [vmem:[#allocation7 + $0x904] ss:$16 sps:$4 sm:$0xff]  }
 0x329   :  { %4553 = vmatpush1.bf16.msra.mxu1 %v9425_v47  ;;  %v9484_v47 = vld [vmem:[#allocation7 + $0x90c] ss:$16 sps:$4 sm:$0xff]  }
 0x32a   :  { %5111 = vmatpush1.bf16.msra.mxu0 %v9428_v6  ;;  %4615 = vmatprep.subr.bf16.mxu1 %v9433_v1  ;;  %v9479_v6 = vld [vmem:[#allocation7 + $0x900] ss:$16 sps:$4 sm:$0xff]   ;;  %v9482_v1 = vld [vmem:[#allocation7 + $0x908] ss:$16 sps:$4 sm:$0xff]  }
 0x32b   :  { %5173 = vmatprep.subr.bf16.mxu0 %v9436_v4  ;;  %v9487_v4 = vld [vmem:[#allocation7 + $0x924] ss:$16 sps:$4 sm:$0xff]  }
 0x32c   :  { %4555 = vmatmul.mubr.bf16.vlgmr.msra.gmra.mrb[56].mxu1 %v11156_v44 }
 0x32d   :  { %5113 = vmatmul.mubr.bf16.vlgmr.msra.gmra.mrb[88].mxu0 %v11156_v44  ;;  %4564 = vmatprep.mubr.bf16.mxu1 %v11194_v18  ;;  %v9454_v44 = vld [vmem:[#allocation7 + $0x86c] ss:$16 sps:$4 sm:$0xff]  }
 0x32e   :  { %4616 = vmatpush1.bf16.msra.mxu1 %v9431_v32  ;;  %5122 = vmatprep.mubr.bf16.mxu0 %v11194_v18  ;;  %v9449_v18 = vld [vmem:[#allocation7 + $0x860] ss:$16 sps:$4 sm:$0xff]   ;;  %v9488_v32 = vld [vmem:[#allocation7 + $0x928] ss:$16 sps:$4 sm:$0xff]  }
 0x32f   :  { %5174 = vmatpush1.bf16.msra.mxu0 %v9434_v58  ;;  %4617 = vmatprep.subr.bf16.mxu1 %v9439_v56  ;;  %v9493_v58 = vld [vmem:[#allocation7 + $0x944] ss:$16 sps:$4 sm:$0xff]   ;;  %v9496_v56 = vld [vmem:[#allocation7 + $0x94c] ss:$16 sps:$4 sm:$0xff]  }
 0x330   :  { %5175 = vmatprep.subr.bf16.mxu0 %v9442_v0  ;;  %v9491_v0 = vld [vmem:[#allocation7 + $0x940] ss:$16 sps:$4 sm:$0xff]  }
 0x332   :  { %4618 = vmatpush1.bf16.msra.mxu1 %v9437_v15  ;;  %v9494_v15 = vld [vmem:[#allocation7 + $0x948] ss:$16 sps:$4 sm:$0xff]  }
 0x333   :  { %5176 = vmatpush1.bf16.msra.mxu0 %v9440_v48  ;;  %4619 = vmatprep.subr.bf16.mxu1 %v9445_v60  ;;  %v9499_v48 = vld [vmem:[#allocation7 + $0x964] ss:$16 sps:$4 sm:$0xff]   ;;  %v9500_v60 = vld [vmem:[#allocation7 + $0x968] ss:$16 sps:$4 sm:$0xff]  }
 0x334   :  { %4565 = vmatmul.mubr.bf16.gmra.mrb[60].mxu1 %v11190_v19  ;;  %5177 = vmatprep.subr.bf16.mxu0 %v9448_v3  ;;  %v9505_v3 = vld [vmem:[#allocation7 + $0x984] ss:$16 sps:$4 sm:$0xff]  }
 0x335   :  { %5123 = vmatmul.mubr.bf16.gmra.mrb[92].mxu0 %v11190_v19  ;;  %4574 = vmatprep.mubr.bf16.mxu1 %v11225_v2  ;;  %v9466_v19 = vld [vmem:[#allocation7 + $0x8ac] ss:$16 sps:$4 sm:$0xff]  }
 0x336   :  { %4620 = vmatpush1.bf16.msra.mxu1 %v9443_v34  ;;  %5132 = vmatprep.mubr.bf16.mxu0 %v11225_v2  ;;  %v9461_v2 = vld [vmem:[#allocation7 + $0x8a0] ss:$16 sps:$4 sm:$0xff]   ;;  %v9508_v34 = vld [vmem:[#allocation7 + $0x98c] ss:$16 sps:$4 sm:$0xff]  }
 0x337   :  { %5178 = vmatpush1.bf16.msra.mxu0 %v9446_v63  ;;  %4621 = vmatprep.subr.bf16.mxu1 %v9451_v39  ;;  %v9503_v63 = vld [vmem:[#allocation7 + $0x980] ss:$16 sps:$4 sm:$0xff]   ;;  %v9506_v39 = vld [vmem:[#allocation7 + $0x988] ss:$16 sps:$4 sm:$0xff]  }
 0x338   :  { %5179 = vmatprep.subr.bf16.mxu0 %v9454_v44  ;;  %v9511_v44 = vld [vmem:[#allocation7 + $0x9a4] ss:$16 sps:$4 sm:$0xff]  }
 0x33a   :  { %4622 = vmatpush1.bf16.msra.mxu1 %v9449_v18  ;;  %v9509_v18 = vld [vmem:[#allocation7 + $0x9a0] ss:$16 sps:$4 sm:$0xff]  }
 0x33b   :  { %5180 = vmatpush1.bf16.msra.mxu0 %v9452_v33  ;;  %4623 = vmatprep.subr.bf16.mxu1 %v9457_v57  ;;  %v9517_v33 = vld [vmem:[#allocation7 + $0x9c4] ss:$16 sps:$4 sm:$0xff]   ;;  %v9520_v57 = vld [vmem:[#allocation7 + $0x9cc] ss:$16 sps:$4 sm:$0xff]  }
 0x33c   :  { %4575 = vmatmul.mubr.bf16.gmra.mrb[64].mxu1 %v11222_v41  ;;  %5181 = vmatprep.subr.bf16.mxu0 %v9460_v14  ;;  %v9515_v14 = vld [vmem:[#allocation7 + $0x9c0] ss:$16 sps:$4 sm:$0xff]  }
 0x33d   :  { %5133 = vmatmul.mubr.bf16.gmra.mrb[96].mxu0 %v11222_v41  ;;  %4584 = vmatprep.mubr.bf16.mxu1 %v11280_v37  ;;  %v9478_v41 = vld [vmem:[#allocation7 + $0x8ec] ss:$16 sps:$4 sm:$0xff]  }
 0x33e   :  { %4624 = vmatpush1.bf16.msra.mxu1 %v9455_v31  ;;  %5142 = vmatprep.mubr.bf16.mxu0 %v11280_v37  ;;  %v9473_v37 = vld [vmem:[#allocation7 + $0x8e0] ss:$16 sps:$4 sm:$0xff]   ;;  %v9518_v31 = vld [vmem:[#allocation7 + $0x9c8] ss:$16 sps:$4 sm:$0xff]  }
 0x33f   :  { %5182 = vmatpush1.bf16.msra.mxu0 %v9458_v8  ;;  %4625 = vmatprep.subr.bf16.mxu1 %v9463_v9  ;;  %v9523_v8 = vld [vmem:[#allocation7 + $0x9e4] ss:$16 sps:$4 sm:$0xff]   ;;  %v9526_v9 = vld [vmem:[#allocation7 + $0x9ec] ss:$16 sps:$4 sm:$0xff]  }
 0x340   :  { %5183 = vmatprep.subr.bf16.mxu0 %v9466_v19  ;;  %v9521_v19 = vld [vmem:[#allocation7 + $0x9e0] ss:$16 sps:$4 sm:$0xff]  }
 0x342   :  { %4626 = vmatpush1.bf16.msra.mxu1 %v9461_v2  ;;  %v9524_v2 = vld [vmem:[#allocation7 + $0x9e8] ss:$16 sps:$4 sm:$0xff]  }
 0x343   :  { %5184 = vmatpush1.bf16.msra.mxu0 %v9464_v16  ;;  %4627 = vmatprep.subr.bf16.mxu1 %v9469_v5  ;;  %v9529_v16 = vld [vmem:[#allocation7 + $0xa04] ss:$16 sps:$4 sm:$0xff]   ;;  %v9532_v5 = vld [vmem:[#allocation7 + $0xa0c] ss:$16 sps:$4 sm:$0xff]  }
 0x344   :  { %4585 = vmatmul.mubr.bf16.gmra.mrb[68].mxu1 %v11266_v20  ;;  %5185 = vmatprep.subr.bf16.mxu0 %v9472_v50  ;;  %v9527_v50 = vld [vmem:[#allocation7 + $0xa00] ss:$16 sps:$4 sm:$0xff]  }
 0x345   :  { %5143 = vmatmul.mubr.bf16.gmra.mrb[100].mxu0 %v11266_v20  ;;  %4594 = vmatprep.mubr.bf16.mxu1 %v11342_v17  ;;  %v9490_v20 = vld [vmem:[#allocation7 + $0x92c] ss:$16 sps:$4 sm:$0xff]  }
 0x346   :  { %4628 = vmatpush1.bf16.msra.mxu1 %v9467_v62  ;;  %5152 = vmatprep.mubr.bf16.mxu0 %v11342_v17  ;;  %v9485_v17 = vld [vmem:[#allocation7 + $0x920] ss:$16 sps:$4 sm:$0xff]   ;;  %v9530_v62 = vld [vmem:[#allocation7 + $0xa08] ss:$16 sps:$4 sm:$0xff]  }
 0x347   :  { %5186 = vmatpush1.bf16.msra.mxu0 %v9470_v22  ;;  %4629 = vmatprep.subr.bf16.mxu1 %v9475_v42  ;;  %v9535_v22 = vld [vmem:[#allocation7 + $0xa24] ss:$16 sps:$4 sm:$0xff]   ;;  %v9538_v42 = vld [vmem:[#allocation7 + $0xa2c] ss:$16 sps:$4 sm:$0xff]  }
 0x348   :  { %5187 = vmatprep.subr.bf16.mxu0 %v9478_v41  ;;  %v9533_v41 = vld [vmem:[#allocation7 + $0xa20] ss:$16 sps:$4 sm:$0xff]  }
 0x34a   :  { %4630 = vmatpush1.bf16.msra.mxu1 %v9473_v37  ;;  %v9536_v37 = vld [vmem:[#allocation7 + $0xa28] ss:$16 sps:$4 sm:$0xff]  }
 0x34b   :  { %5188 = vmatpush1.bf16.msra.mxu0 %v9476_v10  ;;  %4631 = vmatprep.subr.bf16.mxu1 %v9481_v29  ;;  %v9541_v10 = vld [vmem:[#allocation7 + $0xa44] ss:$16 sps:$4 sm:$0xff]   ;;  %v9544_v29 = vld [vmem:[#allocation7 + $0xa4c] ss:$16 sps:$4 sm:$0xff]  }
 0x34c   :  { %4595 = vmatmul.mubr.bf16.gmra.mrb[72].mxu1 %v11333_v59  ;;  %5189 = vmatprep.subr.bf16.mxu0 %v9484_v47  ;;  %v9539_v47 = vld [vmem:[#allocation7 + $0xa40] ss:$16 sps:$4 sm:$0xff]  }
 0x34d   :  { %5153 = vmatmul.mubr.bf16.gmra.mrb[104].mxu0 %v11333_v59  ;;  %4604 = vmatprep.mubr.bf16.mxu1 %v11449_v26  ;;  %v9502_v59 = vld [vmem:[#allocation7 + $0x96c] ss:$16 sps:$4 sm:$0xff]  }
 0x34e   :  { %4632 = vmatpush1.bf16.msra.mxu1 %v9479_v6  ;;  %5162 = vmatprep.mubr.bf16.mxu0 %v11449_v26  ;;  %v9497_v26 = vld [vmem:[#allocation7 + $0x960] ss:$16 sps:$4 sm:$0xff]   ;;  %v9542_v6 = vld [vmem:[#allocation7 + $0xa48] ss:$16 sps:$4 sm:$0xff]  }
 0x34f   :  { %5190 = vmatpush1.bf16.msra.mxu0 %v9482_v1  ;;  %4633 = vmatprep.subr.bf16.mxu1 %v9487_v4  ;;  %v9547_v1 = vld [vmem:[#allocation7 + $0xa64] ss:$16 sps:$4 sm:$0xff]   ;;  %v9548_v4 = vld [vmem:[#allocation7 + $0xa68] ss:$16 sps:$4 sm:$0xff]  }
 0x350   :  { %5191 = vmatprep.subr.bf16.mxu0 %v9490_v20  ;;  %v9553_v20 = vld [vmem:[#allocation7 + $0xa84] ss:$16 sps:$4 sm:$0xff]  }
 0x352   :  { %4634 = vmatpush1.bf16.msra.mxu1 %v9485_v17  ;;  %v9556_v17 = vld [vmem:[#allocation7 + $0xa8c] ss:$16 sps:$4 sm:$0xff]  }
 0x353   :  { %5192 = vmatpush1.bf16.msra.mxu0 %v9488_v32  ;;  %4635 = vmatprep.subr.bf16.mxu1 %v9493_v58  ;;  %v9551_v32 = vld [vmem:[#allocation7 + $0xa80] ss:$16 sps:$4 sm:$0xff]   ;;  %v9554_v58 = vld [vmem:[#allocation7 + $0xa88] ss:$16 sps:$4 sm:$0xff]  }
 0x354   :  { %4605 = vmatmul.mubr.bf16.gmra.mrb[76].mxu1 %v11465_v23  ;;  %5193 = vmatprep.subr.bf16.mxu0 %v9496_v56  ;;  %v9559_v56 = vld [vmem:[#allocation7 + $0xaa4] ss:$16 sps:$4 sm:$0xff]  }
 0x355   :  { %5163 = vmatmul.mubr.bf16.gmra.mrb[108].mxu0 %v11465_v23  ;;  %4647 = vmatprep.mubr.bf16.mxu1 %v11174_v45  ;;  %v9514_v23 = vld [vmem:[#allocation7 + $0x9ac] ss:$16 sps:$4 sm:$0xff]  }
 0x356   :  { %4636 = vmatpush1.bf16.msra.mxu1 %v9491_v0  ;;  %5205 = vmatprep.mubr.bf16.mxu0 %v11174_v45  ;;  %v9512_v45 = vld [vmem:[#allocation7 + $0x9a8] ss:$16 sps:$4 sm:$0xff]  }
 0x357   :  { %5194 = vmatpush1.bf16.msra.mxu0 %v9494_v15  ;;  %4637 = vmatprep.subr.bf16.mxu1 %v9499_v48  ;;  %v9560_v0 = vld [vmem:[#allocation7 + $0xaa8] ss:$16 sps:$4 sm:$0xff]   ;;  %v9565_v15 = vld [vmem:[#allocation7 + $0xac4] ss:$16 sps:$4 sm:$0xff]   ;;  %v9568_v48 = vld [vmem:[#allocation7 + $0xacc] ss:$16 sps:$4 sm:$0xff]  }
 0x358   :  { %5195 = vmatprep.subr.bf16.mxu0 %v9502_v59  ;;  %v9563_v59 = vld [vmem:[#allocation7 + $0xac0] ss:$16 sps:$4 sm:$0xff]  }
 0x35a   :  { %4638 = vmatpush1.bf16.msra.mxu1 %v9497_v26  ;;  %v9566_v26 = vld [vmem:[#allocation7 + $0xac8] ss:$16 sps:$4 sm:$0xff]  }
 0x35b   :  { %5196 = vmatpush1.bf16.msra.mxu0 %v9500_v60  ;;  %4639 = vmatprep.subr.bf16.mxu1 %v9505_v3  ;;  %v9571_v60 = vld [vmem:[#allocation7 + $0xae4] ss:$16 sps:$4 sm:$0xff]   ;;  %v9572_v3 = vld [vmem:[#allocation7 + $0xae8] ss:$16 sps:$4 sm:$0xff]  }
 0x35c   :  { %5197 = vmatprep.subr.bf16.mxu0 %v9508_v34  ;;  %v9577_v34 = vld [vmem:[#allocation7 + $0xb04] ss:$16 sps:$4 sm:$0xff]  }
 0x35e   :  { %4640 = vmatpush1.bf16.msra.mxu1 %v9503_v63  ;;  %v9580_v63 = vld [vmem:[#allocation7 + $0xb0c] ss:$16 sps:$4 sm:$0xff]  }
 0x35f   :  { %5198 = vmatpush1.bf16.msra.mxu0 %v9506_v39  ;;  %4641 = vmatprep.subr.bf16.mxu1 %v9511_v44  ;;  %v9575_v39 = vld [vmem:[#allocation7 + $0xb00] ss:$16 sps:$4 sm:$0xff]   ;;  %v9578_v44 = vld [vmem:[#allocation7 + $0xb08] ss:$16 sps:$4 sm:$0xff]  }
 0x360   :  { %5199 = vmatprep.subr.bf16.mxu0 %v9514_v23  ;;  %v9583_v23 = vld [vmem:[#allocation7 + $0xb24] ss:$16 sps:$4 sm:$0xff]  }
 0x362   :  { %4642 = vmatpush1.bf16.msra.mxu1 %v9509_v18  ;;  %v9584_v18 = vld [vmem:[#allocation7 + $0xb28] ss:$16 sps:$4 sm:$0xff]  }
 0x363   :  { %5200 = vmatpush1.bf16.msra.mxu0 %v9512_v45  ;;  %4643 = vmatprep.subr.bf16.mxu1 %v9517_v33  ;;  %v9589_v45 = vld [vmem:[#allocation7 + $0xb44] ss:$16 sps:$4 sm:$0xff]   ;;  %v9592_v33 = vld [vmem:[#allocation7 + $0xb4c] ss:$16 sps:$4 sm:$0xff]  }
 0x364   :  { %5201 = vmatprep.subr.bf16.mxu0 %v9520_v57  ;;  %v9587_v57 = vld [vmem:[#allocation7 + $0xb40] ss:$16 sps:$4 sm:$0xff]  }
 0x366   :  { %4644 = vmatpush1.bf16.msra.mxu1 %v9515_v14  ;;  %v9590_v14 = vld [vmem:[#allocation7 + $0xb48] ss:$16 sps:$4 sm:$0xff]  }
 0x367   :  { %5202 = vmatpush1.bf16.msra.mxu0 %v9518_v31  ;;  %4645 = vmatprep.subr.bf16.mxu1 %v9523_v8  ;;  %v9595_v31 = vld [vmem:[#allocation7 + $0xb64] ss:$16 sps:$4 sm:$0xff]   ;;  %v9596_v8 = vld [vmem:[#allocation7 + $0xb68] ss:$16 sps:$4 sm:$0xff]  }
 0x368   :  { %5203 = vmatprep.subr.bf16.mxu0 %v9526_v9  ;;  %v9601_v9 = vld [vmem:[#allocation7 + $0xb84] ss:$16 sps:$4 sm:$0xff]  }
 0x36a   :  { %4646 = vmatpush1.bf16.msra.mxu1 %v9521_v19  ;;  %v9604_v19 = vld [vmem:[#allocation7 + $0xb8c] ss:$16 sps:$4 sm:$0xff]  }
 0x36b   :  { %5204 = vmatpush1.bf16.msra.mxu0 %v9524_v2  ;;  %4708 = vmatprep.subr.bf16.mxu1 %v9529_v16  ;;  %v9599_v2 = vld [vmem:[#allocation7 + $0xb80] ss:$16 sps:$4 sm:$0xff]   ;;  %v9602_v16 = vld [vmem:[#allocation7 + $0xb88] ss:$16 sps:$4 sm:$0xff]  }
 0x36c   :  { %5266 = vmatprep.subr.bf16.mxu0 %v9532_v5  ;;  %v9607_v5 = vld [vmem:[#allocation7 + $0xba4] ss:$16 sps:$4 sm:$0xff]  }
 0x36d   :  { %4648 = vmatmul.mubr.bf16.vlgmr.msra.gmra.mrb[56].mxu1 %v11326_v7 }
 0x36e   :  { %5206 = vmatmul.mubr.bf16.vlgmr.msra.gmra.mrb[88].mxu0 %v11326_v7  ;;  %4657 = vmatprep.mubr.bf16.mxu1 %v11208_v40  ;;  %v9550_v7 = vld [vmem:[#allocation7 + $0xa6c] ss:$16 sps:$4 sm:$0xff]  }
 0x36f   :  { %4709 = vmatpush1.bf16.msra.mxu1 %v9527_v50  ;;  %5215 = vmatprep.mubr.bf16.mxu0 %v11208_v40  ;;  %v9545_v40 = vld [vmem:[#allocation7 + $0xa60] ss:$16 sps:$4 sm:$0xff]  }
 0x370   :  { %5267 = vmatpush1.bf16.msra.mxu0 %v9530_v62  ;;  %4710 = vmatprep.subr.bf16.mxu1 %v9535_v22  ;;  %v9605_v50 = vld [vmem:[#allocation7 + $0xba0] ss:$16 sps:$4 sm:$0xff]   ;;  %v9613_v62 = vld [vmem:[#allocation7 + $0xbc4] ss:$16 sps:$4 sm:$0xff]   ;;  %v9616_v22 = vld [vmem:[#allocation7 + $0xbcc] ss:$16 sps:$4 sm:$0xff]  }
 0x371   :  { %5268 = vmatprep.subr.bf16.mxu0 %v9538_v42  ;;  %v9611_v42 = vld [vmem:[#allocation7 + $0xbc0] ss:$16 sps:$4 sm:$0xff]  }
 0x373   :  { %4711 = vmatpush1.bf16.msra.mxu1 %v9533_v41  ;;  %v9614_v41 = vld [vmem:[#allocation7 + $0xbc8] ss:$16 sps:$4 sm:$0xff]  }
 0x374   :  { %5269 = vmatpush1.bf16.msra.mxu0 %v9536_v37  ;;  %4712 = vmatprep.subr.bf16.mxu1 %v9541_v10  ;;  %v9619_v37 = vld [vmem:[#allocation7 + $0xbe4] ss:$16 sps:$4 sm:$0xff]   ;;  %v9622_v10 = vld [vmem:[#allocation7 + $0xbec] ss:$16 sps:$4 sm:$0xff]  }
 0x375   :  { %4658 = vmatmul.mubr.bf16.gmra.mrb[60].mxu1 %v11358_v54  ;;  %5270 = vmatprep.subr.bf16.mxu0 %v9544_v29  ;;  %v9617_v29 = vld [vmem:[#allocation7 + $0xbe0] ss:$16 sps:$4 sm:$0xff]  }
 0x376   :  { %5216 = vmatmul.mubr.bf16.gmra.mrb[92].mxu0 %v11358_v54  ;;  %4667 = vmatprep.mubr.bf16.mxu1 %v11247_v30  ;;  %v9562_v54 = vld [vmem:[#allocation7 + $0xaac] ss:$16 sps:$4 sm:$0xff]  }
 0x377   :  { %4713 = vmatpush1.bf16.msra.mxu1 %v9539_v47  ;;  %5225 = vmatprep.mubr.bf16.mxu0 %v11247_v30  ;;  %v9557_v30 = vld [vmem:[#allocation7 + $0xaa0] ss:$16 sps:$4 sm:$0xff]   ;;  %v9620_v47 = vld [vmem:[#allocation7 + $0xbe8] ss:$16 sps:$4 sm:$0xff]  }
 0x378   :  { %5271 = vmatpush1.bf16.msra.mxu0 %v9542_v6  ;;  %4714 = vmatprep.subr.bf16.mxu1 %v9547_v1  ;;  %v9623_v6 = vld [vmem:[#allocation10 + $0x40] sm:$0xff]  }
 0x379   :  { %5272 = vmatprep.subr.bf16.mxu0 %v9550_v7  ;;  %v9633_v1 = vld [vmem:[#allocation10 + $0x1c0] sm:$0xff]  }
 0x37a   :  { %v9624_v7 = vld [vmem:[#allocation10] sm:$0xff]  }
 0x37b   :  { %4715 = vmatpush1.bf16.msra.mxu1 %v9545_v40  ;;  %v9625_v40 = vld [vmem:[#allocation10 + $0x48] sm:$0xff]  }
 0x37c   :  { %5273 = vmatpush1.bf16.msra.mxu0 %v9548_v4  ;;  %4716 = vmatprep.subr.bf16.mxu1 %v9553_v20  ;;  %v9634_v4 = vld [vmem:[#allocation10 + $0x180] sm:$0xff]   ;;  %v9626_v20 = vld [vmem:[#allocation10 + $0x8] sm:$0xff]  }
 0x37d   :  { %4668 = vmatmul.mubr.bf16.gmra.mrb[64].mxu1 %v11415_v27  ;;  %5274 = vmatprep.subr.bf16.mxu0 %v9556_v17  ;;  %v9627_v17 = vld [vmem:[#allocation10 + $0x50] sm:$0xff]  }
 0x37e   :  { %5226 = vmatmul.mubr.bf16.gmra.mrb[96].mxu0 %v11415_v27  ;;  %4677 = vmatprep.mubr.bf16.mxu1 %v11306_v53  ;;  %v9574_v27 = vld [vmem:[#allocation7 + $0xaec] ss:$16 sps:$4 sm:$0xff]  }
 0x37f   :  { %4717 = vmatpush1.bf16.msra.mxu1 %v9551_v32  ;;  %5235 = vmatprep.mubr.bf16.mxu0 %v11306_v53  ;;  %v9569_v53 = vld [vmem:[#allocation7 + $0xae0] ss:$16 sps:$4 sm:$0xff]   ;;  %v9628_v32 = vld [vmem:[#allocation10 + $0x10] sm:$0xff]  }
 0x380   :  { %5275 = vmatpush1.bf16.msra.mxu0 %v9554_v58  ;;  %4718 = vmatprep.subr.bf16.mxu1 %v9559_v56  ;;  %v9629_v58 = vld [vmem:[#allocation10 + $0x58] sm:$0xff]   ;;  %v9632_v56 = vld [vmem:[#allocation10 + $0x20] sm:$0xff]  }
 0x381   :  { %5276 = vmatprep.subr.bf16.mxu0 %v9562_v54  ;;  %v9641_v54 = vld [vmem:[#allocation10 + $0x70] sm:$0xff]  }
 0x383   :  { %4719 = vmatpush1.bf16.msra.mxu1 %v9557_v30  ;;  %v9642_v30 = vld [vmem:[#allocation10 + $0x30] sm:$0xff]  }
 0x384   :  { %5277 = vmatpush1.bf16.msra.mxu0 %v9560_v0  ;;  %4720 = vmatprep.subr.bf16.mxu1 %v9565_v15  ;;  %v9648_v0 = vld [vmem:[#allocation10 + $0x1a0] sm:$0xff]   ;;  %v9645_v15 = vld [vmem:[#allocation10 + $0x78] sm:$0xff]  }
 0x385   :  { %4678 = vmatmul.mubr.bf16.gmra.mrb[68].mxu1 %v11461_v49  ;;  %5278 = vmatprep.subr.bf16.mxu0 %v9568_v48  ;;  %v9647_v48 = vld [vmem:[#allocation10 + $0x38] sm:$0xff]  }
 0x386   :  { %5236 = vmatmul.mubr.bf16.gmra.mrb[100].mxu0 %v11461_v49  ;;  %4687 = vmatprep.mubr.bf16.mxu1 %v11391_v36  ;;  %v9586_v49 = vld [vmem:[#allocation7 + $0xb2c] ss:$16 sps:$4 sm:$0xff]  }
 0x387   :  { %4721 = vmatpush1.bf16.msra.mxu1 %v9563_v59  ;;  %5245 = vmatprep.mubr.bf16.mxu0 %v11391_v36  ;;  %v9581_v36 = vld [vmem:[#allocation7 + $0xb20] ss:$16 sps:$4 sm:$0xff]  }
 0x388   :  { %5279 = vmatpush1.bf16.msra.mxu0 %v9566_v26  ;;  %4722 = vmatprep.subr.bf16.mxu1 %v9571_v60  ;;  %v9649_v59 = vld [vmem:[#allocation10 + $0x1e8] sm:$0xff]   ;;  %v9651_v60 = vld [vmem:[#allocation10 + $0xc0] sm:$0xff]  }
 0x389   :  { %5280 = vmatprep.subr.bf16.mxu0 %v9574_v27  ;;  %v9650_v26 = vld [vmem:[#allocation10 + $0x1a8] sm:$0xff]   ;;  %v9653_v27 = vld [vmem:[#allocation10 + $0x1f0] sm:$0xff]  }
 0x38b   :  { %4723 = vmatpush1.bf16.msra.mxu1 %v9569_v53  ;;  %v9654_v53 = vld [vmem:[#allocation10 + $0x1b0] sm:$0xff]  }
 0x38c   :  { %5281 = vmatpush1.bf16.msra.mxu0 %v9572_v3  ;;  %4724 = vmatprep.subr.bf16.mxu1 %v9577_v34  ;;  %v9657_v3 = vld [vmem:[#allocation10 + $0x1f8] sm:$0xff]  }
 0x38d   :  { %4688 = vmatmul.mubr.bf16.gmra.mrb[72].mxu1 %v11485_v12  ;;  %5282 = vmatprep.subr.bf16.mxu0 %v9580_v63  ;;  %v9658_v34 = vld [vmem:[#allocation10 + $0x1b8] sm:$0xff]   ;;  %v9661_v63 = vld [vmem:[#allocation10 + $0x2c0] sm:$0xff]  }
 0x38e   :  { %5246 = vmatmul.mubr.bf16.gmra.mrb[104].mxu0 %v11485_v12  ;;  %4697 = vmatprep.mubr.bf16.mxu1 %v11468_v38  ;;  %v9598_v12 = vld [vmem:[#allocation7 + $0xb6c] ss:$16 sps:$4 sm:$0xff]  }
 0x38f   :  { %4725 = vmatpush1.bf16.msra.mxu1 %v9575_v39  ;;  %5255 = vmatprep.mubr.bf16.mxu0 %v11468_v38  ;;  %v9593_v38 = vld [vmem:[#allocation7 + $0xb60] ss:$16 sps:$4 sm:$0xff]  }
 0x390   :  { %5283 = vmatpush1.bf16.msra.mxu0 %v9578_v44  ;;  %4726 = vmatprep.subr.bf16.mxu1 %v9583_v23  ;;  %v2259_v39 = vld [vmem:[#allocation8] sm:$0xf]  ;;  %v11771_v44 = vld [vmem:[#allocation27_spill] sm:$0xff] }
 0x391   :  { %5284 = vmatprep.subr.bf16.mxu0 %v9586_v49  ;;  %v2317_v23 = vsub.s32 3, %v11771_v44  ;;  %v11772_v49 = vld [vmem:[#allocation28_spill] sm:$0xff] }
 0x393   :  { %4727 = vmatpush1.bf16.msra.mxu1 %v9581_v36  ;;  %v11603_v36 = vrot.slane %v2259_v39, %v11772_v49 }
 0x394   :  { %5285 = vmatpush1.bf16.msra.mxu0 %v9584_v18  ;;  %4728 = vmatprep.subr.bf16.mxu1 %v9589_v45  ;;  %v11773_v18 = vld [vmem:[#allocation30_spill] sm:$0xff] }
 0x395   :  { %4698 = vmatmul.mubr.bf16.gmra.mrb[76].mxu1 %v11501_v35  ;;  %5286 = vmatprep.subr.bf16.mxu0 %v9592_v33  ;;  %v11606_v45 = vrot.slane %v2259_v39, %v11773_v18  ;;  %v11774_v33 = vld [vmem:[#allocation29_spill] sm:$0xff] }
 0x396   :  { %5256 = vmatmul.mubr.bf16.gmra.mrb[108].mxu0 %v11501_v35  ;;  %4740 = vmatprep.mubr.bf16.mxu1 %v11356_v43  ;;  %v9610_v35 = vld [vmem:[#allocation7 + $0xbac] ss:$16 sps:$4 sm:$0xff]  }
 0x397   :  { %4729 = vmatpush1.bf16.msra.mxu1 %v9587_v57  ;;  %5298 = vmatprep.mubr.bf16.mxu0 %v11356_v43  ;;  %v9608_v43 = vld [vmem:[#allocation7 + $0xba8] ss:$16 sps:$4 sm:$0xff]   ;;  %v11609_v57 = vrot.slane %v2259_v39, %v11774_v33 }
 0x398   :  { %5287 = vmatpush1.bf16.msra.mxu0 %v9590_v14  ;;  %4730 = vmatprep.subr.bf16.mxu1 %v9595_v31  ;;  %v11611_v14 = vrot.slane %v2259_v39, %v2317_v23 }
 0x399   :  { %5288 = vmatprep.subr.bf16.mxu0 %v9598_v12 }
 0x39b   :  { %4731 = vmatpush1.bf16.msra.mxu1 %v9593_v38 }
 0x39c   :  { %5289 = vmatpush1.bf16.msra.mxu0 %v9596_v8  ;;  %4732 = vmatprep.subr.bf16.mxu1 %v9601_v9 }
 0x39d   :  { %5290 = vmatprep.subr.bf16.mxu0 %v9604_v19 }
 0x39f   :  { %4733 = vmatpush1.bf16.msra.mxu1 %v9599_v2 }
 0x3a0   :  { %5291 = vmatpush1.bf16.msra.mxu0 %v9602_v16  ;;  %4734 = vmatprep.subr.bf16.mxu1 %v9607_v5 }
 0x3a1   :  { %5292 = vmatprep.subr.bf16.mxu0 %v9610_v35 }
 0x3a3   :  { %4735 = vmatpush1.bf16.msra.mxu1 %v9605_v50 }
 0x3a4   :  { %5293 = vmatpush1.bf16.msra.mxu0 %v9608_v43  ;;  %4736 = vmatprep.subr.bf16.mxu1 %v9613_v62 }
 0x3a5   :  { %5294 = vmatprep.subr.bf16.mxu0 %v9616_v22 }
 0x3a7   :  { %4737 = vmatpush1.bf16.msra.mxu1 %v9611_v42 }
 0x3a8   :  { %5295 = vmatpush1.bf16.msra.mxu0 %v9614_v41  ;;  %4738 = vmatprep.subr.bf16.mxu1 %v9619_v37 }
 0x3a9   :  { %5296 = vmatprep.subr.bf16.mxu0 %v9622_v10 }
 0x3ab   :  { %4739 = vmatpush1.bf16.msra.mxu1 %v9617_v29 }
 0x3ac   :  { %5297 = vmatpush1.bf16.msra.mxu0 %v9620_v47  ;;  %7996 = vmatprep.subr.bf16.mxu1 %v9623_v6 }
 0x3ad   :  { %8062 = vmatprep.subr.bf16.mxu0 %v9633_v1 }
 0x3ae   :  { %4741 = vmatmul.mubr.bf16.vlgmr.msra.gmra.mrb[56].mxu1 %v11177_v51 }
 0x3af   :  { %5299 = vmatmul.mubr.bf16.vlgmr.msra.gmra.mrb[88].mxu0 %v11177_v51  ;;  %4750 = vmatprep.mubr.bf16.mxu1 %v11381_v61  ;;  %v9630_v51 = vld [vmem:[#allocation10 + $0x18] sm:$0xff]  }
 0x3b0   :  { %5308 = vmatprep.mubr.bf16.mxu0 %v11381_v61  ;;  %7997 = vmatpush3.bf16.msra.mxu1 %v9624_v7  ;;  %v9631_v61 = vld [vmem:[#allocation10 + $0x60] sm:$0xff]  }
 0x3b1   :  { %7998 = vmatprep.subr.bf16.mxu1 %v9625_v40  ;;  %8063 = vmatpush3.bf16.msra.mxu0 %v9634_v4 }
 0x3b4   :  { %7999 = vmatpush3.bf16.msra.mxu1 %v9626_v20 }
 0x3b5   :  { %8000 = vmatprep.subr.bf16.mxu1 %v9627_v17 }
 0x3b6   :  { %4751 = vmatmul.mubr.bf16.gmra.mrb[60].mxu1 %v11211_v21 }
 0x3b7   :  { %5309 = vmatmul.mubr.bf16.gmra.mrb[92].mxu0 %v11211_v21  ;;  %4760 = vmatprep.mubr.bf16.mxu1 %v11442_v55  ;;  %v9636_v21 = vld [vmem:[#allocation10 + $0x1c8] sm:$0xff]  }
 0x3b8   :  { %5318 = vmatprep.mubr.bf16.mxu0 %v11442_v55  ;;  %8001 = vmatpush3.bf16.msra.mxu1 %v9628_v32  ;;  %v9637_v55 = vld [vmem:[#allocation10 + $0x28] sm:$0xff]  }
 0x3b9   :  { %8002 = vmatprep.subr.bf16.mxu1 %v9629_v58  ;;  %8064 = vmatprep.subr.bf16.mxu0 %v9636_v21 }
 0x3bc   :  { %8003 = vmatpush3.bf16.msra.mxu1 %v9630_v51 }
 0x3bd   :  { %8004 = vmatprep.subr.bf16.mxu1 %v9631_v61 }
 0x3be   :  { %4761 = vmatmul.mubr.bf16.gmra.mrb[64].mxu1 %v11251_v13 }
 0x3bf   :  { %5319 = vmatmul.mubr.bf16.gmra.mrb[96].mxu0 %v11251_v13  ;;  %4770 = vmatprep.mubr.bf16.mxu1 %v11471_v25  ;;  %v9638_v13 = vld [vmem:[#allocation10 + $0x188] sm:$0xff]  }
 0x3c0   :  { %5328 = vmatprep.mubr.bf16.mxu0 %v11471_v25  ;;  %8005 = vmatpush3.bf16.msra.mxu1 %v9632_v56  ;;  %v9639_v25 = vld [vmem:[#allocation10 + $0x1d0] sm:$0xff]  }
 0x3c1   :  { %8065 = vmatpush3.bf16.msra.mxu0 %v9638_v13 }
 0x3c2   :  { %8066 = vmatprep.subr.bf16.mxu0 %v9639_v25 }
 0x3c6   :  { %4771 = vmatmul.mubr.bf16.gmra.mrb[68].mxu1 %v11311_v24 }
 0x3c7   :  { %5329 = vmatmul.mubr.bf16.gmra.mrb[100].mxu0 %v11311_v24  ;;  %4780 = vmatprep.mubr.bf16.mxu1 %v11496_v52  ;;  %v9635_v24 = vld [vmem:[#allocation10 + $0x68] sm:$0xff]  }
 0x3c8   :  { %5338 = vmatprep.mubr.bf16.mxu0 %v11496_v52  ;;  %8006 = vmatprep.subr.bf16.mxu1 %v9635_v24  ;;  %v9640_v52 = vld [vmem:[#allocation10 + $0x190] sm:$0xff]  }
 0x3c9   :  { %8007 = vmatpush3.bf16.msra.mxu1 %v9637_v55  ;;  %8067 = vmatpush3.bf16.msra.mxu0 %v9640_v52 }
 0x3ca   :  { %8008 = vmatprep.subr.bf16.mxu1 %v9641_v54 }
 0x3cd   :  { %8009 = vmatpush3.bf16.msra.mxu1 %v9642_v30 }
 0x3ce   :  { %4781 = vmatmul.mubr.bf16.gmra.mrb[72].mxu1 %v11396_v28  ;;  %8010 = vmatprep.subr.bf16.mxu1 %v9645_v15 }
 0x3cf   :  { %5339 = vmatmul.mubr.bf16.gmra.mrb[104].mxu0 %v11396_v28  ;;  %4790 = vmatprep.mubr.bf16.mxu1 %v11505_v46  ;;  %v9643_v28 = vld [vmem:[#allocation10 + $0x1d8] sm:$0xff]  }
 0x3d0   :  { %5348 = vmatprep.mubr.bf16.mxu0 %v11505_v46  ;;  %v9644_v46 = vld [vmem:[#allocation10 + $0x198] sm:$0xff]   ;;  %8068 = vmatprep.subr.bf16.mxu0 %v9643_v28 }
 0x3d1   :  { %8069 = vmatpush3.bf16.msra.mxu0 %v9644_v46  ;;  %8011 = vmatpush3.bf16.msra.mxu1 %v9647_v48 }
 0x3d2   :  { %8018 = vmatprep.subr.bf16.mxu1 %v9651_v60 }
 0x3d6   :  { %4791 = vmatmul.mubr.bf16.gmra.mrb[76].mxu1 %v11474_v11 }
 0x3d7   :  { %5349 = vmatmul.mubr.bf16.gmra.mrb[108].mxu0 %v11474_v11  ;;  %v9646_v11 = vld [vmem:[#allocation10 + $0x1e0] sm:$0xff]  }
 0x3d8   :  { %8070 = vmatprep.subr.bf16.mxu0 %v9646_v11 }
 0x3d9   :  { %8071 = vmatpush3.bf16.msra.mxu0 %v9648_v0 }
 0x3da   :  { %8072 = vmatprep.subr.bf16.mxu0 %v9649_v59 }
 0x3dd   :  { %8073 = vmatpush3.bf16.msra.mxu0 %v9650_v26 }
 0x3de   :  { %8074 = vmatprep.subr.bf16.mxu0 %v9653_v27 }
 0x3e1   :  { %8075 = vmatpush3.bf16.msra.mxu0 %v9654_v53 }
 0x3e2   :  { %8076 = vmatprep.subr.bf16.mxu0 %v9657_v3 }
 0x3e5   :  { %8077 = vmatpush3.bf16.msra.mxu0 %v9658_v34 }
 0x3e6   :  { %8106 = vmatprep.subr.bf16.mxu0 %v9661_v63 }
 0x481   :  { %v4742_v31 = vpop.f32.mrb[56].mxu1 }
 0x482   :  { %v8373_v12 = vadd.f32 %v4742_v31, %v11603_v36  ;;  %v5300_v38 = vpop.f32.mrb[88].mxu0  ;;  %v4744_v8 = vpop.f32.mrb[57].mxu1 }
 0x483   :  { %v8397_v9 = vadd.f32 %v5300_v38, %v11606_v45  ;;  %v8374_v19 = vadd.f32 %v4744_v8, %v11609_v57  ;;  %v5302_v2 = vpop.f32.mrb[89].mxu0  ;;  %v4746_v16 = vpop.f32.mrb[58].mxu1  ;;  %v9652_v8 = vld [vmem:[#allocation10 + $0x80] sm:$0xff]  }
 0x484   :  { %vm5359_vm11 = vcmp.gt.f32.partialorder %v8373_v12, 1e-06  ;;  %v8398_v5 = vadd.f32 %v5302_v2, %v11611_v14  ;;  %v8375_v35 = vadd.f32 %v4746_v16, %v11603_v36  ;;  %v5304_v50 = vpop.f32.mrb[90].mxu0  ;;  %v4748_v43 = vpop.f32.mrb[59].mxu1 }
 0x485   :  { %vm5361_vm12 = vcmp.gt.f32.partialorder %v8397_v9, 1e-06  ;;  %v8399_v62 = vadd.f32 %v5304_v50, %v11606_v45  ;;  %v5306_v22 = vpop.f32.mrb[91].mxu0  ;;  %v5407_v42 = vsel %vm5359_vm11, %v8373_v12, 0.0  ;;  %vm5360_vm13 = vcmp.gt.f32.partialorder %v8374_v19, 1e-06 }
 0x486   :  { %vm5363_vm14 = vcmp.gt.f32.partialorder %v8375_v35, 1e-06  ;;  %vm5362_vm15 = vcmp.gt.f32.partialorder %v8398_v5, 1e-06  ;;  %v8376_v37 = vadd.f32 %v4748_v43, %v11609_v57  ;;  %v5409_v10 = vsel %vm5361_vm12, %v8397_v9, 0.0 }
 0x487   :  { %v5411_v41 = vsel %vm5363_vm14, %v8375_v35, 0.0  ;;  %vm5365_vm0 = vcmp.gt.f32.partialorder %v8399_v62, 1e-06  ;;  %v8400_v6 = vadd.f32 %v5306_v22, %v11611_v14  ;;  %v5408_v1 = vsel %vm5360_vm13, %v8374_v19, 0.0  ;;  %v9655_v19 = vld [vmem:[#allocation10 + $0xc8] sm:$0xff]  }
 0x488   :  { %v5455_v29 = vmax.f32 %v5407_v42, %v5411_v41  ;;  %v5413_v47 = vsel %vm5365_vm0, %v8399_v62, 0.0  ;;  %vm5364_vm1 = vcmp.gt.f32.partialorder %v8376_v37, 1e-06  ;;  %v5410_v4 = vsel %vm5362_vm15, %v8398_v5, 0.0 }
 0x489   :  { %v5457_v7 = vmax.f32 %v5409_v10, %v5413_v47  ;;  %v4752_v40 = vpop.f32.mrb[60].mxu1  ;;  %v5412_v20 = vsel %vm5364_vm1, %v8376_v37, 0.0  ;;  %vm5366_vm2 = vcmp.gt.f32.partialorder %v8400_v6, 1e-06 }
 0x48a   :  { %v8377_v17 = vadd.f32 %v4752_v40, %v11603_v36  ;;  %v5310_v32 = vpop.f32.mrb[92].mxu0  ;;  %v4754_v58 = vpop.f32.mrb[61].mxu1  ;;  %v5456_v51 = vmax.f32 %v5408_v1, %v5412_v20  ;;  %v5414_v61 = vsel %vm5366_vm2, %v8400_v6, 0.0  ;;  %v9656_v1 = vld [vmem:[#allocation10 + $0x88] sm:$0xff]   ;;  %v9659_v20 = vld [vmem:[#allocation10 + $0xd0] sm:$0xff]  }
 0x48b   :  { %v8401_v56 = vadd.f32 %v5310_v32, %v11606_v45  ;;  %v8378_v21 = vadd.f32 %v4754_v58, %v11609_v57  ;;  %v5312_v13 = vpop.f32.mrb[93].mxu0  ;;  %v4756_v24 = vpop.f32.mrb[62].mxu1  ;;  %v5458_v55 = vmax.f32 %v5410_v4, %v5414_v61 }
 0x48c   :  { %vm5367_vm3 = vcmp.gt.f32.partialorder %v8377_v17, 1e-06  ;;  %v8402_v25 = vadd.f32 %v5312_v13, %v11611_v14  ;;  %v8379_v52 = vadd.f32 %v4756_v24, %v11603_v36  ;;  %v5314_v28 = vpop.f32.mrb[94].mxu0  ;;  %v4758_v54 = vpop.f32.mrb[63].mxu1  ;;  %v9660_v13 = vld [vmem:[#allocation10 + $0x90] sm:$0xff]   ;;  %v9663_v24 = vld [vmem:[#allocation10 + $0xd8] sm:$0xff]  }
 0x48d   :  { %v5415_v30 = vsel %vm5367_vm3, %v8377_v17, 0.0  ;;  %vm5369_vm4 = vcmp.gt.f32.partialorder %v8401_v56, 1e-06  ;;  %vm5368_vm5 = vcmp.gt.f32.partialorder %v8378_v21, 1e-06  ;;  %v8403_v46 = vadd.f32 %v5314_v28, %v11606_v45  ;;  %v5316_v11 = vpop.f32.mrb[95].mxu0 }
 0x48e   :  { %v5471_v0 = vmax.f32 %v5455_v29, %v5415_v30  ;;  %v5417_v15 = vsel %vm5369_vm4, %v8401_v56, 0.0  ;;  %v5416_v48 = vsel %vm5368_vm5, %v8378_v21, 0.0  ;;  %vm5370_vm6 = vcmp.gt.f32.partialorder %v8402_v25, 1e-06 }
 0x48f   :  { %v11627_v59 = vmax.f32 %v5457_v7, %v5417_v15  ;;  %v5472_v26 = vmax.f32 %v5456_v51, %v5416_v48  ;;  %v5418_v60 = vsel %vm5370_vm6, %v8402_v25, 0.0  ;;  %vm5371_vm7 = vcmp.gt.f32.partialorder %v8379_v52, 1e-06 }
 0x490   :  { %v5474_v27 = vmax.f32 %v5458_v55, %v5418_v60  ;;  %vm5373_vm8 = vcmp.gt.f32.partialorder %v8403_v46, 1e-06  ;;  %v5744_v53 = vpack.c.bf16 %v5471_v0, %v5471_v0  ;;  %v5419_v3 = vsel %vm5371_vm7, %v8379_v52, 0.0 }
 0x491   :  { %v8380_v34 = vadd.f32 %v4758_v54, %v11609_v57  ;;  %v8404_v63 = vadd.f32 %v5316_v11, %v11611_v14  ;;  %v4762_v39 = vpop.f32.mrb[64].mxu1  ;;  %v5421_v44 = vsel %vm5373_vm8, %v8403_v46, 0.0  ;;  %v5745_v38 = vpack.c.bf16 %v5472_v26, %v5472_v26 }
 0x492   :  { %v8381_v23 = vadd.f32 %v4762_v39, %v11603_v36  ;;  %v5320_v31 = vpop.f32.mrb[96].mxu0  ;;  %v4764_v12 = vpop.f32.mrb[65].mxu1  ;;  %v5747_v9 = vpack.c.bf16 %v5474_v27, %v5474_v27 }
 0x493   :  { %vm5372_vm9 = vcmp.gt.f32.partialorder %v8380_v34, 1e-06  ;;  %vm5374_vm10 = vcmp.gt.f32.partialorder %v8404_v63, 1e-06  ;;  %v8405_v2 = vadd.f32 %v5320_v31, %v11606_v45  ;;  %v8382_v16 = vadd.f32 %v4764_v12, %v11609_v57  ;;  %v5322_v5 = vpop.f32.mrb[97].mxu0  ;;  %v4766_v35 = vpop.f32.mrb[66].mxu1  ;;  %6566 = vmatprep.mubr.bf16.mxu1 %v5745_v38 }
 0x494   :  { %v5420_v50 = vsel %vm5372_vm9, %v8380_v34, 0.0  ;;  %v5422_v43 = vsel %vm5374_vm10, %v8404_v63, 0.0  ;;  %vm5375_vm11 = vcmp.gt.f32.partialorder %v8381_v23, 1e-06  ;;  %v8406_v62 = vadd.f32 %v5322_v5, %v11611_v14  ;;  %v5324_v22 = vpop.f32.mrb[98].mxu0  ;;  %v4768_v42 = vpop.f32.mrb[67].mxu1  ;;  %6567 = vmatmul.mubr.bf16.vlgmr.msra.gmra.mrb[80].mxu1 %v5744_v53 }
 0x495   :  { %v5423_v41 = vsel %vm5375_vm11, %v8381_v23, 0.0  ;;  %vm5377_vm12 = vcmp.gt.f32.partialorder %v8405_v2, 1e-06  ;;  %vm5376_vm13 = vcmp.gt.f32.partialorder %v8382_v16, 1e-06  ;;  %v8383_v37 = vadd.f32 %v4766_v35, %v11603_v36  ;;  %v5326_v10 = vpop.f32.mrb[99].mxu0  ;;  %8019 = vmatpush3.bf16.msra.mxu1 %v9652_v8  ;;  %6606 = vmatprep.mubr.bf16.mxu1 %v5747_v9 }
 0x496   :  { %v5459_v29 = vmax.f32 %v5419_v3, %v5423_v41  ;;  %v5425_v47 = vsel %vm5377_vm12, %v8405_v2, 0.0  ;;  %v5424_v6 = vsel %vm5376_vm13, %v8382_v16, 0.0  ;;  %vm5378_vm14 = vcmp.gt.f32.partialorder %v8406_v62, 1e-06  ;;  %8020 = vmatprep.subr.bf16.mxu1 %v9655_v19  ;;  %v9664_v31 = vld [vmem:[#allocation10 + $0x98] sm:$0xff]   ;;  %v9667_v8 = vld [vmem:[#allocation10 + $0xe0] sm:$0xff]  }
 0x497   :  { %v5461_v7 = vmax.f32 %v5421_v44, %v5425_v47  ;;  %v5460_v40 = vmax.f32 %v5420_v50, %v5424_v6  ;;  %v5426_v4 = vsel %vm5378_vm14, %v8406_v62, 0.0  ;;  %vm5379_vm15 = vcmp.gt.f32.partialorder %v8383_v37, 1e-06  ;;  %v9668_v2 = vld [vmem:[#allocation10 + $0xa0] sm:$0xff]  }
 0x498   :  { %v5462_v17 = vmax.f32 %v5422_v43, %v5426_v4  ;;  %v5427_v32 = vsel %vm5379_vm15, %v8383_v37, 0.0  ;;  %v8407_v58 = vadd.f32 %v5324_v22, %v11606_v45  ;;  %v8384_v51 = vadd.f32 %v4768_v42, %v11609_v57 }
 0x499   :  { %v11638_v61 = vmax.f32 %v5459_v29, %v5427_v32  ;;  %v8408_v56 = vadd.f32 %v5326_v10, %v11611_v14  ;;  %v4772_v21 = vpop.f32.mrb[68].mxu1  ;;  %8021 = vmatpush3.bf16.msra.mxu1 %v9656_v1  ;;  %v9662_v29 = vld [vmem:[#allocation10 + $0x280] sm:$0xff]   ;;  %v9671_v1 = vld [vmem:[#allocation10 + $0xe8] sm:$0xff]  }
 0x49a   :  { %vm5381_vm0 = vcmp.gt.f32.partialorder %v8407_v58, 1e-06  ;;  %vm5380_vm1 = vcmp.gt.f32.partialorder %v8384_v51, 1e-06  ;;  %v8385_v55 = vadd.f32 %v4772_v21, %v11603_v36  ;;  %v5330_v25 = vpop.f32.mrb[100].mxu0  ;;  %v4774_v52 = vpop.f32.mrb[69].mxu1  ;;  %8022 = vmatprep.subr.bf16.mxu1 %v9659_v20 }
 0x49b   :  { %v5429_v28 = vsel %vm5381_vm0, %v8407_v58, 0.0  ;;  %v5428_v54 = vsel %vm5380_vm1, %v8384_v51, 0.0  ;;  %vm5382_vm2 = vcmp.gt.f32.partialorder %v8408_v56, 1e-06  ;;  %v5332_v30 = vpop.f32.mrb[101].mxu0  ;;  %v4776_v46 = vpop.f32.mrb[70].mxu1  ;;  %v8409_v53 = vadd.f32 %v5330_v25, %v11606_v45 }
 0x49c   :  { %v11642_v11 = vmax.f32 %v5461_v7, %v5429_v28  ;;  %v11644_v0 = vmax.f32 %v5460_v40, %v5428_v54  ;;  %v5430_v15 = vsel %vm5382_vm2, %v8408_v56, 0.0  ;;  %vm5383_vm3 = vcmp.gt.f32.partialorder %v8385_v55, 1e-06  ;;  %v5334_v48 = vpop.f32.mrb[102].mxu0  ;;  %v4778_v26 = vpop.f32.mrb[71].mxu1  ;;  %v9665_v20 = vld [vmem:[#allocation10 + $0x2c8] sm:$0xff]  }
 0x49d   :  { %v5478_v60 = vmax.f32 %v5462_v17, %v5430_v15  ;;  %v11646_v27 = vsel %vm5383_vm3, %v8385_v55, 0.0  ;;  %v8386_v3 = vadd.f32 %v4774_v52, %v11609_v57  ;;  %v5336_v34 = vpop.f32.mrb[103].mxu0  ;;  %v8410_v39 = vadd.f32 %v5332_v30, %v11611_v14  ;;  %8023 = vmatpush3.bf16.msra.mxu1 %v9660_v13  ;;  %v9666_v56 = vld [vmem:[#allocation10 + $0x288] sm:$0xff]  }
 0x49e   :  { %v5750_v63 = vpack.c.bf16 %v11642_v11, %v11642_v11  ;;  %v8387_v44 = vadd.f32 %v4776_v46, %v11603_v36  ;;  %v8411_v23 = vadd.f32 %v5334_v48, %v11606_v45  ;;  %vm5385_vm4 = vcmp.gt.f32.partialorder %v8409_v53, 1e-06  ;;  %8024 = vmatprep.subr.bf16.mxu1 %v9663_v24  ;;  %v9672_v25 = vld [vmem:[#allocation10 + $0xa8] sm:$0xff]   ;;  %v9675_v46 = vld [vmem:[#allocation10 + $0xf0] sm:$0xff]  }
 0x49f   :  { %vm5384_vm5 = vcmp.gt.f32.partialorder %v8386_v3, 1e-06  ;;  %v8388_v12 = vadd.f32 %v4778_v26, %v11609_v57  ;;  %v8412_v38 = vadd.f32 %v5336_v34, %v11611_v14  ;;  %v5433_v9 = vsel %vm5385_vm4, %v8409_v53, 0.0 }
 0x4a0   :  { %v5432_v19 = vsel %vm5384_vm5, %v8386_v3, 0.0  ;;  %vm5386_vm6 = vcmp.gt.f32.partialorder %v8410_v39, 1e-06  ;;  %vm5387_vm7 = vcmp.gt.f32.partialorder %v8387_v44, 1e-06  ;;  %v5751_v10 = vpack.c.bf16 %v5478_v60, %v5478_v60  ;;  %v9669_v60 = vld [vmem:[#allocation10 + $0x2d0] sm:$0xff]  }
 0x4a1   :  { %v5434_v16 = vsel %vm5386_vm6, %v8410_v39, 0.0  ;;  %v5435_v5 = vsel %vm5387_vm7, %v8387_v44, 0.0  ;;  %vm5389_vm8 = vcmp.gt.f32.partialorder %v8411_v23, 1e-06  ;;  %vm5388_vm9 = vcmp.gt.f32.partialorder %v8388_v12, 1e-06  ;;  %8025 = vmatpush3.bf16.msra.mxu1 %v9664_v31 }
 0x4a2   :  { %v5463_v35 = vmax.f32 %v11646_v27, %v5435_v5  ;;  %v5437_v50 = vsel %vm5389_vm8, %v8411_v23, 0.0  ;;  %v5436_v43 = vsel %vm5388_vm9, %v8388_v12, 0.0  ;;  %vm5390_vm10 = vcmp.gt.f32.partialorder %v8412_v38, 1e-06  ;;  %v4782_v62 = vpop.f32.mrb[72].mxu1  ;;  %v5340_v22 = vpop.f32.mrb[104].mxu0  ;;  %8026 = vmatprep.subr.bf16.mxu1 %v9667_v8  ;;  %6686 = vmatprep.mubr.bf16.mxu0 %v5751_v10 }
 0x4a3   :  { %v5465_v42 = vmax.f32 %v5433_v9, %v5437_v50  ;;  %v5464_v41 = vmax.f32 %v5432_v19, %v5436_v43  ;;  %v5438_v37 = vsel %vm5390_vm10, %v8412_v38, 0.0  ;;  %v4784_v47 = vpop.f32.mrb[73].mxu1  ;;  %v5342_v6 = vpop.f32.mrb[105].mxu0  ;;  %v8389_v40 = vadd.f32 %v4782_v62, %v11603_v36  ;;  %6687 = vmatmul.mubr.bf16.vlgmr.msra.gmra.mrb[112].mxu0 %v5750_v63  ;;  %v9676_v63 = vld [vmem:[#allocation10 + $0xb0] sm:$0xff]   ;;  %v9679_v9 = vld [vmem:[#allocation10 + $0xf8] sm:$0xff]  }
 0x4a4   :  { %v5466_v7 = vmax.f32 %v5434_v16, %v5438_v37  ;;  %v8413_v4 = vadd.f32 %v5340_v22, %v11606_v45  ;;  %v8390_v17 = vadd.f32 %v4784_v47, %v11609_v57  ;;  %v4786_v32 = vpop.f32.mrb[74].mxu1  ;;  %v5344_v58 = vpop.f32.mrb[106].mxu0  ;;  %v8414_v51 = vadd.f32 %v5342_v6, %v11611_v14  ;;  %8107 = vmatpush3.bf16.msra.mxu0 %v9662_v29  ;;  %v9670_v23 = vld [vmem:[#allocation10 + $0x290] sm:$0xff]   ;;  %v9680_v62 = vld [vmem:[#allocation10 + $0xb8] sm:$0xff]  }
 0x4a5   :  { %v8391_v21 = vadd.f32 %v4786_v32, %v11603_v36  ;;  %v8415_v13 = vadd.f32 %v5344_v58, %v11606_v45  ;;  %v4788_v24 = vpop.f32.mrb[75].mxu1  ;;  %v5346_v55 = vpop.f32.mrb[107].mxu0  ;;  %vm5391_vm11 = vcmp.gt.f32.partialorder %v8389_v40, 1e-06  ;;  %8027 = vmatpush3.bf16.msra.mxu1 %v9668_v2  ;;  %8108 = vmatprep.subr.bf16.mxu0 %v9665_v20  ;;  %v9673_v2 = vld [vmem:[#allocation10 + $0x2d8] sm:$0xff]  }
 0x4a6   :  { %vm5393_vm12 = vcmp.gt.f32.partialorder %v8413_v4, 1e-06  ;;  %vm5392_vm13 = vcmp.gt.f32.partialorder %v8390_v17, 1e-06  ;;  %v8392_v52 = vadd.f32 %v4788_v24, %v11609_v57  ;;  %v5439_v28 = vsel %vm5391_vm11, %v8389_v40, 0.0  ;;  %8028 = vmatprep.subr.bf16.mxu1 %v9671_v1  ;;  %v9674_v1 = vld [vmem:[#allocation10 + $0x298] sm:$0xff]  }
 0x4a7   :  { %v5441_v54 = vsel %vm5393_vm12, %v8413_v4, 0.0  ;;  %v5440_v30 = vsel %vm5392_vm13, %v8390_v17, 0.0  ;;  %vm5394_vm14 = vcmp.gt.f32.partialorder %v8414_v51, 1e-06  ;;  %v11665_v11 = vmax.f32 %v5463_v35, %v5439_v28  ;;  %v9683_v40 = vld [vmem:[#allocation10 + $0x140] sm:$0xff]  }
 0x4a8   :  { %v11667_v15 = vmax.f32 %v5465_v42, %v5441_v54  ;;  %v11669_v48 = vmax.f32 %v5464_v41, %v5440_v30  ;;  %v5442_v26 = vsel %vm5394_vm14, %v8414_v51, 0.0  ;;  %vm5395_vm15 = vcmp.gt.f32.partialorder %v8391_v21, 1e-06  ;;  %8109 = vmatpush3.bf16.msra.mxu0 %v9666_v56  ;;  %v9677_v17 = vld [vmem:[#allocation10 + $0x2e0] sm:$0xff]  }
 0x4a9   :  { %v5482_v27 = vmax.f32 %v5466_v7, %v5442_v26  ;;  %vm5397_vm0 = vcmp.gt.f32.partialorder %v8415_v13, 1e-06  ;;  %vm5396_vm1 = vcmp.gt.f32.partialorder %v8392_v52, 1e-06  ;;  %v5443_v53 = vsel %vm5395_vm15, %v8391_v21, 0.0  ;;  %8029 = vmatpush3.bf16.msra.mxu1 %v9672_v25  ;;  %v4792_v3 = vpop.f32.mrb[76].mxu1  ;;  %8110 = vmatprep.subr.bf16.mxu0 %v9669_v60 }
 0x4aa   :  { %v5350_v34 = vpop.f32.mrb[108].mxu0  ;;  %v5445_v39 = vsel %vm5397_vm0, %v8415_v13, 0.0  ;;  %v8416_v44 = vadd.f32 %v5346_v55, %v11611_v14  ;;  %v8393_v31 = vadd.f32 %v4792_v3, %v11603_v36  ;;  %v4794_v38 = vpop.f32.mrb[77].mxu1  ;;  %8030 = vmatprep.subr.bf16.mxu1 %v9675_v46  ;;  %v5444_v19 = vsel %vm5396_vm1, %v8392_v52, 0.0  ;;  %v9678_v13 = vld [vmem:[#allocation10 + $0x2a0] sm:$0xff]   ;;  %v9682_v26 = vld [vmem:[#allocation10 + $0x2a8] sm:$0xff]  }
 0x4ab   :  { %v8417_v12 = vadd.f32 %v5350_v34, %v11606_v45  ;;  %v5352_v8 = vpop.f32.mrb[109].mxu0  ;;  %v8394_v16 = vadd.f32 %v4794_v38, %v11609_v57  ;;  %v4796_v35 = vpop.f32.mrb[78].mxu1  ;;  %v5755_v43 = vpack.c.bf16 %v5482_v27, %v5482_v27  ;;  %v9684_v24 = vld [vmem:[#allocation10 + $0x100] sm:$0xff]   ;;  %v5746_v55 = vpack.c.bf16 %v11627_v59, %v11627_v59  ;;  %v9688_v59 = vld [vmem:[#allocation10 + $0x108] sm:$0xff]   ;;  %v9691_v60 = vld [vmem:[#allocation10 + $0x150] sm:$0xff]  }
 0x4ac   :  { %v8418_v5 = vadd.f32 %v5352_v8, %v11611_v14  ;;  %v5354_v50 = vpop.f32.mrb[110].mxu0  ;;  %vm5398_vm2 = vcmp.gt.f32.partialorder %v8416_v44, 1e-06  ;;  %vm5399_vm3 = vcmp.gt.f32.partialorder %v8393_v31, 1e-06  ;;  %v8395_v22 = vadd.f32 %v4796_v35, %v11603_v36  ;;  %v4798_v10 = vpop.f32.mrb[79].mxu1  ;;  %8111 = vmatpush3.bf16.msra.mxu0 %v9670_v23 }
 0x4ad   :  { %vm5401_vm4 = vcmp.gt.f32.partialorder %v8417_v12, 1e-06  ;;  %v5446_v42 = vsel %vm5398_vm2, %v8416_v44, 0.0  ;;  %v5447_v41 = vsel %vm5399_vm3, %v8393_v31, 0.0  ;;  %vm5400_vm5 = vcmp.gt.f32.partialorder %v8394_v16, 1e-06  ;;  %6766 = vmatprep.mubr.bf16.mxu0 %v5755_v43  ;;  %8031 = vmatpush3.bf16.msra.mxu1 %v9676_v63 }
 0x4ae   :  { %v5449_v37 = vsel %vm5401_vm4, %v8417_v12, 0.0  ;;  %v5467_v29 = vmax.f32 %v5443_v53, %v5447_v41  ;;  %v5448_v6 = vsel %vm5400_vm5, %v8394_v16, 0.0  ;;  %vm5402_vm6 = vcmp.gt.f32.partialorder %v8418_v5, 1e-06  ;;  %v5356_v7 = vpop.f32.mrb[111].mxu0  ;;  %8032 = vmatprep.subr.bf16.mxu1 %v9679_v9  ;;  %8112 = vmatprep.subr.bf16.mxu0 %v9673_v2  ;;  %v9685_v27 = vld [vmem:[#allocation10 + $0x2f0] sm:$0xff]  }
 0x4af   :  { %v5469_v47 = vmax.f32 %v5445_v39, %v5449_v37  ;;  %v5468_v4 = vmax.f32 %v5444_v19, %v5448_v6  ;;  %v5450_v20 = vsel %vm5402_vm6, %v8418_v5, 0.0  ;;  %vm5403_vm7 = vcmp.gt.f32.partialorder %v8395_v22, 1e-06  ;;  %v9692_v53 = vld [vmem:[#allocation10 + $0x110] sm:$0xff]   ;;  %v9695_v34 = vld [vmem:[#allocation10 + $0x158] sm:$0xff]   ;;  %v9699_v44 = vld [vmem:[#allocation10 + $0x160] sm:$0xff]  }
 0x4b0   :  { %v8419_v36 = vadd.f32 %v5354_v50, %v11606_v45  ;;  %v5470_v32 = vmax.f32 %v5446_v42, %v5450_v20  ;;  %v5451_v58 = vsel %vm5403_vm7, %v8395_v22, 0.0  ;;  %v8396_v51 = vadd.f32 %v4798_v10, %v11609_v57  ;;  %8113 = vmatpush3.bf16.msra.mxu0 %v9674_v1  ;;  %v9687_v45 = vld [vmem:[#allocation10 + $0x148] sm:$0xff]   ;;  %v9686_v3 = vld [vmem:[#allocation10 + $0x2b0] sm:$0xff]   ;;  %v9696_v63 = vld [vmem:[#allocation10 + $0x118] sm:$0xff]  }
 0x4b1   :  { %v8420_v56 = vadd.f32 %v5356_v7, %v11611_v14  ;;  %v11681_v21 = vmax.f32 %v5467_v29, %v5451_v58  ;;  %8033 = vmatpush3.bf16.msra.mxu1 %v9680_v62  ;;  %8114 = vmatprep.subr.bf16.mxu0 %v9677_v17  ;;  %v9681_v14 = vld [vmem:[#allocation10 + $0x2e8] sm:$0xff]   ;;  %v5749_v54 = vpack.c.bf16 %v11644_v0, %v11644_v0  ;;  %v9689_v0 = vld [vmem:[#allocation10 + $0x2f8] sm:$0xff]   ;;  %v9693_v23 = vld [vmem:[#allocation10 + $0x3c0] sm:$0xff]   ;;  %vm10117_vm11 = vmmov 0  }
 0x4b2   :  { %vm5405_vm8 = vcmp.gt.f32.partialorder %v8419_v36, 1e-06  ;;  %vm5404_vm9 = vcmp.gt.f32.partialorder %v8396_v51, 1e-06  ;;  %8040 = vmatprep.subr.bf16.mxu1 %v9683_v40  ;;  %v9690_v39 = vld [vmem:[#allocation10 + $0x2b8] sm:$0xff]   ;;  %v9700_v31 = vld [vmem:[#allocation10 + $0x120] sm:$0xff]   ;;  %v5754_v38 = vpack.c.bf16 %v11667_v15, %v11667_v15  ;;  %v5748_v29 = vpack.c.bf16 %v11638_v61, %v11638_v61 }
 0x4b3   :  { %v5453_v25 = vsel %vm5405_vm8, %v8419_v36, 0.0  ;;  %vm5406_vm10 = vcmp.gt.f32.partialorder %v8420_v56, 1e-06  ;;  %v5452_v57 = vsel %vm5404_vm9, %v8396_v51, 0.0  ;;  %v9694_v12 = vld [vmem:[#allocation10 + $0x380] sm:$0xff]   ;;  %v9697_v8 = vld [vmem:[#allocation10 + $0x3c8] sm:$0xff]   ;;  %v5753_v7 = vpack.c.bf16 %v11669_v48, %v11669_v48 }
 0x4b4   :  { %v11685_v52 = vmax.f32 %v5469_v47, %v5453_v25  ;;  %v5454_v28 = vsel %vm5406_vm10, %v8420_v56, 0.0  ;;  %v11689_v30 = vmax.f32 %v5468_v4, %v5452_v57  ;;  %6607 = vmatmul.mubr.bf16.vlgmr.msra.gmra.mrb[84].mxu1 %v5746_v55  ;;  %8115 = vmatpush3.bf16.msra.mxu0 %v9678_v13  ;;  %v9703_v9 = vld [vmem:[#allocation10 + $0x168] sm:$0xff]   ;;  %v9707_v5 = vld [vmem:[#allocation10 + $0x170] sm:$0xff]   ;;  %v9711_v15 = vld [vmem:[#allocation10 + $0x178] sm:$0xff]  }
 0x4b5   :  { %v5486_v46 = vmax.f32 %v5470_v32, %v5454_v28  ;;  %8041 = vmatpush3.bf16.msra.mxu1 %v9684_v24  ;;  %6646 = vmatprep.mubr.bf16.mxu1 %v5749_v54  ;;  %v9704_v2 = vld [vmem:[#allocation10 + $0x128] sm:$0xff]   ;;  %v9701_v35 = vld [vmem:[#allocation10 + $0x3d0] sm:$0xff]   ;;  %v9705_v62 = vld [vmem:[#allocation10 + $0x3d8] sm:$0xff]  }
 0x4b6   :  { %8042 = vmatprep.subr.bf16.mxu1 %v9687_v45  ;;  %8116 = vmatprep.subr.bf16.mxu0 %v9681_v14  ;;  %v9698_v16 = vld [vmem:[#allocation10 + $0x388] sm:$0xff]   ;;  %v9708_v50 = vld [vmem:[#allocation10 + $0x130] sm:$0xff]   ;;  %v9712_v22 = vld [vmem:[#allocation10 + $0x138] sm:$0xff]   ;;  %v5758_v55 = vpack.c.bf16 %v11685_v52, %v11685_v52 }
 0x4b7   :  { %v5759_v19 = vpack.c.bf16 %v5486_v46, %v5486_v46  ;;  %v9702_v43 = vld [vmem:[#allocation10 + $0x390] sm:$0xff]   ;;  %v9706_v42 = vld [vmem:[#allocation10 + $0x398] sm:$0xff]   ;;  %v9715_v41 = vld [vmem:[#allocation10 + $0x240] sm:$0xff]  }
 0x4b8   :  { %8117 = vmatpush3.bf16.msra.mxu0 %v9682_v26  ;;  %v9709_v37 = vld [vmem:[#allocation10 + $0x3e0] sm:$0xff]   ;;  %v9719_v6 = vld [vmem:[#allocation10 + $0x248] sm:$0xff]   ;;  %v9723_v20 = vld [vmem:[#allocation10 + $0x250] sm:$0xff]   ;;  %v5757_v26 = vpack.c.bf16 %v11689_v30, %v11689_v30 }
 0x4b9   :  { %8043 = vmatpush3.bf16.msra.mxu1 %v9688_v59  ;;  %8118 = vmatprep.subr.bf16.mxu0 %v9685_v27  ;;  %v9716_v10 = vld [vmem:[#allocation10 + $0x200] sm:$0xff]   ;;  %v9713_v1 = vld [vmem:[#allocation10 + $0x3e8] sm:$0xff]   ;;  %v9717_v36 = vld [vmem:[#allocation10 + $0x3f0] sm:$0xff]   ;;  %v5752_v59 = vpack.c.bf16 %v11665_v11, %v11665_v11 }
 0x4ba   :  { %8044 = vmatprep.subr.bf16.mxu1 %v9691_v60  ;;  %v9710_v47 = vld [vmem:[#allocation10 + $0x3a0] sm:$0xff]   ;;  %v9720_v40 = vld [vmem:[#allocation10 + $0x208] sm:$0xff]   ;;  %v9724_v61 = vld [vmem:[#allocation10 + $0x210] sm:$0xff]  }
 0x4bb   :  { %v9714_v4 = vld [vmem:[#allocation10 + $0x3a8] sm:$0xff]   ;;  %v9718_v17 = vld [vmem:[#allocation10 + $0x3b0] sm:$0xff]   ;;  %v9725_v32 = vld [vmem:[#allocation10 + $0x258] sm:$0xff]  }
 0x4bc   :  { %8119 = vmatpush3.bf16.msra.mxu0 %v9686_v3  ;;  %v9721_v58 = vld [vmem:[#allocation10 + $0x3f8] sm:$0xff]   ;;  %v9727_v56 = vld [vmem:[#allocation10 + $0x260] sm:$0xff]   ;;  %v9729_v24 = vld [vmem:[#allocation10 + $0x268] sm:$0xff]  }
 0x4bd   :  { %8045 = vmatpush3.bf16.msra.mxu1 %v9692_v53  ;;  %8120 = vmatprep.subr.bf16.mxu0 %v9689_v0  ;;  %v9726_v48 = vld [vmem:[#allocation10 + $0x218] sm:$0xff]   ;;  %v9728_v13 = vld [vmem:[#allocation10 + $0x220] sm:$0xff]   ;;  %v9730_v25 = vld [vmem:[#allocation10 + $0x228] sm:$0xff]  }
 0x4be   :  { %8046 = vmatprep.subr.bf16.mxu1 %v9695_v34  ;;  %v9722_v51 = vld [vmem:[#allocation10 + $0x3b8] sm:$0xff]   ;;  %v9731_v45 = vld [vmem:[#allocation10 + $0x270] sm:$0xff]   ;;  %v9735_v54 = vld [vmem:[#allocation10 + $0x340] sm:$0xff]  }
 0x4bf   :  { %v9732_v57 = vld [vmem:[#allocation10 + $0x230] sm:$0xff]   ;;  %v9733_v28 = vld [vmem:[#allocation10 + $0x278] sm:$0xff]   ;;  %v9736_v46 = vld [vmem:[#allocation10 + $0x300] sm:$0xff]  }
 0x4c0   :  { %8121 = vmatpush3.bf16.msra.mxu0 %v9690_v39  ;;  %v9734_v14 = vld [vmem:[#allocation10 + $0x238] sm:$0xff]   ;;  %v9737_v52 = vld [vmem:[#allocation10 + $0x348] sm:$0xff]   ;;  %v9739_v27 = vld [vmem:[#allocation10 + $0x350] sm:$0xff]  }
 0x4c1   :  { %8047 = vmatpush3.bf16.msra.mxu1 %v9696_v63  ;;  %8150 = vmatprep.subr.bf16.mxu0 %v9693_v23  ;;  %v9738_v60 = vld [vmem:[#allocation10 + $0x308] sm:$0xff]   ;;  %v9740_v53 = vld [vmem:[#allocation10 + $0x310] sm:$0xff]   ;;  %v9741_v3 = vld [vmem:[#allocation10 + $0x358] sm:$0xff]  }
 0x4c2   :  { %8048 = vmatprep.subr.bf16.mxu1 %v9699_v44  ;;  %v9742_v34 = vld [vmem:[#allocation10 + $0x318] sm:$0xff]   ;;  %v9743_v0 = vld [vmem:[#allocation10 + $0x360] sm:$0xff]   ;;  %v9745_v63 = vld [vmem:[#allocation10 + $0x368] sm:$0xff]  }
 0x4c3   :  { %6767 = vmatmul.mubr.bf16.vlgmr.msra.gmra.mrb[116].mxu0 %v5754_v38  ;;  %v9744_v11 = vld [vmem:[#allocation10 + $0x320] sm:$0xff]   ;;  %v9746_v30 = vld [vmem:[#allocation10 + $0x328] sm:$0xff]   ;;  %v9747_v39 = vld [vmem:[#allocation10 + $0x370] sm:$0xff]   ;;  %v11775_v38 = vmov 0  }
 0x4c4   :  { %8151 = vmatpush3.bf16.msra.mxu0 %v9694_v12  ;;  %6846 = vmatprep.mubr.bf16.mxu0 %v5759_v19  ;;  %v9748_v44 = vld [vmem:[#allocation10 + $0x330] sm:$0xff]   ;;  %v9749_v23 = vld [vmem:[#allocation10 + $0x378] sm:$0xff]   ;;  %v5756_v12 = vpack.c.bf16 %v11681_v21, %v11681_v21  ;;  %v10116_v19 = vmov 0.0  }
 0x4c5   :  { %8049 = vmatpush3.bf16.msra.mxu1 %v9700_v31  ;;  %8152 = vmatprep.subr.bf16.mxu0 %v9697_v8  ;;  %v9750_v31 = vld [vmem:[#allocation10 + $0x338] sm:$0xff]   ;;  %v9751_v8 = vld [vmem:[#allocation13] ss:$12 sps:$4 sm:$0xff]  }
 0x4c6   :  { %8050 = vmatprep.subr.bf16.mxu1 %v9703_v9  ;;  %v9753_v9 = vld [vmem:[#allocation13 + $0x4] ss:$12 sps:$4 sm:$0xff]  }
 0x4c7   :  { %v9759_v21 = vld [vmem:[#allocation13 + $0x30] ss:$12 sps:$4 sm:$0xff]  }
 0x4c8   :  { %8153 = vmatpush3.bf16.msra.mxu0 %v9698_v16  ;;  %v9757_v16 = vld [vmem:[#allocation13 + $0x1c] ss:$12 sps:$4 sm:$0xff]  }
 0x4c9   :  { %8051 = vmatpush3.bf16.msra.mxu1 %v9704_v2  ;;  %8154 = vmatprep.subr.bf16.mxu0 %v9701_v35  ;;  %v9754_v2 = vld [vmem:[#allocation13 + $0x8] ss:$12 sps:$4 sm:$0xff]   ;;  %v9758_v35 = vld [vmem:[#allocation13 + $0x20] ss:$12 sps:$4 sm:$0xff]  }
 0x4ca   :  { %8052 = vmatprep.subr.bf16.mxu1 %v9707_v5  ;;  %v9755_v5 = vld [vmem:[#allocation13 + $0x18] ss:$12 sps:$4 sm:$0xff]  }
 0x4cc   :  { %8155 = vmatpush3.bf16.msra.mxu0 %v9702_v43  ;;  %v9762_v43 = vld [vmem:[#allocation13 + $0x38] ss:$12 sps:$4 sm:$0xff]  }
 0x4cd   :  { %8053 = vmatpush3.bf16.msra.mxu1 %v9708_v50  ;;  %8156 = vmatprep.subr.bf16.mxu0 %v9705_v62  ;;  %v9761_v50 = vld [vmem:[#allocation13 + $0x34] ss:$12 sps:$4 sm:$0xff]  }
 0x4ce   :  { %8054 = vmatprep.subr.bf16.mxu1 %v9711_v15  ;;  %v9765_v15 = vld [vmem:[#allocation13 + $0x4c] ss:$12 sps:$4 sm:$0xff]   ;;  %v9763_v62 = vld [vmem:[#allocation13 + $0x48] ss:$12 sps:$4 sm:$0xff]  }
 0x4d0   :  { %8157 = vmatpush3.bf16.msra.mxu0 %v9706_v42  ;;  %v9769_v42 = vld [vmem:[#allocation13 + $0x64] ss:$12 sps:$4 sm:$0xff]  }
 0x4d1   :  { %8055 = vmatpush3.bf16.msra.mxu1 %v9712_v22  ;;  %8158 = vmatprep.subr.bf16.mxu0 %v9709_v37  ;;  %v9766_v22 = vld [vmem:[#allocation13 + $0x50] ss:$12 sps:$4 sm:$0xff]   ;;  %v9770_v37 = vld [vmem:[#allocation13 + $0x68] ss:$12 sps:$4 sm:$0xff]  }
 0x4d2   :  { %8084 = vmatprep.subr.bf16.mxu1 %v9715_v41  ;;  %v9767_v41 = vld [vmem:[#allocation13 + $0x60] ss:$12 sps:$4 sm:$0xff]  }
 0x4d4   :  { %6647 = vmatmul.mubr.bf16.vlgmr.msra.gmra.mrb[88].mxu1 %v5748_v29  ;;  %8159 = vmatpush3.bf16.msra.mxu0 %v9710_v47  ;;  %v9771_v29 = vld [vmem:[#allocation13 + $0x78] ss:$12 sps:$4 sm:$0xff]   ;;  %v9774_v47 = vld [vmem:[#allocation13 + $0x80] ss:$12 sps:$4 sm:$0xff]  }
 0x4d5   :  { %8085 = vmatpush3.bf16.msra.mxu1 %v9716_v10  ;;  %6726 = vmatprep.mubr.bf16.mxu1 %v5753_v7  ;;  %v9773_v10 = vld [vmem:[#allocation13 + $0x7c] ss:$12 sps:$4 sm:$0xff]  }
 0x4d6   :  { %8086 = vmatprep.subr.bf16.mxu1 %v9719_v6  ;;  %8160 = vmatprep.subr.bf16.mxu0 %v9713_v1 }
 0x4d8   :  { %8161 = vmatpush3.bf16.msra.mxu0 %v9714_v4 }
 0x4d9   :  { %8087 = vmatpush3.bf16.msra.mxu1 %v9720_v40  ;;  %8162 = vmatprep.subr.bf16.mxu0 %v9717_v36  ;;  %v9775_v36 = vld [vmem:[#allocation13 + $0x90] ss:$12 sps:$4 sm:$0xff]  }
 0x4da   :  { %8088 = vmatprep.subr.bf16.mxu1 %v9723_v20  ;;  %v9777_v20 = vld [vmem:[#allocation13 + $0x94] ss:$12 sps:$4 sm:$0xff]  }
 0x4dc   :  { %8163 = vmatpush3.bf16.msra.mxu0 %v9718_v17  ;;  %v9781_v17 = vld [vmem:[#allocation13 + $0xac] ss:$12 sps:$4 sm:$0xff]  }
 0x4dd   :  { %8089 = vmatpush3.bf16.msra.mxu1 %v9724_v61  ;;  %8164 = vmatprep.subr.bf16.mxu0 %v9721_v58  ;;  %v9778_v61 = vld [vmem:[#allocation13 + $0x98] ss:$12 sps:$4 sm:$0xff]   ;;  %v9779_v58 = vld [vmem:[#allocation13 + $0xa8] ss:$12 sps:$4 sm:$0xff]  }
 0x4de   :  { %8090 = vmatprep.subr.bf16.mxu1 %v9725_v32  ;;  %v7116_v32 = vld [vmem:[#allocation14 + $0x8] sm:$0xff] }
 0x4e0   :  { %8165 = vmatpush3.bf16.msra.mxu0 %v9722_v51  ;;  %v7119_v51 = vld [vmem:[#allocation14 + $0x20] sm:$0xff] }
 0x4e1   :  { %8091 = vmatpush3.bf16.msra.mxu1 %v9726_v48  ;;  %8254 = vmatprep.subr.bf16.mxu0 %v10116_v19  ;;  %v9782_v48 = vld [vmem:[#allocation13 + $0xb0] ss:$12 sps:$4 sm:$0xff]  }
 0x4e2   :  { %8092 = vmatprep.subr.bf16.mxu1 %v9727_v56  ;;  %v8309_v56 = vpack.c.bf16 %v7119_v51, %v7116_v32  ;;  %v7126_v51 = vld [vmem:[#allocation14 + $0x58] sm:$0xff] }
 0x4e3   :  { %6847 = vmatmul.mubr.bf16.vlgmr.msra.gmra.mrb[120].mxu0 %v5758_v55 }
 0x4e4   :  { %8255 = vmatpush3.bf16.msra.mxu0 %v9754_v2  ;;  %8270 = vmatprep.mubr.msk.bf16.mxu0 %vm10117_vm11, %v10116_v19 }
 0x4e5   :  { %8093 = vmatpush3.bf16.msra.mxu1 %v9728_v13  ;;  %8256 = vmatprep.subr.bf16.mxu0 %v10116_v19 }
 0x4e6   :  { %8094 = vmatprep.subr.bf16.mxu1 %v9729_v24 }
 0x4e8   :  { %8257 = vmatpush3.bf16.msra.mxu0 %v9758_v35 }
 0x4e9   :  { %8095 = vmatpush3.bf16.msra.mxu1 %v9730_v25  ;;  %8258 = vmatprep.subr.bf16.mxu0 %v10116_v19 }
 0x4ea   :  { %8096 = vmatprep.subr.bf16.mxu1 %v9731_v45 }
 0x4ec   :  { %8259 = vmatpush3.bf16.msra.mxu0 %v9762_v43 }
 0x4ed   :  { %8097 = vmatpush3.bf16.msra.mxu1 %v9732_v57  ;;  %8260 = vmatprep.subr.bf16.mxu0 %v10116_v19  ;;  %v7807_v57 = vld [vmem:[#allocation11] ss:$0 sm:$0xff] }
 0x4ee   :  { %8098 = vmatprep.subr.bf16.mxu1 %v9733_v28 }
 0x4f0   :  { %8261 = vmatpush3.bf16.msra.mxu0 %v9766_v22 }
 0x4f1   :  { %8099 = vmatpush3.bf16.msra.mxu1 %v9734_v14  ;;  %8262 = vmatprep.subr.bf16.mxu0 %v10116_v19 }
 0x4f2   :  { %8128 = vmatprep.subr.bf16.mxu1 %v9735_v54 }
 0x4f4   :  { %6727 = vmatmul.mubr.bf16.vlgmr.msra.gmra.mrb[92].mxu1 %v5752_v59  ;;  %8263 = vmatpush3.bf16.msra.mxu0 %v9770_v37 }
 0x4f5   :  { %8129 = vmatpush3.bf16.msra.mxu1 %v9736_v46  ;;  %6806 = vmatprep.mubr.bf16.mxu1 %v5757_v26 }
 0x4f6   :  { %8130 = vmatprep.subr.bf16.mxu1 %v9737_v52  ;;  %8264 = vmatprep.subr.bf16.mxu0 %v10116_v19 }
 0x4f8   :  { %8265 = vmatpush3.bf16.msra.mxu0 %v9774_v47  ;;  %v7118_v47 = vld [vmem:[#allocation14 + $0x18] sm:$0xff] }
 0x4f9   :  { %8131 = vmatpush3.bf16.msra.mxu1 %v9738_v60  ;;  %8266 = vmatprep.subr.bf16.mxu0 %v10116_v19  ;;  %v10118_v60 = vmov 0.0|0.0  }
 0x4fa   :  { %8132 = vmatprep.subr.bf16.mxu1 %v9739_v27 }
 0x4fc   :  { %8267 = vmatpush3.bf16.msra.mxu0 %v9778_v61 }
 0x4fd   :  { %8133 = vmatpush3.bf16.msra.mxu1 %v9740_v53  ;;  %8268 = vmatprep.subr.bf16.mxu0 %v10116_v19 }
 0x4fe   :  { %8134 = vmatprep.subr.bf16.mxu1 %v9741_v3 }
 0x500   :  { %8269 = vmatpush3.bf16.msra.mxu0 %v9782_v48  ;;  %v7123_v48 = vld [vmem:[#allocation14 + $0x40] sm:$0xff] }
 0x501   :  { %8135 = vmatpush3.bf16.msra.mxu1 %v9742_v34  ;;  %8341 = vmatprep.subr.bf16.mxu0 %v10118_v60 }
 0x502   :  { %8136 = vmatprep.subr.bf16.mxu1 %v9743_v0 }
 0x505   :  { %8137 = vmatpush3.bf16.msra.mxu1 %v9744_v11 }
 0x506   :  { %8138 = vmatprep.subr.bf16.mxu1 %v9745_v63 }
 0x509   :  { %8139 = vmatpush3.bf16.msra.mxu1 %v9746_v30 }
 0x50a   :  { %8140 = vmatprep.subr.bf16.mxu1 %v9747_v39 }
 0x50d   :  { %8141 = vmatpush3.bf16.msra.mxu1 %v9748_v44 }
 0x50e   :  { %8142 = vmatprep.subr.bf16.mxu1 %v9749_v23 }
 0x511   :  { %8143 = vmatpush3.bf16.msra.mxu1 %v9750_v31 }
 0x512   :  { %7034 = vmatprep.subr.bf16.mxu1 %v9753_v9 }
 0x514   :  { %6807 = vmatmul.mubr.bf16.vlgmr.msra.gmra.mrb[96].mxu1 %v5756_v12 }
 0x515   :  { %7066 = vmatprep.mubr.bf16.mxu1 %v11775_v38  ;;  %7035 = vmatpush1.bf16.msra.mxu1 %v9751_v8 }
 0x516   :  { %7036 = vmatprep.subr.bf16.mxu1 %v9757_v16 }
 0x519   :  { %7037 = vmatpush1.bf16.msra.mxu1 %v9755_v5 }
 0x51a   :  { %7038 = vmatprep.subr.bf16.mxu1 %v9761_v50 }
 0x51d   :  { %7039 = vmatpush1.bf16.msra.mxu1 %v9759_v21 }
 0x51e   :  { %7040 = vmatprep.subr.bf16.mxu1 %v9765_v15 }
 0x521   :  { %7041 = vmatpush1.bf16.msra.mxu1 %v9763_v62 }
 0x522   :  { %7042 = vmatprep.subr.bf16.mxu1 %v9769_v42 }
 0x525   :  { %7043 = vmatpush1.bf16.msra.mxu1 %v9767_v41 }
 0x526   :  { %7044 = vmatprep.subr.bf16.mxu1 %v9773_v10  ;;  %v7115_v10 = vld [vmem:[#allocation14] sm:$0xff] }
 0x529   :  { %7045 = vmatpush1.bf16.msra.mxu1 %v9771_v29 }
 0x52a   :  { %7046 = vmatprep.subr.bf16.mxu1 %v9777_v20  ;;  %v8311_v20 = vpack.c.bf16 %v7118_v47, %v7115_v10  ;;  %v7153_v10 = vld [vmem:[#allocation14 + $0x130] sm:$0xff]  ;;  %v7158_v47 = vld [vmem:[#allocation14 + $0x158] sm:$0xff] }
 0x52d   :  { %7047 = vmatpush1.bf16.msra.mxu1 %v9775_v36  ;;  %v7121_v36 = vld [vmem:[#allocation14 + $0x30] sm:$0xff] }
 0x52e   :  { %7048 = vmatprep.subr.bf16.mxu1 %v9781_v17 }
 0x531   :  { %7049 = vmatpush1.bf16.msra.mxu1 %v9779_v58  ;;  %v7124_v58 = vld [vmem:[#allocation14 + $0x48] sm:$0xff] }
 0x532   :  { %8310 = vmatprep.subr.bf16.mxu1 %v8309_v56  ;;  %v7128_v56 = vld [vmem:[#allocation14 + $0x68] sm:$0xff] }
 0x567   :  { %v8012_v6 = vpop.f32.mrb[80].mxu1 }
 0x568   :  { %v8013_v1 = vpop.f32.mrb[81].mxu1 }
 0x569   :  { %v8014_v7 = vadd.f32 %v8013_v1, %v8012_v6  ;;  %v8015_v40 = vpop.f32.mrb[82].mxu1  ;;  %v7117_v6 = vld [vmem:[#allocation14 + $0x10] sm:$0xff]  ;;  %v7120_v1 = vld [vmem:[#allocation14 + $0x28] sm:$0xff] }
 0x56a   :  { %v8016_v4 = vpop.f32.mrb[83].mxu1  ;;  %v7125_v40 = vld [vmem:[#allocation14 + $0x50] sm:$0xff]  ;;  %v8342_v61 = vpack.c.bf16 %v7120_v1, %v7117_v6 }
 0x56b   :  { %v6569_v54 = vadd.f32 %v8014_v7, %v7807_v57  ;;  %v7122_v7 = vld [vmem:[#allocation14 + $0x38] sm:$0xff]  ;;  %v7161_v6 = vld [vmem:[#allocation14 + $0x170] sm:$0xff] }
 0x56c   :  { %v8313_v32 = vpack.c.bf16 %v7125_v40, %v7122_v7  ;;  %v7130_v57 = vld [vmem:[#allocation14 + $0x78] sm:$0xff]  ;;  %v7157_v7 = vld [vmem:[#allocation14 + $0x150] sm:$0xff] }
 0x576   :  { %v8078_v13 = vpop.f32.mrb[112].mxu0 }
 0x577   :  { %v8079_v24 = vpop.f32.mrb[113].mxu0 }
 0x578   :  { %v8080_v55 = vadd.f32 %v8079_v24, %v8078_v13  ;;  %v8081_v25 = vpop.f32.mrb[114].mxu0  ;;  %v7131_v13 = vld [vmem:[#allocation14 + $0x80] sm:$0xff]  ;;  %v8315_v24 = vpack.c.bf16 %v7124_v58, %v7121_v36 }
 0x579   :  { %v8082_v45 = vpop.f32.mrb[115].mxu0  ;;  %v8345_v25 = vpack.c.bf16 %v7126_v51, %v7123_v48  ;;  %v7159_v36 = vld [vmem:[#allocation14 + $0x160] sm:$0xff] }
 0x57a   :  { %v8317_v45 = vpack.c.bf16 %v7131_v13, %v7128_v56 }
 0x587   :  { %v8034_v28 = vpop.f32.mrb[84].mxu1 }
 0x588   :  { %v8035_v14 = vpop.f32.mrb[85].mxu1 }
 0x589   :  { %v8036_v46 = vadd.f32 %v8035_v14, %v8034_v28  ;;  %v8037_v59 = vpop.f32.mrb[86].mxu1  ;;  %v7129_v28 = vld [vmem:[#allocation14 + $0x70] sm:$0xff]  ;;  %v7132_v14 = vld [vmem:[#allocation14 + $0x88] sm:$0xff] }
 0x58a   :  { %v8038_v52 = vpop.f32.mrb[87].mxu1 }
 0x58b   :  { %v6609_v26 = vadd.f32 %v8036_v46, %v6569_v54  ;;  %v7134_v54 = vld [vmem:[#allocation14 + $0x98] sm:$0xff]  ;;  %v7137_v46 = vld [vmem:[#allocation14 + $0xb0] sm:$0xff] }
 0x58c   :  { %v7133_v52 = vld [vmem:[#allocation14 + $0x90] sm:$0xff] }
 0x596   :  { %v8122_v27 = vpop.f32.mrb[116].mxu0 }
 0x597   :  { %v8123_v53 = vpop.f32.mrb[117].mxu0 }
 0x598   :  { %v8124_v3 = vadd.f32 %v8123_v53, %v8122_v27  ;;  %v8125_v34 = vpop.f32.mrb[118].mxu0  ;;  %v8321_v27 = vpack.c.bf16 %v7137_v46, %v7134_v54  ;;  %v7136_v53 = vld [vmem:[#allocation14 + $0xa8] sm:$0xff] }
 0x599   :  { %v8126_v0 = vpop.f32.mrb[119].mxu0  ;;  %v7138_v34 = vld [vmem:[#allocation14 + $0xb8] sm:$0xff] }
 0x59a   :  { %v7140_v0 = vld [vmem:[#allocation14 + $0xc8] sm:$0xff] }
 0x5a7   :  { %v8056_v11 = vpop.f32.mrb[88].mxu1 }
 0x5a8   :  { %v8057_v63 = vpop.f32.mrb[89].mxu1 }
 0x5a9   :  { %v8058_v30 = vadd.f32 %v8057_v63, %v8056_v11  ;;  %v8059_v39 = vpop.f32.mrb[90].mxu1  ;;  %v7143_v11 = vld [vmem:[#allocation14 + $0xe0] sm:$0xff]  ;;  %v8323_v63 = vpack.c.bf16 %v7136_v53, %v7133_v52 }
 0x5aa   :  { %v8060_v44 = vpop.f32.mrb[91].mxu1 }
 0x5ab   :  { %v6649_v23 = vadd.f32 %v8058_v30, %v6609_v26  ;;  %v8348_v26 = vpack.c.bf16 %v7132_v14, %v7129_v28  ;;  %v7139_v30 = vld [vmem:[#allocation14 + $0xc0] sm:$0xff]  ;;  %v8325_v44 = vpack.c.bf16 %v7143_v11, %v7140_v0 }
 0x5ad   :  { %v6689_v31 = vadd.f32 %v8080_v55, %v6649_v23  ;;  %v7127_v55 = vld [vmem:[#allocation14 + $0x60] sm:$0xff]  ;;  %v7142_v23 = vld [vmem:[#allocation14 + $0xd8] sm:$0xff] }
 0x5ae   :  { %v8319_v59 = vpack.c.bf16 %v7130_v57, %v7127_v55  ;;  %v7163_v57 = vld [vmem:[#allocation17] sm:$0x7] }
 0x5af   :  { %v7172_v54 = vrot.slane %v7163_v57, %v11774_v33 }
 0x5b6   :  { %v8166_v12 = vpop.f32.mrb[120].mxu0 }
 0x5b7   :  { %v8167_v38 = vpop.f32.mrb[121].mxu0 }
 0x5b8   :  { %v8168_v8 = vadd.f32 %v8167_v38, %v8166_v12  ;;  %v8169_v9 = vpop.f32.mrb[122].mxu0  ;;  %v7144_v12 = vld [vmem:[#allocation14 + $0xe8] sm:$0xff]  ;;  %v7146_v38 = vld [vmem:[#allocation14 + $0xf8] sm:$0xff] }
 0x5b9   :  { %v8170_v2 = vpop.f32.mrb[123].mxu0  ;;  %v8327_v9 = vpack.c.bf16 %v7142_v23, %v7139_v30 }
 0x5ba   :  { %v7145_v2 = vld [vmem:[#allocation14 + $0xf0] sm:$0xff] }
 0x5c7   :  { %v8100_v16 = vpop.f32.mrb[92].mxu1 }
 0x5c8   :  { %v8101_v5 = vpop.f32.mrb[93].mxu1 }
 0x5c9   :  { %v8102_v35 = vadd.f32 %v8101_v5, %v8100_v16  ;;  %v8103_v50 = vpop.f32.mrb[94].mxu1 }
 0x5ca   :  { %v8104_v21 = vpop.f32.mrb[95].mxu1  ;;  %v7147_v50 = vld [vmem:[#allocation14 + $0x100] sm:$0xff] }
 0x5cb   :  { %v6729_v43 = vadd.f32 %v8102_v35, %v6689_v31  ;;  %v7141_v31 = vld [vmem:[#allocation14 + $0xd0] sm:$0xff]  ;;  %v7148_v35 = vld [vmem:[#allocation14 + $0x108] sm:$0xff]  ;;  %v7150_v21 = vld [vmem:[#allocation14 + $0x118] sm:$0xff] }
 0x5cc   :  { %v8354_v16 = vpack.c.bf16 %v7144_v12, %v7141_v31 }
 0x5cd   :  { %v6769_v15 = vadd.f32 %v8124_v3, %v6729_v43  ;;  %v7135_v3 = vld [vmem:[#allocation14 + $0xa0] sm:$0xff]  ;;  %v7152_v43 = vld [vmem:[#allocation14 + $0x128] sm:$0xff] }
 0x5ce   :  { %v8351_v39 = vpack.c.bf16 %v7138_v34, %v7135_v3 }
 0x5e7   :  { %v8144_v62 = vpop.f32.mrb[96].mxu1 }
 0x5e8   :  { %v8145_v22 = vpop.f32.mrb[97].mxu1 }
 0x5e9   :  { %v8146_v42 = vadd.f32 %v8145_v22, %v8144_v62  ;;  %v8147_v41 = vpop.f32.mrb[98].mxu1  ;;  %v8331_v62 = vpack.c.bf16 %v7148_v35, %v7145_v2  ;;  %v7151_v22 = vld [vmem:[#allocation14 + $0x120] sm:$0xff] }
 0x5ea   :  { %v8148_v37 = vpop.f32.mrb[99].mxu1 }
 0x5eb   :  { %v6809_v29 = vadd.f32 %v8146_v42, %v6769_v15  ;;  %v7155_v15 = vld [vmem:[#allocation14 + $0x140] sm:$0xff]  ;;  %v8357_v42 = vpack.c.bf16 %v7150_v21, %v7147_v50  ;;  %v7154_v37 = vld [vmem:[#allocation14 + $0x138] sm:$0xff] }
 0x5ec   :  { %v8333_v41 = vpack.c.bf16 %v7155_v15, %v7152_v43  ;;  %v8335_v1 = vpack.c.bf16 %v7154_v37, %v7151_v22 }
 0x5ed   :  { %v6849_v4 = vadd.f32 %v8168_v8, %v6809_v29  ;;  %v7149_v8 = vld [vmem:[#allocation14 + $0x110] sm:$0xff]  ;;  %v7156_v29 = vld [vmem:[#allocation14 + $0x148] sm:$0xff] }
 0x5ee   :  { %v8329_v5 = vpack.c.bf16 %v7149_v8, %v7146_v38  ;;  %v8360_v40 = vpack.c.bf16 %v7156_v29, %v7153_v10 }
 0x5ef   :  { %v7961_v17 = vpack.c.bf16 %v6849_v4, %v6849_v4  ;;  %vm6854_vm12 = vcmp.gt.f32.partialorder %v6849_v4, 1e-06  ;;  %v8337_v4 = vpack.c.bf16 %v7161_v6, %v7158_v47 }
 0x5f0   :  { %vm7960_vm13 = vmpackc.low %vm6854_vm12, %vm6854_vm12 }
 0x5f1   :  { %7962 = vmatmul.mubr.msk.bf16.vlgmr.msra.gmra.mrb[100].mxu1 %vm7960_vm13, %v7961_v17  ;;  %8271 = vmatmul.mubr.msk.bf16.vlgmr.msra.gmra.mrb[124].mxu0 %vm7960_vm13, %v7961_v17 }
 0x5f2   :  { %8312 = vmatpush1.bf16.msra.mxu1 %v8311_v20  ;;  %8343 = vmatpush3.bf16.msra.mxu0 %v8342_v61  ;;  %v7160_v20 = vld [vmem:[#allocation14 + $0x168] sm:$0xff]  ;;  %v7162_v61 = vld [vmem:[#allocation14 + $0x178] sm:$0xff] }
 0x5f3   :  { %8314 = vmatprep.subr.bf16.mxu1 %v8313_v32  ;;  %7244 = vmatprep.mubr.f32.mxu1 %v10116_v19  ;;  %v8339_v17 = vpack.c.bf16 %v7160_v20, %v7157_v7  ;;  %v8363_v32 = vpack.c.bf16 %v7162_v61, %v7159_v36 }
 0x5f4   :  { %8344 = vmatprep.subr.bf16.mxu0 %v10118_v60  ;;  %8306 = vmatprep.mubr.msk.f32.mxu0 %vm10117_vm11, %v10116_v19 }
 0x5f6   :  { %8316 = vmatpush1.bf16.msra.mxu1 %v8315_v24  ;;  %8346 = vmatpush3.bf16.msra.mxu0 %v8345_v25 }
 0x5f7   :  { %8318 = vmatprep.subr.bf16.mxu1 %v8317_v45  ;;  %8347 = vmatprep.subr.bf16.mxu0 %v10118_v60  ;;  %v6889_v45 = vld [vmem:[#allocation16] sm:$0x7] }
 0x5f8   :  { %v6894_v28 = vrot.slane %v6889_v45, %v11772_v49  ;;  %v6898_v14 = vrot.slane %v6889_v45, %v11774_v33 }
 0x5fa   :  { %8320 = vmatpush1.bf16.msra.mxu1 %v8319_v59  ;;  %8349 = vmatpush3.bf16.msra.mxu0 %v8348_v26 }
 0x5fb   :  { %8322 = vmatprep.subr.bf16.mxu1 %v8321_v27  ;;  %8350 = vmatprep.subr.bf16.mxu0 %v10118_v60 }
 0x5fe   :  { %8324 = vmatpush1.bf16.msra.mxu1 %v8323_v63  ;;  %8352 = vmatpush3.bf16.msra.mxu0 %v8351_v39  ;;  %v7176_v39 = vrot.slane %v7163_v57, %v11773_v18 }
 0x5ff   :  { %8326 = vmatprep.subr.bf16.mxu1 %v8325_v44  ;;  %8353 = vmatprep.subr.bf16.mxu0 %v10118_v60  ;;  %v6902_v44 = vrot.slane %v6889_v45, %v11773_v18 }
 0x602   :  { %8328 = vmatpush1.bf16.msra.mxu1 %v8327_v9  ;;  %8355 = vmatpush3.bf16.msra.mxu0 %v8354_v16 }
 0x603   :  { %8330 = vmatprep.subr.bf16.mxu1 %v8329_v5  ;;  %8356 = vmatprep.subr.bf16.mxu0 %v10118_v60 }
 0x606   :  { %8332 = vmatpush1.bf16.msra.mxu1 %v8331_v62  ;;  %8358 = vmatpush3.bf16.msra.mxu0 %v8357_v42 }
 0x607   :  { %8334 = vmatprep.subr.bf16.mxu1 %v8333_v41  ;;  %8359 = vmatprep.subr.bf16.mxu0 %v10118_v60 }
 0x60a   :  { %8336 = vmatpush1.bf16.msra.mxu1 %v8335_v1  ;;  %8361 = vmatpush3.bf16.msra.mxu0 %v8360_v40 }
 0x60b   :  { %8338 = vmatprep.subr.bf16.mxu1 %v8337_v4  ;;  %8362 = vmatprep.subr.bf16.mxu0 %v10118_v60  ;;  %v7168_v60 = vrot.slane %v7163_v57, %v11772_v49 }
 0x60e   :  { %8340 = vmatpush1.bf16.msra.mxu1 %v8339_v17  ;;  %8364 = vmatpush3.bf16.msra.mxu0 %v8363_v32 }
 0x611   :  { %7245 = vmatmul.mubr.f32.vlgmr.msra.gmra.mrb[104].mxu1 %v10116_v19  ;;  %8307 = vmatmul.mubr.f32.vlgmr.msra.gmra.mrb[128].mxu0 %v10116_v19 }
 0x6c4   :  { %v7068_v58 = vpop.f32.mrb[100].mxu1  ;;  %v7109_v48 = vpop.f32.mrb[124].mxu0 }
 0x6c5   :  { %v7070_v51 = vpop.f32.mrb[101].mxu1  ;;  %v8272_v56 = vpop.f32.mrb[125].mxu0  ;;  %v7069_v59 = vadd.f32 %v7068_v58, %v6894_v28  ;;  %v7110_v38 = vadd.f32 %v7109_v48, %v6902_v44 }
 0x6c6   :  { %v7072_v13 = vpop.f32.mrb[102].mxu1  ;;  %v7112_v24 = vpop.f32.mrb[126].mxu0  ;;  %v7071_v53 = vadd.f32 %v7070_v51, %v6898_v14 }
 0x6c7   :  { %v7073_v55 = vpop.f32.mrb[103].mxu1  ;;  %v8273_v25 = vpop.f32.mrb[127].mxu0 }
 0x6e4   :  { %v7246_v46 = vpop.f32.mrb[104].mxu1  ;;  %v7317_v19 = vpop.f32.mrb[128].mxu0 }
 0x6e5   :  { %v7247_v52 = vadd.f32 %v7246_v46, %v7168_v60  ;;  %v7248_v26 = vpop.f32.mrb[105].mxu1  ;;  %v8308_v27 = vpop.f32.mrb[129].mxu0  ;;  %v7318_v31 = vadd.f32 %v7317_v19, %v7176_v39 }
 0x6e6   :  { %v7249_v3 = vadd.f32 %v7248_v26, %v7172_v54 }
 0x6e7   :  { %v7321_v34 = vadd.f32 %v7247_v52, %v7069_v59 }
 0x6e8   :  { %v7328_v0 = vadd.f32 %v7249_v3, %v7071_v53 }
 0x6e9   :  { %v7966_v11 = vmul.f32 -1.442695, %v7321_v34 }
 0x6ea   :  { %v7967_v63 = vmul.f32 -1.442695, %v7328_v0 }
 0x6eb   :  { %9783 = vpow2.f32 %v7966_v11 }
 0x6ec   :  { %9785 = vpow2.f32 %v7967_v63 }
 0x6f5   :  { %v9784_v30 = vpop.eup %9783 }
 0x6f6   :  { %v7325_v49 = vadd.f32 1.0, %v9784_v30  ;;  %v9786_v33 = vpop.eup %9785 }
 0x6f7   :  { %v7332_v23 = vadd.f32 1.0, %v9786_v33 }
 0x6f8   :  { %9787 = vrcp.f32 %v7325_v49 }
 0x6f9   :  { %9789 = vrcp.f32 %v7332_v23 }
 0x702   :  { %v9788_v12 = vpop.eup %9787 }
 0x703   :  { %v7335_v8 = vmul.f32 %v9788_v12, %v7318_v31  ;;  %v9790_v2 = vpop.eup %9789 }
 0x704   :  { %v7338_v16 = vsub.f32 1.0, %v9790_v2  ;;  %v7340_v50 = vmul.f32 0.0, %v9790_v2 }
 0x705   :  { %v7336_v9 = vadd.f32 %v7335_v8, %v7110_v38 }
 0x707   :  { %9791 = vtanh.f32 %v7336_v9 }
 0x711   :  { %v9792_v5 = vpop.eup %9791 }
 0x712   :  { %v7339_v35 = vmul.f32 %v9792_v5, %v7338_v16 }
 0x714   :  { %v7341_v21 = vadd.f32 %v7340_v50, %v7339_v35 }
 0x716   :  { %7342 = vst [vmem:[#allocation19] sm:$0xff] %v7341_v21 }
 0x717   :  { %10070 = shalt.err (!%p10067_p0)
}
 0x718   :  { %s10071_s16 = scalar_lea.hbm %s11758_s11, 128 }
 0x719   :  { %p10072_p1 = scmp.ne.s32.totalorder %s11758_s11, %s10071_s16  ;;  %p10075_p2 = scmp.lt.u32.totalorder %s10071_s16, %s11758_s11 }
 0x71b   :  { %p10077_p3 = pnand %p10075_p2, %p10072_p1 }
 0x71d   :  { %10080 = shalt.err (!%p10077_p3)
}
 0x71e   :  { %7352 = dma.vmem_to_hbm [thread:$0]  %s7350_s15, 128, %s11758_s11, [#allocation4]  }
 0x71f   :  { %10093 = dma.done.wait [#allocation4], 128  }
 0x720   :  { %10094 = vsyncadd [#allocation4], 4294967168 }
 0x721   :  { %7356 = vsyncpa [#allocation3], 1 }
 0x722   :  { %7357 = vsyncpa [#allocation6], 1 }
 0x723   :  { %7358 = vsyncpa [#allocation9], 1 }
 0x724   :  { %7359 = vsyncpa [#allocation12], 1 }
 0x725   :  { %7360 = vsyncpa [#allocation15], 1 }
 0x726   :  { %7361 = vsyncpa [#allocation18], 1 }
 0x727   :  { %7362 = vsyncpa [#allocation4], 1 }

</bundles_post_ra>
